<compile_context>
chip_gen: v7x
topology: tpu7x:2x2x1
jax: 0.10.0
libtpu: 0.0.40
codegen_flags: <defaults>
</compile_context>

<pallas_src>
import math
import jax
import jax.numpy as jnp
from jax.experimental import pallas as pl
from jax.experimental.pallas import tpu as pltpu

HIDDEN = 48           # hidden size (divisible by NUM_HEADS)
NUM_HEADS = 12        # default num_heads in EncoderBlock
HEAD_DIM = HIDDEN // NUM_HEADS
NUM_LAYERS = 2        # L
EPS = 1e-5            # nn.LayerNorm default eps

HP = 128              # lane-padded hidden (48 -> 128)
H4 = 4 * HIDDEN       # 192
H4P = 256             # lane-padded 4*hidden (192 -> 256)
INV_SQRT2 = 1.0 / math.sqrt(2.0)
SCALE = 1.0 / math.sqrt(HEAD_DIM)


def transformer_kernel(x_ref, rep_ref, sel_ref, mh_ref, valid_ref, lmask_ref,
                       ln1w_ref, ln1b_ref, wqkv_ref, bqkv_ref, wo_ref, bo_ref,
                       ln2w_ref, ln2b_ref, w1_ref, b1_ref, w2_ref, b2_ref,
                       fnw_ref, fnb_ref, out_ref):
    """Whole transformer in one invocation. Shapes (N = B*S tokens):
       x:(N,HP)  rep:(N*NH,N)  sel:(N,N*NH)  mh:(N*NH,HP)  valid:(N*NH,N)."""
    x = x_ref[...]
    rep = rep_ref[...]
    sel = sel_ref[...]
    mh = mh_ref[...]
    valid = valid_ref[...]
    lmask = lmask_ref[...]

    inv_h = 1.0 / HIDDEN

    def layernorm(v, w, b):
        # Padded lanes (>=HIDDEN) of v are zero by construction; stats use /48.
        mu = jnp.sum(v, axis=-1, keepdims=True) * inv_h
        d = v - mu
        var = jnp.sum((d * lmask) ** 2, axis=-1, keepdims=True) * inv_h
        return d * jax.lax.rsqrt(var + EPS) * w + b

    for l in range(NUM_LAYERS):          # static unroll, L=2
        # ---- MSA sub-block: x = MHA(LN1(x)) + x ----
        y = layernorm(x, ln1w_ref[l], ln1b_ref[l])
        qkv = jnp.dot(y, wqkv_ref[l],
                      preferred_element_type=jnp.float32) + bqkv_ref[l]
        q = qkv[:, 0:HP]            # 128-aligned lane-tile slices
        k = qkv[:, HP:2 * HP]
        v = qkv[:, 2 * HP:3 * HP]

        # q replicated per head and masked to that head's 4 columns.
        qm = jnp.dot(rep, q, preferred_element_type=jnp.float32) * mh   # (N*NH, HP)
        # scores[i, m] = <q_head, k_head> for token n=i//NH, head h=i%NH.
        s = jax.lax.dot_general(qm, k, (((1,), (1,)), ((), ())),
                                preferred_element_type=jnp.float32) * SCALE
        m = jnp.max(s, axis=-1, keepdims=True)
        e = jnp.exp(s - m) * valid        # multiplicative same-batch mask
        p = e * pl.reciprocal(jnp.sum(e, axis=-1, keepdims=True), approx=True)
        oph = jnp.dot(p, v, preferred_element_type=jnp.float32) * mh     # (N*NH, HP)
        o = jnp.dot(sel, oph, preferred_element_type=jnp.float32)        # (N, HP)
        attn = jnp.dot(o, wo_ref[l],
                       preferred_element_type=jnp.float32) + bo_ref[l]
        x = x + attn

        # ---- MLP sub-block: x = MLP(LN2(x)) + x ----
        y2 = layernorm(x, ln2w_ref[l], ln2b_ref[l])
        h1 = jnp.dot(y2, w1_ref[l],
                     preferred_element_type=jnp.float32) + b1_ref[l]
        g = 0.5 * h1 * (1.0 + jax.lax.erf(h1 * INV_SQRT2))   # exact GELU
        x = x + jnp.dot(g, w2_ref[l],
                        preferred_element_type=jnp.float32) + b2_ref[l]

    # ---- final encoder LayerNorm ----
    out_ref[...] = layernorm(x, fnw_ref[...], fnb_ref[...])


def pack_params(p):
    """Pre-transpose weights to (in, out), fuse QKV, zero-pad to lane-dense."""
    L = p['wq'].shape[0]
    H = HIDDEN

    def pad_vec(v, width):                       # (L,1,w) -> (L,1,width)
        return jnp.zeros((L, 1, width), jnp.float32).at[:, :, :v.shape[-1]].set(v)

    ln1w = pad_vec(p['ln1_w'], HP)
    ln1b = pad_vec(p['ln1_b'], HP)
    ln2w = pad_vec(p['ln2_w'], HP)
    ln2b = pad_vec(p['ln2_b'], HP)

    wq_t = jnp.swapaxes(p['wq'], 1, 2)           # (L, in, out)
    wk_t = jnp.swapaxes(p['wk'], 1, 2)
    wv_t = jnp.swapaxes(p['wv'], 1, 2)
    wqkv = jnp.zeros((L, HP, 3 * HP), jnp.float32)
    wqkv = wqkv.at[:, :H, 0:H].set(wq_t)
    wqkv = wqkv.at[:, :H, HP:HP + H].set(wk_t)
    wqkv = wqkv.at[:, :H, 2 * HP:2 * HP + H].set(wv_t)
    bqkv = jnp.zeros((L, 1, 3 * HP), jnp.float32)
    bqkv = bqkv.at[:, :, 0:H].set(p['bq'])
    bqkv = bqkv.at[:, :, HP:HP + H].set(p['bk'])
    bqkv = bqkv.at[:, :, 2 * HP:2 * HP + H].set(p['bv'])

    wo = jnp.zeros((L, HP, HP), jnp.float32).at[:, :H, :H].set(
        jnp.swapaxes(p['wo'], 1, 2))
    bo = pad_vec(p['bo'], HP)

    w1 = jnp.zeros((L, HP, H4P), jnp.float32).at[:, :H, :H4].set(
        jnp.swapaxes(p['w1'], 1, 2))
    b1 = pad_vec(p['b1'], H4P)
    w2 = jnp.zeros((L, H4P, HP), jnp.float32).at[:, :H4, :H].set(
        jnp.swapaxes(p['w2'], 1, 2))
    b2 = pad_vec(p['b2'], HP)

    fnw = jnp.zeros((1, HP), jnp.float32).at[:, :H].set(p['fn_w'])
    fnb = jnp.zeros((1, HP), jnp.float32).at[:, :H].set(p['fn_b'])

    return [ln1w, ln1b, wqkv, bqkv, wo, bo, ln2w, ln2b, w1, b1, w2, b2, fnw, fnb]


def run_transformer(x, params):
    B, S, H = x.shape
    assert H == HIDDEN
    N = B * S
    NHN = N * NUM_HEADS

    x_pad = jnp.zeros((N, HP), jnp.float32).at[:, :H].set(
        x.reshape(N, H).astype(jnp.float32))

    # Precomputed constant selection / mask matrices (built once, tiny).
    i_idx = jnp.arange(NHN)
    n_of_i = i_idx // NUM_HEADS
    h_of_i = i_idx % NUM_HEADS
    n_idx = jnp.arange(N)
    d_idx = jnp.arange(HP)
    rep = (n_of_i[:, None] == n_idx[None, :]).astype(jnp.float32)        # (NHN, N)
    sel = rep.T                                                          # (N, NHN)
    mh = ((d_idx[None, :] < H) &
          (d_idx[None, :] // HEAD_DIM == h_of_i[:, None])).astype(jnp.float32)
    valid = ((n_of_i[:, None] // S) == (n_idx[None, :] // S)).astype(jnp.float32)
    lmask = (d_idx < H).astype(jnp.float32)[None, :]                     # (1, HP)

    operands = [x_pad, rep, sel, mh, valid, lmask] + pack_params(params)

    def full_spec(a):
        nd = a.ndim
        return pl.BlockSpec(a.shape, lambda i, nd=nd: (0,) * nd)

    fn = pl.pallas_call(
        transformer_kernel,
        out_shape=jax.ShapeDtypeStruct((N, HP), jnp.float32),
        grid=(1,),
        in_specs=[full_spec(a) for a in operands],
        out_specs=pl.BlockSpec((N, HP), lambda i: (0, 0)),
        compiler_params=pltpu.CompilerParams(
            dimension_semantics=("arbitrary",)),
    )
    out_pad = fn(*operands)
    return out_pad[:, :H].reshape(B, S, H)


def init_params(key, hidden, L):
    """Deterministic synthetic parameters (shapes from EncoderBlock.__init__,
    PyTorch Linear convention: y = x @ W^T + b)."""
    h4 = 4 * hidden
    ks = jax.random.split(key, 16)
    n = lambda k, shape, s: (s * jax.random.normal(k, shape)).astype(jnp.float32)
    p = {
        'ln1_w': 1.0 + n(ks[0], (L, 1, hidden), 0.1),
        'ln1_b': n(ks[1], (L, 1, hidden), 0.1),
        'ln2_w': 1.0 + n(ks[2], (L, 1, hidden), 0.1),
        'ln2_b': n(ks[3], (L, 1, hidden), 0.1),
        'wq': n(ks[4], (L, hidden, hidden), 0.05),
        'wk': n(ks[5], (L, hidden, hidden), 0.05),
        'wv': n(ks[6], (L, hidden, hidden), 0.05),
        'wo': n(ks[7], (L, hidden, hidden), 0.05),
        'bq': n(ks[8], (L, 1, hidden), 0.02),
        'bk': n(ks[9], (L, 1, hidden), 0.02),
        'bv': n(ks[10], (L, 1, hidden), 0.02),
        'bo': n(ks[11], (L, 1, hidden), 0.02),
        'w1': n(ks[12], (L, h4, hidden), 0.05),
        'b1': n(ks[13], (L, 1, h4), 0.02),
        'w2': n(ks[14], (L, hidden, h4), 0.05),
        'b2': n(ks[15], (L, 1, hidden), 0.02),
        'fn_w': jnp.ones((1, hidden), jnp.float32),
        'fn_b': jnp.zeros((1, hidden), jnp.float32),
    }
    return p


def reference(x, p):
    """Pure-JAX reference mirroring the PyTorch forward (eval mode)."""
    x = x.astype(jnp.float32)
    L = p['wq'].shape[0]
    B, S, H = x.shape

    def ln(v, w, b):
        mu = jnp.mean(v, axis=-1, keepdims=True)
        var = jnp.mean((v - mu) ** 2, axis=-1, keepdims=True)
        return (v - mu) * jax.lax.rsqrt(var + EPS) * w + b

    for l in range(L):
        y = ln(x, p['ln1_w'][l, 0], p['ln1_b'][l, 0])
        q = y @ p['wq'][l].T + p['bq'][l, 0]
        k = y @ p['wk'][l].T + p['bk'][l, 0]
        v = y @ p['wv'][l].T + p['bv'][l, 0]
        split = lambda t: t.reshape(B, S, NUM_HEADS, HEAD_DIM).transpose(0, 2, 1, 3)
        qh, kh, vh = split(q), split(k), split(v)
        s = jnp.einsum('bhqd,bhkd->bhqk', qh, kh) / math.sqrt(HEAD_DIM)
        pw = jax.nn.softmax(s, axis=-1)
        oh = jnp.einsum('bhqk,bhkd->bhqd', pw, vh)
        o = oh.transpose(0, 2, 1, 3).reshape(B, S, H)
        x = x + (o @ p['wo'][l].T + p['bo'][l, 0])
        y2 = ln(x, p['ln2_w'][l, 0], p['ln2_b'][l, 0])
        h1 = y2 @ p['w1'][l].T + p['b1'][l, 0]
        g = 0.5 * h1 * (1.0 + jax.lax.erf(h1 / math.sqrt(2.0)))
        x = x + (g @ p['w2'][l].T + p['b2'][l, 0])
    return ln(x, p['fn_w'][0], p['fn_b'][0])


if __name__ == "__main__":
    key = jax.random.PRNGKey(0)
    kx, kp = jax.random.split(key)
    B, S = 2, 8
    x = jax.random.normal(kx, (B, S, HIDDEN), dtype=jnp.float32)
    params = init_params(kp, HIDDEN, NUM_LAYERS)

    out = run_transformer(x, params)
    out = jax.block_until_ready(out)

    ref = reference(x, params)
    assert out.shape == (B, S, HIDDEN)
    # Tolerance accounts for the approximate (EUP) softmax reciprocal; all
    # other math is exact f32.
    assert jnp.allclose(out, ref, atol=5e-3, rtol=5e-3), \
        f"max abs err = {jnp.max(jnp.abs(out - ref))}"
    print("KERNEL_OK")
</pallas_src>

<mosaic_0001>
module attributes {stable_mosaic.version = 11 : i64} {
  func.func @transformer_kernel(%arg0: i32, %arg1: memref<16x128xf32, #tpu.memory_space<vmem>>, %arg2: memref<192x16xf32, #tpu.memory_space<vmem>>, %arg3: memref<16x192xf32, #tpu.memory_space<vmem>>, %arg4: memref<192x128xf32, #tpu.memory_space<vmem>>, %arg5: memref<192x16xf32, #tpu.memory_space<vmem>>, %arg6: memref<1x128xf32, #tpu.memory_space<vmem>>, %arg7: memref<2x1x128xf32, #tpu.memory_space<vmem>>, %arg8: memref<2x1x128xf32, #tpu.memory_space<vmem>>, %arg9: memref<2x128x384xf32, #tpu.memory_space<vmem>>, %arg10: memref<2x1x384xf32, #tpu.memory_space<vmem>>, %arg11: memref<2x128x128xf32, #tpu.memory_space<vmem>>, %arg12: memref<2x1x128xf32, #tpu.memory_space<vmem>>, %arg13: memref<2x1x128xf32, #tpu.memory_space<vmem>>, %arg14: memref<2x1x128xf32, #tpu.memory_space<vmem>>, %arg15: memref<2x128x256xf32, #tpu.memory_space<vmem>>, %arg16: memref<2x1x256xf32, #tpu.memory_space<vmem>>, %arg17: memref<2x256x128xf32, #tpu.memory_space<vmem>>, %arg18: memref<2x1x128xf32, #tpu.memory_space<vmem>>, %arg19: memref<1x128xf32, #tpu.memory_space<vmem>>, %arg20: memref<1x128xf32, #tpu.memory_space<vmem>>, %arg21: memref<16x128xf32, #tpu.memory_space<vmem>>) attributes {dimension_semantics = [#tpu.dimension_semantics<arbitrary>], iteration_bounds = array<i64: 1>, scalar_prefetch = 0 : i64, scratch_operands = 0 : i64, tpu.core_type = #tpu.core_type<tc>, window_params = [{pipeline_mode = #tpu.pipeline_mode<synchronous>, transform_indices = @transform_0, window_bounds = array<i64: 16, 128>}, {pipeline_mode = #tpu.pipeline_mode<synchronous>, transform_indices = @transform_1, window_bounds = array<i64: 192, 16>}, {pipeline_mode = #tpu.pipeline_mode<synchronous>, transform_indices = @transform_2, window_bounds = array<i64: 16, 192>}, {pipeline_mode = #tpu.pipeline_mode<synchronous>, transform_indices = @transform_3, window_bounds = array<i64: 192, 128>}, {pipeline_mode = #tpu.pipeline_mode<synchronous>, transform_indices = @transform_4, window_bounds = array<i64: 192, 16>}, {pipeline_mode = #tpu.pipeline_mode<synchronous>, transform_indices = @transform_5, window_bounds = array<i64: 1, 128>}, {pipeline_mode = #tpu.pipeline_mode<synchronous>, transform_indices = @transform_6, window_bounds = array<i64: 2, 1, 128>}, {pipeline_mode = #tpu.pipeline_mode<synchronous>, transform_indices = @transform_7, window_bounds = array<i64: 2, 1, 128>}, {pipeline_mode = #tpu.pipeline_mode<synchronous>, transform_indices = @transform_8, window_bounds = array<i64: 2, 128, 384>}, {pipeline_mode = #tpu.pipeline_mode<synchronous>, transform_indices = @transform_9, window_bounds = array<i64: 2, 1, 384>}, {pipeline_mode = #tpu.pipeline_mode<synchronous>, transform_indices = @transform_10, window_bounds = array<i64: 2, 128, 128>}, {pipeline_mode = #tpu.pipeline_mode<synchronous>, transform_indices = @transform_11, window_bounds = array<i64: 2, 1, 128>}, {pipeline_mode = #tpu.pipeline_mode<synchronous>, transform_indices = @transform_12, window_bounds = array<i64: 2, 1, 128>}, {pipeline_mode = #tpu.pipeline_mode<synchronous>, transform_indices = @transform_13, window_bounds = array<i64: 2, 1, 128>}, {pipeline_mode = #tpu.pipeline_mode<synchronous>, transform_indices = @transform_14, window_bounds = array<i64: 2, 128, 256>}, {pipeline_mode = #tpu.pipeline_mode<synchronous>, transform_indices = @transform_15, window_bounds = array<i64: 2, 1, 256>}, {pipeline_mode = #tpu.pipeline_mode<synchronous>, transform_indices = @transform_16, window_bounds = array<i64: 2, 256, 128>}, {pipeline_mode = #tpu.pipeline_mode<synchronous>, transform_indices = @transform_17, window_bounds = array<i64: 2, 1, 128>}, {pipeline_mode = #tpu.pipeline_mode<synchronous>, transform_indices = @transform_18, window_bounds = array<i64: 1, 128>}, {pipeline_mode = #tpu.pipeline_mode<synchronous>, transform_indices = @transform_19, window_bounds = array<i64: 1, 128>}, {pipeline_mode = #tpu.pipeline_mode<synchronous>, transform_indices = @transform_20, window_bounds = array<i64: 16, 128>}]} {
    %c0 = arith.constant 0 : index
    %c0_0 = arith.constant 0 : index
    %0 = vector.load %arg1[%c0, %c0_0] : memref<16x128xf32, #tpu.memory_space<vmem>>, vector<16x128xf32>
    %c0_1 = arith.constant 0 : index
    %c0_2 = arith.constant 0 : index
    %1 = vector.load %arg2[%c0_1, %c0_2] : memref<192x16xf32, #tpu.memory_space<vmem>>, vector<192x16xf32>
    %c0_3 = arith.constant 0 : index
    %c0_4 = arith.constant 0 : index
    %2 = vector.load %arg3[%c0_3, %c0_4] : memref<16x192xf32, #tpu.memory_space<vmem>>, vector<16x192xf32>
    %c0_5 = arith.constant 0 : index
    %c0_6 = arith.constant 0 : index
    %3 = vector.load %arg4[%c0_5, %c0_6] : memref<192x128xf32, #tpu.memory_space<vmem>>, vector<192x128xf32>
    %c0_7 = arith.constant 0 : index
    %c0_8 = arith.constant 0 : index
    %4 = vector.load %arg5[%c0_7, %c0_8] : memref<192x16xf32, #tpu.memory_space<vmem>>, vector<192x16xf32>
    %c0_9 = arith.constant 0 : index
    %c0_10 = arith.constant 0 : index
    %5 = vector.load %arg6[%c0_9, %c0_10] : memref<1x128xf32, #tpu.memory_space<vmem>>, vector<1x128xf32>
    %c0_11 = arith.constant 0 : index
    %c0_12 = arith.constant 0 : index
    %c0_13 = arith.constant 0 : index
    %6 = vector.load %arg7[%c0_11, %c0_12, %c0_13] : memref<2x1x128xf32, #tpu.memory_space<vmem>>, vector<1x1x128xf32>
    %7 = vector.shape_cast %6 : vector<1x1x128xf32> to vector<1x128xf32>
    %c0_14 = arith.constant 0 : index
    %c0_15 = arith.constant 0 : index
    %c0_16 = arith.constant 0 : index
    %8 = vector.load %arg8[%c0_14, %c0_15, %c0_16] : memref<2x1x128xf32, #tpu.memory_space<vmem>>, vector<1x1x128xf32>
    %9 = vector.shape_cast %8 : vector<1x1x128xf32> to vector<1x128xf32>
    %cst = arith.constant dense<0.000000e+00> : vector<16xf32>
    %10 = vector.multi_reduction <add>, %0, %cst [1] : vector<16x128xf32> to vector<16xf32>
    %11 = vector.shape_cast %10 : vector<16xf32> to vector<16x1xf32>
    %cst_17 = arith.constant 0.020833334 : f32
    %12 = vector.broadcast %cst_17 : f32 to vector<16x1xf32>
    %13 = arith.mulf %11, %12 : vector<16x1xf32>
    %14 = vector.broadcast %13 : vector<16x1xf32> to vector<16x128xf32>
    %15 = arith.subf %0, %14 : vector<16x128xf32>
    %16 = vector.broadcast %5 : vector<1x128xf32> to vector<16x128xf32>
    %17 = arith.mulf %15, %16 : vector<16x128xf32>
    %18 = arith.mulf %17, %17 : vector<16x128xf32>
    %cst_18 = arith.constant dense<0.000000e+00> : vector<16xf32>
    %19 = vector.multi_reduction <add>, %18, %cst_18 [1] : vector<16x128xf32> to vector<16xf32>
    %20 = vector.shape_cast %19 : vector<16xf32> to vector<16x1xf32>
    %cst_19 = arith.constant 0.020833334 : f32
    %21 = vector.broadcast %cst_19 : f32 to vector<16x1xf32>
    %22 = arith.mulf %20, %21 : vector<16x1xf32>
    %cst_20 = arith.constant 9.99999974E-6 : f32
    %23 = vector.broadcast %cst_20 : f32 to vector<16x1xf32>
    %24 = arith.addf %22, %23 : vector<16x1xf32>
    %25 = math.rsqrt %24 : vector<16x1xf32>
    %26 = vector.broadcast %25 : vector<16x1xf32> to vector<16x128xf32>
    %27 = arith.mulf %15, %26 : vector<16x128xf32>
    %28 = vector.broadcast %7 : vector<1x128xf32> to vector<16x128xf32>
    %29 = arith.mulf %27, %28 : vector<16x128xf32>
    %30 = vector.broadcast %9 : vector<1x128xf32> to vector<16x128xf32>
    %31 = arith.addf %29, %30 : vector<16x128xf32>
    %c0_21 = arith.constant 0 : index
    %c0_22 = arith.constant 0 : index
    %c0_23 = arith.constant 0 : index
    %32 = vector.load %arg9[%c0_21, %c0_22, %c0_23] : memref<2x128x384xf32, #tpu.memory_space<vmem>>, vector<1x128x384xf32>
    %33 = vector.shape_cast %32 : vector<1x128x384xf32> to vector<128x384xf32>
    %cst_24 = arith.constant dense<0.000000e+00> : vector<16x384xf32>
    %34 = tpu.matmul %31, %33, %cst_24 {dimension_numbers = #tpu.dot_dimension_numbers<[1], [0], [0], [1], [0, 0, 1, 1], [], []>} : vector<16x128xf32>, vector<128x384xf32>, vector<16x384xf32> -> vector<16x384xf32>
    %c0_25 = arith.constant 0 : index
    %c0_26 = arith.constant 0 : index
    %c0_27 = arith.constant 0 : index
    %35 = vector.load %arg10[%c0_25, %c0_26, %c0_27] : memref<2x1x384xf32, #tpu.memory_space<vmem>>, vector<1x1x384xf32>
    %36 = vector.shape_cast %35 : vector<1x1x384xf32> to vector<1x384xf32>
    %37 = vector.broadcast %36 : vector<1x384xf32> to vector<16x384xf32>
    %38 = arith.addf %34, %37 : vector<16x384xf32>
    %39 = vector.extract_strided_slice %38 {offsets = [0, 0], sizes = [16, 128], strides = [1, 1]} : vector<16x384xf32> to vector<16x128xf32>
    %40 = vector.extract_strided_slice %38 {offsets = [0, 128], sizes = [16, 128], strides = [1, 1]} : vector<16x384xf32> to vector<16x128xf32>
    %41 = vector.extract_strided_slice %38 {offsets = [0, 256], sizes = [16, 128], strides = [1, 1]} : vector<16x384xf32> to vector<16x128xf32>
    %cst_28 = arith.constant dense<0.000000e+00> : vector<192x128xf32>
    %42 = tpu.matmul %1, %39, %cst_28 {dimension_numbers = #tpu.dot_dimension_numbers<[1], [0], [0], [1], [0, 0, 1, 1], [], []>} : vector<192x16xf32>, vector<16x128xf32>, vector<192x128xf32> -> vector<192x128xf32>
    %43 = arith.mulf %42, %3 : vector<192x128xf32>
    %cst_29 = arith.constant dense<0.000000e+00> : vector<192x16xf32>
    %44 = tpu.matmul %43, %40, %cst_29 {dimension_numbers = #tpu.dot_dimension_numbers<[1], [1], [0], [0], [0, 0, 1, 0], [], []>} : vector<192x128xf32>, vector<16x128xf32>, vector<192x16xf32> -> vector<192x16xf32>
    %cst_30 = arith.constant 5.000000e-01 : f32
    %45 = vector.broadcast %cst_30 : f32 to vector<192x16xf32>
    %46 = arith.mulf %44, %45 : vector<192x16xf32>
    %cst_31 = arith.constant dense<0xFF800000> : vector<192xf32>
    %47 = vector.multi_reduction <maximumf>, %46, %cst_31 [1] : vector<192x16xf32> to vector<192xf32>
    %48 = vector.shape_cast %47 : vector<192xf32> to vector<192x1xf32>
    %49 = vector.broadcast %48 : vector<192x1xf32> to vector<192x16xf32>
    %50 = arith.subf %46, %49 : vector<192x16xf32>
    %51 = math.exp %50 : vector<192x16xf32>
    %52 = arith.mulf %51, %4 : vector<192x16xf32>
    %cst_32 = arith.constant dense<0.000000e+00> : vector<192xf32>
    %53 = vector.multi_reduction <add>, %52, %cst_32 [1] : vector<192x16xf32> to vector<192xf32>
    %54 = vector.shape_cast %53 : vector<192xf32> to vector<192x1xf32>
    %55 = tpu.reciprocal %54 {approx = true} : vector<192x1xf32> -> vector<192x1xf32>
    %56 = vector.broadcast %55 : vector<192x1xf32> to vector<192x16xf32>
    %57 = arith.mulf %52, %56 : vector<192x16xf32>
    %cst_33 = arith.constant dense<0.000000e+00> : vector<192x128xf32>
    %58 = tpu.matmul %57, %41, %cst_33 {dimension_numbers = #tpu.dot_dimension_numbers<[1], [0], [0], [1], [0, 0, 1, 1], [], []>} : vector<192x16xf32>, vector<16x128xf32>, vector<192x128xf32> -> vector<192x128xf32>
    %59 = arith.mulf %58, %3 : vector<192x128xf32>
    %cst_34 = arith.constant dense<0.000000e+00> : vector<16x128xf32>
    %60 = tpu.matmul %2, %59, %cst_34 {dimension_numbers = #tpu.dot_dimension_numbers<[1], [0], [0], [1], [0, 0, 1, 1], [], []>} : vector<16x192xf32>, vector<192x128xf32>, vector<16x128xf32> -> vector<16x128xf32>
    %c0_35 = arith.constant 0 : index
    %c0_36 = arith.constant 0 : index
    %c0_37 = arith.constant 0 : index
    %61 = vector.load %arg11[%c0_35, %c0_36, %c0_37] : memref<2x128x128xf32, #tpu.memory_space<vmem>>, vector<1x128x128xf32>
    %62 = vector.shape_cast %61 : vector<1x128x128xf32> to vector<128x128xf32>
    %cst_38 = arith.constant dense<0.000000e+00> : vector<16x128xf32>
    %63 = tpu.matmul %60, %62, %cst_38 {dimension_numbers = #tpu.dot_dimension_numbers<[1], [0], [0], [1], [0, 0, 1, 1], [], []>} : vector<16x128xf32>, vector<128x128xf32>, vector<16x128xf32> -> vector<16x128xf32>
    %c0_39 = arith.constant 0 : index
    %c0_40 = arith.constant 0 : index
    %c0_41 = arith.constant 0 : index
    %64 = vector.load %arg12[%c0_39, %c0_40, %c0_41] : memref<2x1x128xf32, #tpu.memory_space<vmem>>, vector<1x1x128xf32>
    %65 = vector.shape_cast %64 : vector<1x1x128xf32> to vector<1x128xf32>
    %66 = vector.broadcast %65 : vector<1x128xf32> to vector<16x128xf32>
    %67 = arith.addf %63, %66 : vector<16x128xf32>
    %68 = arith.addf %0, %67 : vector<16x128xf32>
    %c0_42 = arith.constant 0 : index
    %c0_43 = arith.constant 0 : index
    %c0_44 = arith.constant 0 : index
    %69 = vector.load %arg13[%c0_42, %c0_43, %c0_44] : memref<2x1x128xf32, #tpu.memory_space<vmem>>, vector<1x1x128xf32>
    %70 = vector.shape_cast %69 : vector<1x1x128xf32> to vector<1x128xf32>
    %c0_45 = arith.constant 0 : index
    %c0_46 = arith.constant 0 : index
    %c0_47 = arith.constant 0 : index
    %71 = vector.load %arg14[%c0_45, %c0_46, %c0_47] : memref<2x1x128xf32, #tpu.memory_space<vmem>>, vector<1x1x128xf32>
    %72 = vector.shape_cast %71 : vector<1x1x128xf32> to vector<1x128xf32>
    %cst_48 = arith.constant dense<0.000000e+00> : vector<16xf32>
    %73 = vector.multi_reduction <add>, %68, %cst_48 [1] : vector<16x128xf32> to vector<16xf32>
    %74 = vector.shape_cast %73 : vector<16xf32> to vector<16x1xf32>
    %cst_49 = arith.constant 0.020833334 : f32
    %75 = vector.broadcast %cst_49 : f32 to vector<16x1xf32>
    %76 = arith.mulf %74, %75 : vector<16x1xf32>
    %77 = vector.broadcast %76 : vector<16x1xf32> to vector<16x128xf32>
    %78 = arith.subf %68, %77 : vector<16x128xf32>
    %79 = vector.broadcast %5 : vector<1x128xf32> to vector<16x128xf32>
    %80 = arith.mulf %78, %79 : vector<16x128xf32>
    %81 = arith.mulf %80, %80 : vector<16x128xf32>
    %cst_50 = arith.constant dense<0.000000e+00> : vector<16xf32>
    %82 = vector.multi_reduction <add>, %81, %cst_50 [1] : vector<16x128xf32> to vector<16xf32>
    %83 = vector.shape_cast %82 : vector<16xf32> to vector<16x1xf32>
    %cst_51 = arith.constant 0.020833334 : f32
    %84 = vector.broadcast %cst_51 : f32 to vector<16x1xf32>
    %85 = arith.mulf %83, %84 : vector<16x1xf32>
    %cst_52 = arith.constant 9.99999974E-6 : f32
    %86 = vector.broadcast %cst_52 : f32 to vector<16x1xf32>
    %87 = arith.addf %85, %86 : vector<16x1xf32>
    %88 = math.rsqrt %87 : vector<16x1xf32>
    %89 = vector.broadcast %88 : vector<16x1xf32> to vector<16x128xf32>
    %90 = arith.mulf %78, %89 : vector<16x128xf32>
    %91 = vector.broadcast %70 : vector<1x128xf32> to vector<16x128xf32>
    %92 = arith.mulf %90, %91 : vector<16x128xf32>
    %93 = vector.broadcast %72 : vector<1x128xf32> to vector<16x128xf32>
    %94 = arith.addf %92, %93 : vector<16x128xf32>
    %c0_53 = arith.constant 0 : index
    %c0_54 = arith.constant 0 : index
    %c0_55 = arith.constant 0 : index
    %95 = vector.load %arg15[%c0_53, %c0_54, %c0_55] : memref<2x128x256xf32, #tpu.memory_space<vmem>>, vector<1x128x256xf32>
    %96 = vector.shape_cast %95 : vector<1x128x256xf32> to vector<128x256xf32>
    %cst_56 = arith.constant dense<0.000000e+00> : vector<16x256xf32>
    %97 = tpu.matmul %94, %96, %cst_56 {dimension_numbers = #tpu.dot_dimension_numbers<[1], [0], [0], [1], [0, 0, 1, 1], [], []>} : vector<16x128xf32>, vector<128x256xf32>, vector<16x256xf32> -> vector<16x256xf32>
    %c0_57 = arith.constant 0 : index
    %c0_58 = arith.constant 0 : index
    %c0_59 = arith.constant 0 : index
    %98 = vector.load %arg16[%c0_57, %c0_58, %c0_59] : memref<2x1x256xf32, #tpu.memory_space<vmem>>, vector<1x1x256xf32>
    %99 = vector.shape_cast %98 : vector<1x1x256xf32> to vector<1x256xf32>
    %100 = vector.broadcast %99 : vector<1x256xf32> to vector<16x256xf32>
    %101 = arith.addf %97, %100 : vector<16x256xf32>
    %cst_60 = arith.constant 5.000000e-01 : f32
    %102 = vector.broadcast %cst_60 : f32 to vector<16x256xf32>
    %103 = arith.mulf %102, %101 : vector<16x256xf32>
    %cst_61 = arith.constant 0.707106769 : f32
    %104 = vector.broadcast %cst_61 : f32 to vector<16x256xf32>
    %105 = arith.mulf %101, %104 : vector<16x256xf32>
    %106 = math.erf %105 : vector<16x256xf32>
    %cst_62 = arith.constant 1.000000e+00 : f32
    %107 = vector.broadcast %cst_62 : f32 to vector<16x256xf32>
    %108 = arith.addf %107, %106 : vector<16x256xf32>
    %109 = arith.mulf %103, %108 : vector<16x256xf32>
    %c0_63 = arith.constant 0 : index
    %c0_64 = arith.constant 0 : index
    %c0_65 = arith.constant 0 : index
    %110 = vector.load %arg17[%c0_63, %c0_64, %c0_65] : memref<2x256x128xf32, #tpu.memory_space<vmem>>, vector<1x256x128xf32>
    %111 = vector.shape_cast %110 : vector<1x256x128xf32> to vector<256x128xf32>
    %cst_66 = arith.constant dense<0.000000e+00> : vector<16x128xf32>
    %112 = tpu.matmul %109, %111, %cst_66 {dimension_numbers = #tpu.dot_dimension_numbers<[1], [0], [0], [1], [0, 0, 1, 1], [], []>} : vector<16x256xf32>, vector<256x128xf32>, vector<16x128xf32> -> vector<16x128xf32>
    %113 = arith.addf %68, %112 : vector<16x128xf32>
    %c0_67 = arith.constant 0 : index
    %c0_68 = arith.constant 0 : index
    %c0_69 = arith.constant 0 : index
    %114 = vector.load %arg18[%c0_67, %c0_68, %c0_69] : memref<2x1x128xf32, #tpu.memory_space<vmem>>, vector<1x1x128xf32>
    %115 = vector.shape_cast %114 : vector<1x1x128xf32> to vector<1x128xf32>
    %116 = vector.broadcast %115 : vector<1x128xf32> to vector<16x128xf32>
    %117 = arith.addf %113, %116 : vector<16x128xf32>
    %c1 = arith.constant 1 : index
    %c0_70 = arith.constant 0 : index
    %c0_71 = arith.constant 0 : index
    %118 = vector.load %arg7[%c1, %c0_70, %c0_71] : memref<2x1x128xf32, #tpu.memory_space<vmem>>, vector<1x1x128xf32>
    %119 = vector.shape_cast %118 : vector<1x1x128xf32> to vector<1x128xf32>
    %c1_72 = arith.constant 1 : index
    %c0_73 = arith.constant 0 : index
    %c0_74 = arith.constant 0 : index
    %120 = vector.load %arg8[%c1_72, %c0_73, %c0_74] : memref<2x1x128xf32, #tpu.memory_space<vmem>>, vector<1x1x128xf32>
    %121 = vector.shape_cast %120 : vector<1x1x128xf32> to vector<1x128xf32>
    %cst_75 = arith.constant dense<0.000000e+00> : vector<16xf32>
    %122 = vector.multi_reduction <add>, %117, %cst_75 [1] : vector<16x128xf32> to vector<16xf32>
    %123 = vector.shape_cast %122 : vector<16xf32> to vector<16x1xf32>
    %cst_76 = arith.constant 0.020833334 : f32
    %124 = vector.broadcast %cst_76 : f32 to vector<16x1xf32>
    %125 = arith.mulf %123, %124 : vector<16x1xf32>
    %126 = vector.broadcast %125 : vector<16x1xf32> to vector<16x128xf32>
    %127 = arith.subf %117, %126 : vector<16x128xf32>
    %128 = vector.broadcast %5 : vector<1x128xf32> to vector<16x128xf32>
    %129 = arith.mulf %127, %128 : vector<16x128xf32>
    %130 = arith.mulf %129, %129 : vector<16x128xf32>
    %cst_77 = arith.constant dense<0.000000e+00> : vector<16xf32>
    %131 = vector.multi_reduction <add>, %130, %cst_77 [1] : vector<16x128xf32> to vector<16xf32>
    %132 = vector.shape_cast %131 : vector<16xf32> to vector<16x1xf32>
    %cst_78 = arith.constant 0.020833334 : f32
    %133 = vector.broadcast %cst_78 : f32 to vector<16x1xf32>
    %134 = arith.mulf %132, %133 : vector<16x1xf32>
    %cst_79 = arith.constant 9.99999974E-6 : f32
    %135 = vector.broadcast %cst_79 : f32 to vector<16x1xf32>
    %136 = arith.addf %134, %135 : vector<16x1xf32>
    %137 = math.rsqrt %136 : vector<16x1xf32>
    %138 = vector.broadcast %137 : vector<16x1xf32> to vector<16x128xf32>
    %139 = arith.mulf %127, %138 : vector<16x128xf32>
    %140 = vector.broadcast %119 : vector<1x128xf32> to vector<16x128xf32>
    %141 = arith.mulf %139, %140 : vector<16x128xf32>
    %142 = vector.broadcast %121 : vector<1x128xf32> to vector<16x128xf32>
    %143 = arith.addf %141, %142 : vector<16x128xf32>
    %c1_80 = arith.constant 1 : index
    %c0_81 = arith.constant 0 : index
    %c0_82 = arith.constant 0 : index
    %144 = vector.load %arg9[%c1_80, %c0_81, %c0_82] : memref<2x128x384xf32, #tpu.memory_space<vmem>>, vector<1x128x384xf32>
    %145 = vector.shape_cast %144 : vector<1x128x384xf32> to vector<128x384xf32>
    %cst_83 = arith.constant dense<0.000000e+00> : vector<16x384xf32>
    %146 = tpu.matmul %143, %145, %cst_83 {dimension_numbers = #tpu.dot_dimension_numbers<[1], [0], [0], [1], [0, 0, 1, 1], [], []>} : vector<16x128xf32>, vector<128x384xf32>, vector<16x384xf32> -> vector<16x384xf32>
    %c1_84 = arith.constant 1 : index
    %c0_85 = arith.constant 0 : index
    %c0_86 = arith.constant 0 : index
    %147 = vector.load %arg10[%c1_84, %c0_85, %c0_86] : memref<2x1x384xf32, #tpu.memory_space<vmem>>, vector<1x1x384xf32>
    %148 = vector.shape_cast %147 : vector<1x1x384xf32> to vector<1x384xf32>
    %149 = vector.broadcast %148 : vector<1x384xf32> to vector<16x384xf32>
    %150 = arith.addf %146, %149 : vector<16x384xf32>
    %151 = vector.extract_strided_slice %150 {offsets = [0, 0], sizes = [16, 128], strides = [1, 1]} : vector<16x384xf32> to vector<16x128xf32>
    %152 = vector.extract_strided_slice %150 {offsets = [0, 128], sizes = [16, 128], strides = [1, 1]} : vector<16x384xf32> to vector<16x128xf32>
    %153 = vector.extract_strided_slice %150 {offsets = [0, 256], sizes = [16, 128], strides = [1, 1]} : vector<16x384xf32> to vector<16x128xf32>
    %cst_87 = arith.constant dense<0.000000e+00> : vector<192x128xf32>
    %154 = tpu.matmul %1, %151, %cst_87 {dimension_numbers = #tpu.dot_dimension_numbers<[1], [0], [0], [1], [0, 0, 1, 1], [], []>} : vector<192x16xf32>, vector<16x128xf32>, vector<192x128xf32> -> vector<192x128xf32>
    %155 = arith.mulf %154, %3 : vector<192x128xf32>
    %cst_88 = arith.constant dense<0.000000e+00> : vector<192x16xf32>
    %156 = tpu.matmul %155, %152, %cst_88 {dimension_numbers = #tpu.dot_dimension_numbers<[1], [1], [0], [0], [0, 0, 1, 0], [], []>} : vector<192x128xf32>, vector<16x128xf32>, vector<192x16xf32> -> vector<192x16xf32>
    %cst_89 = arith.constant 5.000000e-01 : f32
    %157 = vector.broadcast %cst_89 : f32 to vector<192x16xf32>
    %158 = arith.mulf %156, %157 : vector<192x16xf32>
    %cst_90 = arith.constant dense<0xFF800000> : vector<192xf32>
    %159 = vector.multi_reduction <maximumf>, %158, %cst_90 [1] : vector<192x16xf32> to vector<192xf32>
    %160 = vector.shape_cast %159 : vector<192xf32> to vector<192x1xf32>
    %161 = vector.broadcast %160 : vector<192x1xf32> to vector<192x16xf32>
    %162 = arith.subf %158, %161 : vector<192x16xf32>
    %163 = math.exp %162 : vector<192x16xf32>
    %164 = arith.mulf %163, %4 : vector<192x16xf32>
    %cst_91 = arith.constant dense<0.000000e+00> : vector<192xf32>
    %165 = vector.multi_reduction <add>, %164, %cst_91 [1] : vector<192x16xf32> to vector<192xf32>
    %166 = vector.shape_cast %165 : vector<192xf32> to vector<192x1xf32>
    %167 = tpu.reciprocal %166 {approx = true} : vector<192x1xf32> -> vector<192x1xf32>
    %168 = vector.broadcast %167 : vector<192x1xf32> to vector<192x16xf32>
    %169 = arith.mulf %164, %168 : vector<192x16xf32>
    %cst_92 = arith.constant dense<0.000000e+00> : vector<192x128xf32>
    %170 = tpu.matmul %169, %153, %cst_92 {dimension_numbers = #tpu.dot_dimension_numbers<[1], [0], [0], [1], [0, 0, 1, 1], [], []>} : vector<192x16xf32>, vector<16x128xf32>, vector<192x128xf32> -> vector<192x128xf32>
    %171 = arith.mulf %170, %3 : vector<192x128xf32>
    %cst_93 = arith.constant dense<0.000000e+00> : vector<16x128xf32>
    %172 = tpu.matmul %2, %171, %cst_93 {dimension_numbers = #tpu.dot_dimension_numbers<[1], [0], [0], [1], [0, 0, 1, 1], [], []>} : vector<16x192xf32>, vector<192x128xf32>, vector<16x128xf32> -> vector<16x128xf32>
    %c1_94 = arith.constant 1 : index
    %c0_95 = arith.constant 0 : index
    %c0_96 = arith.constant 0 : index
    %173 = vector.load %arg11[%c1_94, %c0_95, %c0_96] : memref<2x128x128xf32, #tpu.memory_space<vmem>>, vector<1x128x128xf32>
    %174 = vector.shape_cast %173 : vector<1x128x128xf32> to vector<128x128xf32>
    %cst_97 = arith.constant dense<0.000000e+00> : vector<16x128xf32>
    %175 = tpu.matmul %172, %174, %cst_97 {dimension_numbers = #tpu.dot_dimension_numbers<[1], [0], [0], [1], [0, 0, 1, 1], [], []>} : vector<16x128xf32>, vector<128x128xf32>, vector<16x128xf32> -> vector<16x128xf32>
    %c1_98 = arith.constant 1 : index
    %c0_99 = arith.constant 0 : index
    %c0_100 = arith.constant 0 : index
    %176 = vector.load %arg12[%c1_98, %c0_99, %c0_100] : memref<2x1x128xf32, #tpu.memory_space<vmem>>, vector<1x1x128xf32>
    %177 = vector.shape_cast %176 : vector<1x1x128xf32> to vector<1x128xf32>
    %178 = vector.broadcast %177 : vector<1x128xf32> to vector<16x128xf32>
    %179 = arith.addf %175, %178 : vector<16x128xf32>
    %180 = arith.addf %117, %179 : vector<16x128xf32>
    %c1_101 = arith.constant 1 : index
    %c0_102 = arith.constant 0 : index
    %c0_103 = arith.constant 0 : index
    %181 = vector.load %arg13[%c1_101, %c0_102, %c0_103] : memref<2x1x128xf32, #tpu.memory_space<vmem>>, vector<1x1x128xf32>
    %182 = vector.shape_cast %181 : vector<1x1x128xf32> to vector<1x128xf32>
    %c1_104 = arith.constant 1 : index
    %c0_105 = arith.constant 0 : index
    %c0_106 = arith.constant 0 : index
    %183 = vector.load %arg14[%c1_104, %c0_105, %c0_106] : memref<2x1x128xf32, #tpu.memory_space<vmem>>, vector<1x1x128xf32>
    %184 = vector.shape_cast %183 : vector<1x1x128xf32> to vector<1x128xf32>
    %cst_107 = arith.constant dense<0.000000e+00> : vector<16xf32>
    %185 = vector.multi_reduction <add>, %180, %cst_107 [1] : vector<16x128xf32> to vector<16xf32>
    %186 = vector.shape_cast %185 : vector<16xf32> to vector<16x1xf32>
    %cst_108 = arith.constant 0.020833334 : f32
    %187 = vector.broadcast %cst_108 : f32 to vector<16x1xf32>
    %188 = arith.mulf %186, %187 : vector<16x1xf32>
    %189 = vector.broadcast %188 : vector<16x1xf32> to vector<16x128xf32>
    %190 = arith.subf %180, %189 : vector<16x128xf32>
    %191 = vector.broadcast %5 : vector<1x128xf32> to vector<16x128xf32>
    %192 = arith.mulf %190, %191 : vector<16x128xf32>
    %193 = arith.mulf %192, %192 : vector<16x128xf32>
    %cst_109 = arith.constant dense<0.000000e+00> : vector<16xf32>
    %194 = vector.multi_reduction <add>, %193, %cst_109 [1] : vector<16x128xf32> to vector<16xf32>
    %195 = vector.shape_cast %194 : vector<16xf32> to vector<16x1xf32>
    %cst_110 = arith.constant 0.020833334 : f32
    %196 = vector.broadcast %cst_110 : f32 to vector<16x1xf32>
    %197 = arith.mulf %195, %196 : vector<16x1xf32>
    %cst_111 = arith.constant 9.99999974E-6 : f32
    %198 = vector.broadcast %cst_111 : f32 to vector<16x1xf32>
    %199 = arith.addf %197, %198 : vector<16x1xf32>
    %200 = math.rsqrt %199 : vector<16x1xf32>
    %201 = vector.broadcast %200 : vector<16x1xf32> to vector<16x128xf32>
    %202 = arith.mulf %190, %201 : vector<16x128xf32>
    %203 = vector.broadcast %182 : vector<1x128xf32> to vector<16x128xf32>
    %204 = arith.mulf %202, %203 : vector<16x128xf32>
    %205 = vector.broadcast %184 : vector<1x128xf32> to vector<16x128xf32>
    %206 = arith.addf %204, %205 : vector<16x128xf32>
    %c1_112 = arith.constant 1 : index
    %c0_113 = arith.constant 0 : index
    %c0_114 = arith.constant 0 : index
    %207 = vector.load %arg15[%c1_112, %c0_113, %c0_114] : memref<2x128x256xf32, #tpu.memory_space<vmem>>, vector<1x128x256xf32>
    %208 = vector.shape_cast %207 : vector<1x128x256xf32> to vector<128x256xf32>
    %cst_115 = arith.constant dense<0.000000e+00> : vector<16x256xf32>
    %209 = tpu.matmul %206, %208, %cst_115 {dimension_numbers = #tpu.dot_dimension_numbers<[1], [0], [0], [1], [0, 0, 1, 1], [], []>} : vector<16x128xf32>, vector<128x256xf32>, vector<16x256xf32> -> vector<16x256xf32>
    %c1_116 = arith.constant 1 : index
    %c0_117 = arith.constant 0 : index
    %c0_118 = arith.constant 0 : index
    %210 = vector.load %arg16[%c1_116, %c0_117, %c0_118] : memref<2x1x256xf32, #tpu.memory_space<vmem>>, vector<1x1x256xf32>
    %211 = vector.shape_cast %210 : vector<1x1x256xf32> to vector<1x256xf32>
    %212 = vector.broadcast %211 : vector<1x256xf32> to vector<16x256xf32>
    %213 = arith.addf %209, %212 : vector<16x256xf32>
    %cst_119 = arith.constant 5.000000e-01 : f32
    %214 = vector.broadcast %cst_119 : f32 to vector<16x256xf32>
    %215 = arith.mulf %214, %213 : vector<16x256xf32>
    %cst_120 = arith.constant 0.707106769 : f32
    %216 = vector.broadcast %cst_120 : f32 to vector<16x256xf32>
    %217 = arith.mulf %213, %216 : vector<16x256xf32>
    %218 = math.erf %217 : vector<16x256xf32>
    %cst_121 = arith.constant 1.000000e+00 : f32
    %219 = vector.broadcast %cst_121 : f32 to vector<16x256xf32>
    %220 = arith.addf %219, %218 : vector<16x256xf32>
    %221 = arith.mulf %215, %220 : vector<16x256xf32>
    %c1_122 = arith.constant 1 : index
    %c0_123 = arith.constant 0 : index
    %c0_124 = arith.constant 0 : index
    %222 = vector.load %arg17[%c1_122, %c0_123, %c0_124] : memref<2x256x128xf32, #tpu.memory_space<vmem>>, vector<1x256x128xf32>
    %223 = vector.shape_cast %222 : vector<1x256x128xf32> to vector<256x128xf32>
    %cst_125 = arith.constant dense<0.000000e+00> : vector<16x128xf32>
    %224 = tpu.matmul %221, %223, %cst_125 {dimension_numbers = #tpu.dot_dimension_numbers<[1], [0], [0], [1], [0, 0, 1, 1], [], []>} : vector<16x256xf32>, vector<256x128xf32>, vector<16x128xf32> -> vector<16x128xf32>
    %225 = arith.addf %180, %224 : vector<16x128xf32>
    %c1_126 = arith.constant 1 : index
    %c0_127 = arith.constant 0 : index
    %c0_128 = arith.constant 0 : index
    %226 = vector.load %arg18[%c1_126, %c0_127, %c0_128] : memref<2x1x128xf32, #tpu.memory_space<vmem>>, vector<1x1x128xf32>
    %227 = vector.shape_cast %226 : vector<1x1x128xf32> to vector<1x128xf32>
    %228 = vector.broadcast %227 : vector<1x128xf32> to vector<16x128xf32>
    %229 = arith.addf %225, %228 : vector<16x128xf32>
    %c0_129 = arith.constant 0 : index
    %c0_130 = arith.constant 0 : index
    %230 = vector.load %arg19[%c0_129, %c0_130] : memref<1x128xf32, #tpu.memory_space<vmem>>, vector<1x128xf32>
    %c0_131 = arith.constant 0 : index
    %c0_132 = arith.constant 0 : index
    %231 = vector.load %arg20[%c0_131, %c0_132] : memref<1x128xf32, #tpu.memory_space<vmem>>, vector<1x128xf32>
    %cst_133 = arith.constant dense<0.000000e+00> : vector<16xf32>
    %232 = vector.multi_reduction <add>, %229, %cst_133 [1] : vector<16x128xf32> to vector<16xf32>
    %233 = vector.shape_cast %232 : vector<16xf32> to vector<16x1xf32>
    %cst_134 = arith.constant 0.020833334 : f32
    %234 = vector.broadcast %cst_134 : f32 to vector<16x1xf32>
    %235 = arith.mulf %233, %234 : vector<16x1xf32>
    %236 = vector.broadcast %235 : vector<16x1xf32> to vector<16x128xf32>
    %237 = arith.subf %229, %236 : vector<16x128xf32>
    %238 = vector.broadcast %5 : vector<1x128xf32> to vector<16x128xf32>
    %239 = arith.mulf %237, %238 : vector<16x128xf32>
    %240 = arith.mulf %239, %239 : vector<16x128xf32>
    %cst_135 = arith.constant dense<0.000000e+00> : vector<16xf32>
    %241 = vector.multi_reduction <add>, %240, %cst_135 [1] : vector<16x128xf32> to vector<16xf32>
    %242 = vector.shape_cast %241 : vector<16xf32> to vector<16x1xf32>
    %cst_136 = arith.constant 0.020833334 : f32
    %243 = vector.broadcast %cst_136 : f32 to vector<16x1xf32>
    %244 = arith.mulf %242, %243 : vector<16x1xf32>
    %cst_137 = arith.constant 9.99999974E-6 : f32
    %245 = vector.broadcast %cst_137 : f32 to vector<16x1xf32>
    %246 = arith.addf %244, %245 : vector<16x1xf32>
    %247 = math.rsqrt %246 : vector<16x1xf32>
    %248 = vector.broadcast %247 : vector<16x1xf32> to vector<16x128xf32>
    %249 = arith.mulf %237, %248 : vector<16x128xf32>
    %250 = vector.broadcast %230 : vector<1x128xf32> to vector<16x128xf32>
    %251 = arith.mulf %249, %250 : vector<16x128xf32>
    %252 = vector.broadcast %231 : vector<1x128xf32> to vector<16x128xf32>
    %253 = arith.addf %251, %252 : vector<16x128xf32>
    %c0_138 = arith.constant 0 : index
    %c0_139 = arith.constant 0 : index
    %254 = vector.load %arg21[%c0_138, %c0_139] : memref<16x128xf32, #tpu.memory_space<vmem>>, vector<16x128xf32>
    tpu.vector_store %arg21[%c0_138, %c0_139], %253 {strides = array<i32>} : memref<16x128xf32, #tpu.memory_space<vmem>>, vector<16x128xf32>,
    return
  }
  func.func @transform_0(%arg0: i32) -> (i32, i32) {
    %c0_i32 = arith.constant 0 : i32
    %c0_i32_0 = arith.constant 0 : i32
    %c0_i32_1 = arith.constant 0 : i32
    return %c0_i32, %c0_i32_0 : i32, i32
  }
  func.func @transform_1(%arg0: i32) -> (i32, i32) {
    %c0_i32 = arith.constant 0 : i32
    %c0_i32_0 = arith.constant 0 : i32
    %c0_i32_1 = arith.constant 0 : i32
    return %c0_i32, %c0_i32_0 : i32, i32
  }
  func.func @transform_2(%arg0: i32) -> (i32, i32) {
    %c0_i32 = arith.constant 0 : i32
    %c0_i32_0 = arith.constant 0 : i32
    %c0_i32_1 = arith.constant 0 : i32
    return %c0_i32, %c0_i32_0 : i32, i32
  }
  func.func @transform_3(%arg0: i32) -> (i32, i32) {
    %c0_i32 = arith.constant 0 : i32
    %c0_i32_0 = arith.constant 0 : i32
    %c0_i32_1 = arith.constant 0 : i32
    return %c0_i32, %c0_i32_0 : i32, i32
  }
  func.func @transform_4(%arg0: i32) -> (i32, i32) {
    %c0_i32 = arith.constant 0 : i32
    %c0_i32_0 = arith.constant 0 : i32
    %c0_i32_1 = arith.constant 0 : i32
    return %c0_i32, %c0_i32_0 : i32, i32
  }
  func.func @transform_5(%arg0: i32) -> (i32, i32) {
    %c0_i32 = arith.constant 0 : i32
    %c0_i32_0 = arith.constant 0 : i32
    %c0_i32_1 = arith.constant 0 : i32
    return %c0_i32, %c0_i32_0 : i32, i32
  }
  func.func @transform_6(%arg0: i32) -> (i32, i32, i32) {
    %c0_i32 = arith.constant 0 : i32
    %c0_i32_0 = arith.constant 0 : i32
    %c0_i32_1 = arith.constant 0 : i32
    %c0_i32_2 = arith.constant 0 : i32
    return %c0_i32, %c0_i32_0, %c0_i32_1 : i32, i32, i32
  }
  func.func @transform_7(%arg0: i32) -> (i32, i32, i32) {
    %c0_i32 = arith.constant 0 : i32
    %c0_i32_0 = arith.constant 0 : i32
    %c0_i32_1 = arith.constant 0 : i32
    %c0_i32_2 = arith.constant 0 : i32
    return %c0_i32, %c0_i32_0, %c0_i32_1 : i32, i32, i32
  }
  func.func @transform_8(%arg0: i32) -> (i32, i32, i32) {
    %c0_i32 = arith.constant 0 : i32
    %c0_i32_0 = arith.constant 0 : i32
    %c0_i32_1 = arith.constant 0 : i32
    %c0_i32_2 = arith.constant 0 : i32
    return %c0_i32, %c0_i32_0, %c0_i32_1 : i32, i32, i32
  }
  func.func @transform_9(%arg0: i32) -> (i32, i32, i32) {
    %c0_i32 = arith.constant 0 : i32
    %c0_i32_0 = arith.constant 0 : i32
    %c0_i32_1 = arith.constant 0 : i32
    %c0_i32_2 = arith.constant 0 : i32
    return %c0_i32, %c0_i32_0, %c0_i32_1 : i32, i32, i32
  }
  func.func @transform_10(%arg0: i32) -> (i32, i32, i32) {
    %c0_i32 = arith.constant 0 : i32
    %c0_i32_0 = arith.constant 0 : i32
    %c0_i32_1 = arith.constant 0 : i32
    %c0_i32_2 = arith.constant 0 : i32
    return %c0_i32, %c0_i32_0, %c0_i32_1 : i32, i32, i32
  }
  func.func @transform_11(%arg0: i32) -> (i32, i32, i32) {
    %c0_i32 = arith.constant 0 : i32
    %c0_i32_0 = arith.constant 0 : i32
    %c0_i32_1 = arith.constant 0 : i32
    %c0_i32_2 = arith.constant 0 : i32
    return %c0_i32, %c0_i32_0, %c0_i32_1 : i32, i32, i32
  }
  func.func @transform_12(%arg0: i32) -> (i32, i32, i32) {
    %c0_i32 = arith.constant 0 : i32
    %c0_i32_0 = arith.constant 0 : i32
    %c0_i32_1 = arith.constant 0 : i32
    %c0_i32_2 = arith.constant 0 : i32
    return %c0_i32, %c0_i32_0, %c0_i32_1 : i32, i32, i32
  }
  func.func @transform_13(%arg0: i32) -> (i32, i32, i32) {
    %c0_i32 = arith.constant 0 : i32
    %c0_i32_0 = arith.constant 0 : i32
    %c0_i32_1 = arith.constant 0 : i32
    %c0_i32_2 = arith.constant 0 : i32
    return %c0_i32, %c0_i32_0, %c0_i32_1 : i32, i32, i32
  }
  func.func @transform_14(%arg0: i32) -> (i32, i32, i32) {
    %c0_i32 = arith.constant 0 : i32
    %c0_i32_0 = arith.constant 0 : i32
    %c0_i32_1 = arith.constant 0 : i32
    %c0_i32_2 = arith.constant 0 : i32
    return %c0_i32, %c0_i32_0, %c0_i32_1 : i32, i32, i32
  }
  func.func @transform_15(%arg0: i32) -> (i32, i32, i32) {
    %c0_i32 = arith.constant 0 : i32
    %c0_i32_0 = arith.constant 0 : i32
    %c0_i32_1 = arith.constant 0 : i32
    %c0_i32_2 = arith.constant 0 : i32
    return %c0_i32, %c0_i32_0, %c0_i32_1 : i32, i32, i32
  }
  func.func @transform_16(%arg0: i32) -> (i32, i32, i32) {
    %c0_i32 = arith.constant 0 : i32
    %c0_i32_0 = arith.constant 0 : i32
    %c0_i32_1 = arith.constant 0 : i32
    %c0_i32_2 = arith.constant 0 : i32
    return %c0_i32, %c0_i32_0, %c0_i32_1 : i32, i32, i32
  }
  func.func @transform_17(%arg0: i32) -> (i32, i32, i32) {
    %c0_i32 = arith.constant 0 : i32
    %c0_i32_0 = arith.constant 0 : i32
    %c0_i32_1 = arith.constant 0 : i32
    %c0_i32_2 = arith.constant 0 : i32
    return %c0_i32, %c0_i32_0, %c0_i32_1 : i32, i32, i32
  }
  func.func @transform_18(%arg0: i32) -> (i32, i32) {
    %c0_i32 = arith.constant 0 : i32
    %c0_i32_0 = arith.constant 0 : i32
    %c0_i32_1 = arith.constant 0 : i32
    return %c0_i32, %c0_i32_0 : i32, i32
  }
  func.func @transform_19(%arg0: i32) -> (i32, i32) {
    %c0_i32 = arith.constant 0 : i32
    %c0_i32_0 = arith.constant 0 : i32
    %c0_i32_1 = arith.constant 0 : i32
    return %c0_i32, %c0_i32_0 : i32, i32
  }
  func.func @transform_20(%arg0: i32) -> (i32, i32) {
    %c0_i32 = arith.constant 0 : i32
    %c0_i32_0 = arith.constant 0 : i32
    %c0_i32_1 = arith.constant 0 : i32
    return %c0_i32, %c0_i32_0 : i32, i32
  }
}

</mosaic_0001>

<bundles_post_ra>
// kernel: tpu_custom_call.1
= control target key start
LH: loop header
LB: loop body
LE: loop exit
PB: predicated region body
PF: predicated region fallthrough
CT: control target
= control target key end

     0   :  { %s7392_s0 = inlined_call_operand.hbm [shape: f32[16,128], index: 0, kind: input, shape index: {}]   ;;  %s7393_s1 = inlined_call_operand.vmem [shape: f32[192,16], index: 1, kind: input, shape index: {}]   ;;  %s7394_s2 = inlined_call_operand.vmem [shape: f32[16,192], index: 2, kind: input, shape index: {}]   ;;  %s7395_s3 = inlined_call_operand.vmem [shape: f32[192,128], index: 3, kind: input, shape index: {}]   ;;  %s7396_s4 = inlined_call_operand.vmem [shape: f32[192,16], index: 4, kind: input, shape index: {}]   ;;  %s7397_s5 = inlined_call_operand.vmem [shape: f32[1,128], index: 5, kind: input, shape index: {}]   ;;  %s7398_s6 = inlined_call_operand.hbm [shape: f32[2,1,128], index: 6, kind: input, shape index: {}]   ;;  %s7399_s7 = inlined_call_operand.hbm [shape: f32[2,1,128], index: 7, kind: input, shape index: {}]   ;;  %s7400_s8 = inlined_call_operand.hbm [shape: f32[2,128,384], index: 8, kind: input, shape index: {}]   ;;  %s7401_s9 = inlined_call_operand.hbm [shape: f32[2,1,384], index: 9, kind: input, shape index: {}]   ;;  %s7402_s10 = inlined_call_operand.vmem [shape: f32[2,128,128], index: 10, kind: input, shape index: {}]   ;;  %s7403_s11 = inlined_call_operand.hbm [shape: f32[2,1,128], index: 11, kind: input, shape index: {}]   ;;  %s7404_s12 = inlined_call_operand.vmem [shape: f32[2,1,128], index: 12, kind: input, shape index: {}]   ;;  %s7405_s13 = inlined_call_operand.vmem [shape: f32[2,1,128], index: 13, kind: input, shape index: {}]   ;;  %s7406_s14 = inlined_call_operand.hbm [shape: f32[2,128,256], index: 14, kind: input, shape index: {}]   ;;  %s7407_s15 = inlined_call_operand.vmem [shape: f32[2,1,256], index: 15, kind: input, shape index: {}]   ;;  %s7408_s16 = inlined_call_operand.hbm [shape: f32[2,256,128], index: 16, kind: input, shape index: {}]   ;;  %s7409_s17 = inlined_call_operand.vmem [shape: f32[2,1,128], index: 17, kind: input, shape index: {}]   ;;  %s7410_s18 = inlined_call_operand.vmem [shape: f32[1,128], index: 18, kind: input, shape index: {}]   ;;  %s7411_s19 = inlined_call_operand.vmem [shape: f32[1,128], index: 19, kind: input, shape index: {}]   ;;  %s7412_s20 = inlined_call_operand.hbm [shape: f32[16,128], index: 20, kind: output, shape index: {}]  }
   0x1   :  { %7423 = sst [smem:[#allocation23_spill]] %s7392_s0 }
   0x2   :  { %7424 = sst [smem:[#allocation24_spill]] %s7393_s1 }
   0x3   :  { %7425 = sst [smem:[#allocation25_spill]] %s7394_s2 }
   0x4   :  { %7426 = sst [smem:[#allocation26_spill]] %s7395_s3 }
   0x5   :  { %7427 = sst [smem:[#allocation27_spill]] %s7396_s4 }
   0x6   :  { %7428 = sst [smem:[#allocation28_spill]] %s7412_s20 }
   0x7   :  { %25 = vsyncpa [#allocation3], 0 }
   0x8   :  { %26 = vsyncpa [#allocation6], 0 }
   0x9   :  { %27 = vsyncpa [#allocation9], 0 }
   0xa   :  { %28 = vsyncpa [#allocation12], 0 }
   0xb   :  { %29 = vsyncpa [#allocation15], 0 }
   0xc   :  { %30 = vsyncpa [#allocation4], 0  ;;  %s5682_s1 = smov [#allocation5]   ;;  %s5472_s2 = scalar_lea.hbm %s7398_s6, 32 }
   0xd   :  { %s58_s22 = sshll.u32 %s5682_s1, 4  ;;  %p5473_p0 = scmp.ne.s32.totalorder %s7398_s6, %s5472_s2  ;;  %s59_s22 = int_to_ptr.vmem [resolvable:$true] %s58_s22 }
   0xe   :  { %p5476_p1 = scmp.lt.u32.totalorder %s5472_s2, %s7398_s6 }
  0x10   :  { %p5478_p2 = pnand %p5476_p1, %p5473_p0 }
  0x12   :  { %5481 = shalt.err (!%p5478_p2)
}
  0x13   :  { %s5482_s28 = scalar_lea.vmem %s59_s22, 32  ;;  %p5487_p4 = scmp.lt.s32.totalorder %s59_s22, %s59_s22 }
  0x14   :  { %p5483_p3 = scmp.ne.s32.totalorder %s59_s22, %s5482_s28  ;;  %p5488_p5 = scmp.lt.s32.totalorder %s5482_s28, %s5482_s28 }
  0x16   :  { %p5489_p6 = por %p5488_p5, %p5487_p4 }
  0x18   :  { %p5490_p7 = pnand %p5489_p6, %p5483_p3 }
  0x1a   :  { %5493 = shalt.err (!%p5490_p7)
}
  0x1b   :  { %s7418_s4 = smov 16   ;;  %s7420_s29 = smov 1  }
  0x1c   :  { %64 = dma.hbm_to_vmem [thread:$0]  %s7398_s6, 32, %s59_s22, [#allocation6], %s7418_s4, %s7418_s4, %s7420_s29  }
  0x1d   :  { %s5685_s21 = smov [#allocation8]   ;;  %s5494_s2 = scalar_lea.hbm %s7400_s8, 12288 }
  0x1e   :  { %s82_s1 = sshll.u32 %s5685_s21, 4  ;;  %p5495_p8 = scmp.ne.s32.totalorder %s7400_s8, %s5494_s2  ;;  %s83_s1 = int_to_ptr.vmem [resolvable:$true] %s82_s1 }
  0x1f   :  { %p5498_p9 = scmp.lt.u32.totalorder %s5494_s2, %s7400_s8 }
  0x21   :  { %p5500_p10 = pnand %p5498_p9, %p5495_p8 }
  0x23   :  { %5503 = shalt.err (!%p5500_p10)
}
  0x24   :  { %s5504_s28 = scalar_lea.vmem %s83_s1, 12288  ;;  %p5509_p12 = scmp.lt.s32.totalorder %s83_s1, %s83_s1 }
  0x25   :  { %p5505_p11 = scmp.ne.s32.totalorder %s83_s1, %s5504_s28  ;;  %p5510_p13 = scmp.lt.s32.totalorder %s5504_s28, %s5504_s28 }
  0x27   :  { %p5511_p0 = por %p5510_p13, %p5509_p12 }
  0x29   :  { %p5512_p1 = pnand %p5511_p0, %p5505_p11 }
  0x2b   :  { %5515 = shalt.err (!%p5512_p1)
}
  0x2c   :  { %s5686_s6 = smov 384   ;;  %s5687_s22 = smov 24  }
  0x2d   :  { %88 = dma.hbm_to_vmem [thread:$0]  %s7400_s8, 12288, %s83_s1, [#allocation9], %s5686_s6, %s5686_s6, %s5687_s22  }
  0x2e   :  { %s5688_s21 = smov [#allocation11]   ;;  %s5689_s24 = smov [#allocation2]  }
  0x2f   :  { %s108_s23 = sshll.u32 %s5688_s21, 4  ;;  %s36_s25 = sshll.u32 %s5689_s24, 4  ;;  %s109_s23 = int_to_ptr.vmem [resolvable:$true] %s108_s23  ;;  %s5834_s25 = int_to_ptr.vmem [resolvable:$true] %s36_s25 }
  0x30   :  { %s5516_s26 = scalar_lea.hbm %s7403_s11, 32 }
  0x31   :  { %p5517_p2 = scmp.ne.s32.totalorder %s7403_s11, %s5516_s26  ;;  %p5520_p3 = scmp.lt.u32.totalorder %s5516_s26, %s7403_s11 }
  0x33   :  { %p5522_p4 = pnand %p5520_p3, %p5517_p2 }
  0x35   :  { %5525 = shalt.err (!%p5522_p4)
}
  0x36   :  { %s5526_s8 = scalar_lea.vmem %s109_s23, 32  ;;  %p5531_p6 = scmp.lt.s32.totalorder %s109_s23, %s109_s23 }
  0x37   :  { %p5527_p5 = scmp.ne.s32.totalorder %s109_s23, %s5526_s8  ;;  %p5532_p7 = scmp.lt.s32.totalorder %s5526_s8, %s5526_s8 }
  0x39   :  { %p5533_p8 = por %p5532_p7, %p5531_p6 }
  0x3b   :  { %p5534_p9 = pnand %p5533_p8, %p5527_p5 }
  0x3d   :  { %5537 = shalt.err (!%p5534_p9)
}
  0x3e   :  { %s7429_s1 = smov 1   ;;  %s7430_s6 = smov 16  }
  0x3f   :  { %114 = dma.hbm_to_vmem [thread:$0]  %s7403_s11, 32, %s109_s23, [#allocation12], %s7430_s6, %s7430_s6, %s7429_s1  }
  0x40   :  { %s7431_s4 = sld [smem:[#allocation23_spill]] }
  0x46   :  { %s5538_s29 = scalar_lea.hbm %s7431_s4, 256 }
  0x47   :  { %p5539_p10 = scmp.ne.s32.totalorder %s7431_s4, %s5538_s29  ;;  %p5542_p11 = scmp.lt.u32.totalorder %s5538_s29, %s7431_s4 }
  0x49   :  { %p5544_p12 = pnand %p5542_p11, %p5539_p10 }
  0x4b   :  { %5547 = shalt.err (!%p5544_p12)
}
  0x4c   :  { %s5548_s27 = scalar_lea.vmem %s5834_s25, 256  ;;  %p5553_p0 = scmp.lt.s32.totalorder %s5834_s25, %s5834_s25 }
  0x4d   :  { %p5549_p13 = scmp.ne.s32.totalorder %s5834_s25, %s5548_s27  ;;  %p5554_p1 = scmp.lt.s32.totalorder %s5548_s27, %s5548_s27 }
  0x4f   :  { %p5555_p2 = por %p5554_p1, %p5553_p0 }
  0x51   :  { %p5556_p3 = pnand %p5555_p2, %p5549_p13 }
  0x53   :  { %5559 = shalt.err (!%p5556_p3)
}
  0x54   :  { %s5690_s11 = smov 128   ;;  %s5691_s23 = smov 8  }
  0x55   :  { %42 = dma.hbm_to_vmem [thread:$0]  %s7431_s4, 256, %s5834_s25, [#allocation3], %s5690_s11, %s5690_s11, %s5691_s23  }
  0x56   :  { %s5692_s22 = smov [#allocation7]   ;;  %s5693_s0 = smov [#allocation10]  }
  0x57   :  { %s70_s30 = sshll.u32 %s5692_s22, 4  ;;  %s94_s21 = sshll.u32 %s5693_s0, 4  ;;  %s71_s30 = int_to_ptr.vmem [resolvable:$true] %s70_s30  ;;  %s5871_s21 = int_to_ptr.vmem [resolvable:$true] %s94_s21 }
  0x58   :  { %s5560_s2 = scalar_lea.hbm %s7399_s7, 32 }
  0x59   :  { %p5561_p4 = scmp.ne.s32.totalorder %s7399_s7, %s5560_s2  ;;  %p5564_p5 = scmp.lt.u32.totalorder %s5560_s2, %s7399_s7 }
  0x5b   :  { %p5566_p6 = pnand %p5564_p5, %p5561_p4 }
  0x5d   :  { %5569 = shalt.err (!%p5566_p6)
}
  0x5e   :  { %s5570_s25 = scalar_lea.vmem %s71_s30, 32  ;;  %p5575_p8 = scmp.lt.s32.totalorder %s71_s30, %s71_s30 }
  0x5f   :  { %p5571_p7 = scmp.ne.s32.totalorder %s71_s30, %s5570_s25  ;;  %p5576_p9 = scmp.lt.s32.totalorder %s5570_s25, %s5570_s25 }
  0x61   :  { %p5577_p10 = por %p5576_p9, %p5575_p8 }
  0x63   :  { %p5578_p11 = pnand %p5577_p10, %p5571_p7 }
  0x65   :  { %5581 = shalt.err (!%p5578_p11)
}
  0x66   :  { %76 = dma.hbm_to_vmem [thread:$0]  %s7399_s7, 32, %s71_s30, [#allocation6], %s7430_s6, %s7430_s6, %s7429_s1  }
  0x67   :  { %s5582_s20 = scalar_lea.hbm %s7401_s9, 96 }
  0x68   :  { %p5583_p12 = scmp.ne.s32.totalorder %s7401_s9, %s5582_s20  ;;  %p5586_p13 = scmp.lt.u32.totalorder %s5582_s20, %s7401_s9 }
  0x6a   :  { %p5588_p0 = pnand %p5586_p13, %p5583_p12 }
  0x6c   :  { %5591 = shalt.err (!%p5588_p0)
}
  0x6d   :  { %s5592_s3 = scalar_lea.vmem %s5871_s21, 96  ;;  %p5597_p2 = scmp.lt.s32.totalorder %s5871_s21, %s5871_s21 }
  0x6e   :  { %p5593_p1 = scmp.ne.s32.totalorder %s5871_s21, %s5592_s3  ;;  %p5598_p3 = scmp.lt.s32.totalorder %s5592_s3, %s5592_s3 }
  0x70   :  { %p5599_p4 = por %p5598_p3, %p5597_p2 }
  0x72   :  { %p5600_p5 = pnand %p5599_p4, %p5593_p1 }
  0x74   :  { %5603 = shalt.err (!%p5600_p5)
}
  0x75   :  { %s5694_s7 = smov 48   ;;  %s5695_s1 = smov 3  }
  0x76   :  { %100 = dma.hbm_to_vmem [thread:$0]  %s7401_s9, 96, %s5871_s21, [#allocation9], %s5694_s7, %s5694_s7, %s5695_s1  }
  0x77   :  { %s5696_s27 = smov [#allocation13]   ;;  %s5697_s4 = smov [#allocation14]  }
  0x78   :  { %s124_s25 = sshll.u32 %s5696_s27, 4  ;;  %s138_s28 = sshll.u32 %s5697_s4, 4  ;;  %s125_s25 = int_to_ptr.vmem [resolvable:$true] %s124_s25  ;;  %s139_s28 = int_to_ptr.vmem [resolvable:$true] %s138_s28 }
  0x79   :  { %s5604_s20 = scalar_lea.hbm %s7406_s14, 8192 }
  0x7a   :  { %p5605_p6 = scmp.ne.s32.totalorder %s7406_s14, %s5604_s20  ;;  %p5608_p7 = scmp.lt.u32.totalorder %s5604_s20, %s7406_s14 }
  0x7c   :  { %p5610_p8 = pnand %p5608_p7, %p5605_p6 }
  0x7e   :  { %5613 = shalt.err (!%p5610_p8)
}
  0x7f   :  { %s5614_s9 = scalar_lea.vmem %s125_s25, 8192  ;;  %p5619_p10 = scmp.lt.s32.totalorder %s125_s25, %s125_s25 }
  0x80   :  { %p5615_p9 = scmp.ne.s32.totalorder %s125_s25, %s5614_s9  ;;  %p5620_p11 = scmp.lt.s32.totalorder %s5614_s9, %s5614_s9 }
  0x82   :  { %p5621_p12 = por %p5620_p11, %p5619_p10 }
  0x84   :  { %p5622_p13 = pnand %p5621_p12, %p5615_p9 }
  0x86   :  { %5625 = shalt.err (!%p5622_p13)
}
  0x87   :  { %s5698_s21 = smov 256   ;;  %s5626_s26 = scalar_lea.hbm %s7408_s16, 8192 }
  0x88   :  { %130 = dma.hbm_to_vmem [thread:$0]  %s7406_s14, 8192, %s125_s25, [#allocation12], %s5698_s21, %s5698_s21, %s7430_s6  }
  0x89   :  { %p5627_p0 = scmp.ne.s32.totalorder %s7408_s16, %s5626_s26  ;;  %p5630_p1 = scmp.lt.u32.totalorder %s5626_s26, %s7408_s16 }
  0x8b   :  { %p5632_p2 = pnand %p5630_p1, %p5627_p0 }
  0x8d   :  { %5635 = shalt.err (!%p5632_p2)
}
  0x8e   :  { %s5636_s20 = scalar_lea.vmem %s139_s28, 8192  ;;  %p5641_p4 = scmp.lt.s32.totalorder %s139_s28, %s139_s28 }
  0x8f   :  { %p5637_p3 = scmp.ne.s32.totalorder %s139_s28, %s5636_s20  ;;  %p5642_p5 = scmp.lt.s32.totalorder %s5636_s20, %s5636_s20 }
  0x91   :  { %p5643_p6 = por %p5642_p5, %p5641_p4 }
  0x93   :  { %p5644_p7 = pnand %p5643_p6, %p5637_p3 }
  0x95   :  { %5647 = shalt.err (!%p5644_p7)
}
  0x96   :  { %144 = dma.hbm_to_vmem [thread:$0]  %s7408_s16, 8192, %s139_s28, [#allocation15], %s5690_s11, %s5690_s11, %s5691_s23  }
  0x97   :  { %5670 = dma.done.wait [#allocation3], 256  }
  0x98   :  { %5671 = vsyncadd [#allocation3], 4294967040 }
  0x99   :  { %5672 = dma.done.wait [#allocation6], 64  }
  0x9a   :  { %5673 = vsyncadd [#allocation6], 4294967232 }
  0x9b   :  { %5674 = dma.done.wait [#allocation9], 12384  }
  0x9c   :  { %5675 = vsyncadd [#allocation9], 4294954912 }
  0x9d   :  { %5676 = dma.done.wait [#allocation12], 8224  }
  0x9e   :  { %5677 = vsyncadd [#allocation12], 4294959072 }
  0x9f   :  { %5678 = dma.done.wait [#allocation15], 8192  }
  0xa0   :  { %5679 = vsyncadd [#allocation15], 4294959104  ;;  %v175_v0 = vld [vmem:[#allocation2] sm:$0xff]  ;;  %v176_v1 = vld [vmem:[#allocation2 + $0x8] sm:$0xff]  ;;  %s7432_s29 = sld [smem:[#allocation24_spill]]  ;;  %vm519_vm0 = vcmask 130048  }
  0xa1   :  { %256 = vadd.xlane.f32.xlu0 %v175_v0  ;;  %v303_v2 = vld [vmem:[#allocation8 + $0x8] sm:$0xff]  ;;  %v306_v3 = vld [vmem:[#allocation8 + $0x20] sm:$0xff]  ;;  %v305_v6 = vld [vmem:[#allocation8 + $0x18] sm:$0xff]  ;;  %s7433_s26 = sld [smem:[#allocation26_spill]]  ;;  %s7434_s0 = sld [smem:[#allocation27_spill]]  ;;  %vm1579_vm1 = vcmask 523264  }
  0xa2   :  { %v302_v4 = vld [vmem:[#allocation8] sm:$0xff]  ;;  %v4680_v5 = vpack.c.bf16 %v306_v3, %v303_v2  ;;  %v309_v7 = vld [vmem:[#allocation8 + $0x38] sm:$0xff]  ;;  %v312_v8 = vld [vmem:[#allocation8 + $0x50] sm:$0xff]  ;;  %s7435_s20 = sld [smem:[#allocation25_spill]]  ;;  %s5701_s9 = smov [#allocation16]  }
  0xa3   :  { %v4682_v9 = vpack.c.bf16 %v305_v6, %v302_v4  ;;  %v4684_v10 = vpack.c.bf16 %v312_v8, %v309_v7  ;;  %v304_v11 = vld [vmem:[#allocation8 + $0x10] sm:$0xff]  ;;  %v307_v12 = vld [vmem:[#allocation8 + $0x28] sm:$0xff]  ;;  %v318_v17 = vld [vmem:[#allocation8 + $0x80] sm:$0xff]  ;;  %v5699_v7 = vmov 0.0   ;;  %s3845_s21 = sshll.u32 %s5701_s9, 4  ;;  %s3846_s21 = int_to_ptr.vmem [resolvable:$true] %s3845_s21 }
  0xa4   :  { %v308_v13 = vld [vmem:[#allocation8 + $0x30] sm:$0xff]  ;;  %4681 = vmatprep.subr.bf16.mxu0 %v4680_v5  ;;  %v4712_v14 = vpack.c.bf16 %v307_v12, %v304_v11  ;;  %v311_v15 = vld [vmem:[#allocation8 + $0x48] sm:$0xff]  ;;  %v310_v19 = vld [vmem:[#allocation8 + $0x40] sm:$0xff]  ;;  %431 = vmatprep.mubr.f32.mxu0 %v5699_v7  ;;  %s5648_s3 = scalar_lea.vmem %s3846_s21, 256  ;;  %p5653_p9 = scmp.lt.s32.totalorder %s3846_s21, %s3846_s21 }
  0xa5   :  { %258 = vadd.xlane.f32.xlu0 %v176_v1  ;;  %v315_v16 = vld [vmem:[#allocation8 + $0x68] sm:$0xff]  ;;  %4683 = vmatpush1.bf16.msra.mxu0 %v4682_v9  ;;  %v4686_v18 = vpack.c.bf16 %v311_v15, %v308_v13  ;;  %v313_v20 = vld [vmem:[#allocation8 + $0x58] sm:$0xff]  ;;  %v314_v23 = vld [vmem:[#allocation8 + $0x60] sm:$0xff]  ;;  %p5649_p8 = scmp.ne.s32.totalorder %s3846_s21, %s5648_s3  ;;  %p5654_p10 = scmp.lt.s32.totalorder %s5648_s3, %s5648_s3 }
  0xa6   :  { %4685 = vmatprep.subr.bf16.mxu0 %v4684_v10  ;;  %4713 = vmatprep.subr.bf16.mxu1 %v4712_v14  ;;  %v4688_v21 = vpack.c.bf16 %v318_v17, %v315_v16  ;;  %v4716_v22 = vpack.c.bf16 %v313_v20, %v310_v19  ;;  %v317_v24 = vld [vmem:[#allocation8 + $0x78] sm:$0xff]  ;;  %v3861_v28 = vld [vmem:[%s7397_s5] ss:$0 sm:$0xff]  ;;  %v324_v38 = vld [vmem:[#allocation8 + $0xb0] sm:$0xff] }
  0xa7   :  { %4715 = vmatpush3.bf16.msra.mxu1 %v4712_v14  ;;  %v4690_v25 = vpack.c.bf16 %v317_v24, %v314_v23  ;;  %v321_v37 = vld [vmem:[#allocation8 + $0x98] sm:$0xff]  ;;  %v316_v39 = vld [vmem:[#allocation8 + $0x70] sm:$0xff]  ;;  %v319_v41 = vld [vmem:[#allocation8 + $0x88] sm:$0xff]  ;;  %p5655_p11 = por %p5654_p10, %p5653_p9 }
  0xa8   :  { %4717 = vmatprep.subr.bf16.mxu1 %v4716_v22  ;;  %v4692_v40 = vpack.c.bf16 %v324_v38, %v321_v37  ;;  %v320_v42 = vld [vmem:[#allocation8 + $0x90] sm:$0xff]  ;;  %v323_v43 = vld [vmem:[#allocation8 + $0xa8] sm:$0xff]  ;;  %v4720_v44 = vpack.c.bf16 %v319_v41, %v316_v39  ;;  %v330_v47 = vld [vmem:[#allocation8 + $0xe0] sm:$0xff] }
  0xa9   :  { %4687 = vmatpush1.bf16.msra.mxu0 %v4686_v18  ;;  %v4694_v45 = vpack.c.bf16 %v323_v43, %v320_v42  ;;  %v327_v46 = vld [vmem:[#allocation8 + $0xc8] sm:$0xff]  ;;  %v322_v48 = vld [vmem:[#allocation8 + $0xa0] sm:$0xff]  ;;  %v325_v50 = vld [vmem:[#allocation8 + $0xb8] sm:$0xff]  ;;  %p5656_p12 = pnand %p5655_p11, %p5649_p8 }
  0xaa   :  { %4689 = vmatprep.subr.bf16.mxu0 %v4688_v21  ;;  %v4696_v49 = vpack.c.bf16 %v330_v47, %v327_v46  ;;  %v326_v51 = vld [vmem:[#allocation8 + $0xc0] sm:$0xff]  ;;  %v329_v52 = vld [vmem:[#allocation8 + $0xd8] sm:$0xff]  ;;  %v4724_v53 = vpack.c.bf16 %v325_v50, %v322_v48  ;;  %v336_v56 = vld [vmem:[#allocation8 + $0x110] sm:$0xff] }
  0xab   :  { %4719 = vmatpush3.bf16.msra.mxu1 %v4716_v22  ;;  %v4698_v54 = vpack.c.bf16 %v329_v52, %v326_v51  ;;  %v333_v55 = vld [vmem:[#allocation8 + $0xf8] sm:$0xff]  ;;  %v328_v57 = vld [vmem:[#allocation8 + $0xd0] sm:$0xff]  ;;  %v331_v59 = vld [vmem:[#allocation8 + $0xe8] sm:$0xff] }
  0xac   :  { %4721 = vmatprep.subr.bf16.mxu1 %v4720_v44  ;;  %v4700_v58 = vpack.c.bf16 %v336_v56, %v333_v55  ;;  %v332_v60 = vld [vmem:[#allocation8 + $0xf0] sm:$0xff]  ;;  %v335_v61 = vld [vmem:[#allocation8 + $0x108] sm:$0xff]  ;;  %v4728_v62 = vpack.c.bf16 %v331_v59, %v328_v57  ;;  %v334_v2 = vld [vmem:[#allocation8 + $0x100] sm:$0xff] }
  0xad   :  { %4691 = vmatpush1.bf16.msra.mxu0 %v4690_v25  ;;  %v4702_v63 = vpack.c.bf16 %v335_v61, %v332_v60  ;;  %v337_v4 = vld [vmem:[#allocation8 + $0x118] sm:$0xff]  ;;  %v338_v5 = vld [vmem:[#allocation8 + $0x120] sm:$0xff]  ;;  %v348_v11 = vld [vmem:[#allocation8 + $0x170] sm:$0xff] }
  0xae   :  { %4693 = vmatprep.subr.bf16.mxu0 %v4692_v40  ;;  %v341_v6 = vld [vmem:[#allocation8 + $0x138] sm:$0xff]  ;;  %v4732_v8 = vpack.c.bf16 %v337_v4, %v334_v2  ;;  %v340_v12 = vld [vmem:[#allocation8 + $0x130] sm:$0xff]  ;;  %v343_v14 = vld [vmem:[#allocation8 + $0x148] sm:$0xff] }
  0xaf   :  { %4723 = vmatpush3.bf16.msra.mxu1 %v4720_v44  ;;  %v4706_v9 = vpack.c.bf16 %v341_v6, %v338_v5  ;;  %v345_v10 = vld [vmem:[#allocation8 + $0x158] sm:$0xff]  ;;  %v344_v15 = vld [vmem:[#allocation8 + $0x150] sm:$0xff]  ;;  %v347_v16 = vld [vmem:[#allocation8 + $0x168] sm:$0xff]  ;;  %v4736_v17 = vpack.c.bf16 %v343_v14, %v340_v12 }
  0xb0   :  { %4725 = vmatprep.subr.bf16.mxu1 %v4724_v53  ;;  %v4708_v13 = vpack.c.bf16 %v348_v11, %v345_v10  ;;  %v4710_v18 = vpack.c.bf16 %v347_v16, %v344_v15  ;;  %v346_v19 = vld [vmem:[#allocation8 + $0x160] sm:$0xff]  ;;  %v349_v20 = vld [vmem:[#allocation8 + $0x178] sm:$0xff]  ;;  %v177_v40 = vld [vmem:[%s7432_s29] sm:$0xff] }
  0xb1   :  { %4695 = vmatpush1.bf16.msra.mxu0 %v4694_v45  ;;  %v4740_v21 = vpack.c.bf16 %v349_v20, %v346_v19  ;;  %v350_v43 = vld [vmem:[#allocation10] sm:$0x7]  ;;  %v181_v2 = vld [vmem:[%s7432_s29 + $0x20] sm:$0xff]  ;;  %v184_v5 = vld [vmem:[%s7432_s29 + $0x38] sm:$0xff] }
  0xb2   :  { %4697 = vmatprep.subr.bf16.mxu0 %v4696_v49  ;;  %v183_v4 = vld [vmem:[%s7432_s29 + $0x30] sm:$0xff]  ;;  %v185_v6 = vld [vmem:[%s7432_s29 + $0x40] sm:$0xff]  ;;  %v188_v10 = vld [vmem:[%s7432_s29 + $0x58] sm:$0xff] }
  0xb3   :  { %4727 = vmatpush3.bf16.msra.mxu1 %v4724_v53  ;;  %v189_v11 = vld [vmem:[%s7432_s29 + $0x60] sm:$0xff]  ;;  %v190_v12 = vld [vmem:[%s7432_s29 + $0x68] sm:$0xff]  ;;  %v192_v14 = vld [vmem:[%s7432_s29 + $0x78] sm:$0xff] }
  0xb4   :  { %4729 = vmatprep.subr.bf16.mxu1 %v4728_v62  ;;  %v193_v15 = vld [vmem:[%s7432_s29 + $0x80] sm:$0xff]  ;;  %v194_v16 = vld [vmem:[%s7432_s29 + $0x88] sm:$0xff] }
  0xb5   :  { %4699 = vmatpush1.bf16.msra.mxu0 %v4698_v54  ;;  %v197_v19 = vld [vmem:[%s7432_s29 + $0xa0] sm:$0xff]  ;;  %v198_v20 = vld [vmem:[%s7432_s29 + $0xa8] sm:$0xff] }
  0xb6   :  { %4701 = vmatprep.subr.bf16.mxu0 %v4700_v58 }
  0xb7   :  { %4731 = vmatpush3.bf16.msra.mxu1 %v4728_v62 }
  0xb8   :  { %4733 = vmatprep.subr.bf16.mxu1 %v4732_v8 }
  0xb9   :  { %4703 = vmatpush1.bf16.msra.mxu0 %v4702_v63  ;;  %v178_v63 = vld [vmem:[%s7432_s29 + $0x8] sm:$0xff] }
  0xbb   :  { %4735 = vmatpush3.bf16.msra.mxu1 %v4732_v8  ;;  %v186_v8 = vld [vmem:[%s7432_s29 + $0x48] sm:$0xff] }
  0xbc   :  { %4737 = vmatprep.subr.bf16.mxu1 %v4736_v17 }
  0xbf   :  { %4739 = vmatpush3.bf16.msra.mxu1 %v4736_v17  ;;  %v195_v17 = vld [vmem:[%s7432_s29 + $0x90] sm:$0xff] }
  0xc0   :  { %4741 = vmatprep.subr.bf16.mxu1 %v4740_v21 }
  0xc3   :  { %4743 = vmatpush3.bf16.msra.mxu1 %v4740_v21  ;;  %v199_v21 = vld [vmem:[%s7432_s29 + $0xb0] sm:$0xff] }
 0x12e   :  { %v257_v26 = vpop.xlane.xlu0 %256 }
 0x12f   :  { %v260_v27 = vmul.f32 0.020833334, %v257_v26 }
 0x131   :  { %v5936_v29 = vsub.f32 %v175_v0, %v260_v27  ;;  %v339_v0 = vld [vmem:[#allocation8 + $0x128] sm:$0xff] }
 0x132   :  { %v259_v30 = vpop.xlane.xlu0 %258 }
 0x133   :  { %v261_v31 = vmul.f32 0.020833334, %v259_v30  ;;  %v270_v32 = vmul.f32 %v3861_v28, %v5936_v29  ;;  %v3862_v30 = vld [vmem:[#allocation5] ss:$0 sm:$0xff] }
 0x135   :  { %v5939_v33 = vsub.f32 %v176_v1, %v261_v31  ;;  %v272_v34 = vmul.f32 %v270_v32, %v270_v32  ;;  %v342_v1 = vld [vmem:[#allocation8 + $0x140] sm:$0xff]  ;;  %v3863_v32 = vld [vmem:[#allocation7] ss:$0 sm:$0xff] }
 0x136   :  { %v4704_v3 = vpack.c.bf16 %v342_v1, %v339_v0  ;;  %v179_v0 = vld [vmem:[%s7432_s29 + $0x10] sm:$0xff]  ;;  %v180_v1 = vld [vmem:[%s7432_s29 + $0x18] sm:$0xff] }
 0x137   :  { %274 = vadd.xlane.f32.xlu1 %v272_v34  ;;  %v271_v35 = vmul.f32 %v3861_v28, %v5939_v33 }
 0x138   :  { %4705 = vmatprep.subr.bf16.mxu0 %v4704_v3  ;;  %v182_v3 = vld [vmem:[%s7432_s29 + $0x28] sm:$0xff] }
 0x139   :  { %v273_v36 = vmul.f32 %v271_v35, %v271_v35  ;;  %4707 = vmatpush1.bf16.msra.mxu0 %v4706_v9  ;;  %v187_v9 = vld [vmem:[%s7432_s29 + $0x50] sm:$0xff] }
 0x13a   :  { %4709 = vmatprep.subr.bf16.mxu0 %v4708_v13  ;;  %v191_v13 = vld [vmem:[%s7432_s29 + $0x70] sm:$0xff] }
 0x13b   :  { %276 = vadd.xlane.f32.xlu1 %v273_v36 }
 0x13d   :  { %4711 = vmatpush1.bf16.msra.mxu0 %v4710_v18  ;;  %v196_v18 = vld [vmem:[%s7432_s29 + $0x98] sm:$0xff] }
 0x1c4   :  { %v275_v22 = vpop.xlane.xlu1 %274 }
 0x1c5   :  { %v278_v23 = vmul.f32 0.020833334, %v275_v22  ;;  %v200_v22 = vld [vmem:[%s7432_s29 + $0xb8] sm:$0xff] }
 0x1c7   :  { %v280_v24 = vadd.f32 1e-05, %v278_v23  ;;  %v205_v23 = vld [vmem:[%s7433_s26] sm:$0xff] }
 0x1c8   :  { %v277_v25 = vpop.xlane.xlu1 %276 }
 0x1c9   :  { %5118 = vrsqrt.f32 %v280_v24  ;;  %v279_v26 = vmul.f32 0.020833334, %v277_v25  ;;  %v206_v24 = vld [vmem:[%s7433_s26 + $0x8] sm:$0xff] }
 0x1cb   :  { %v281_v27 = vadd.f32 1e-05, %v279_v26 }
 0x1cd   :  { %5120 = vrsqrt.f32 %v281_v27 }
 0x1d3   :  { %v5119_v28 = vpop.eup %5118 }
 0x1d4   :  { %v284_v31 = vmul.f32 %v5119_v28, %v5936_v29  ;;  %v352_v29 = vlaneseq }
 0x1d6   :  { %v292_v34 = vmul.f32 %v3862_v30, %v284_v31  ;;  %v5950_v41 = vshrl.u32 %v352_v29, 7  ;;  %v208_v31 = vld [vmem:[%s7433_s26 + $0x18] sm:$0xff] }
 0x1d7   :  { %v5121_v35 = vpop.eup %5120 }
 0x1d8   :  { %v300_v36 = vadd.f32 %v3863_v32, %v292_v34  ;;  %v285_v37 = vmul.f32 %v5121_v35, %v5939_v33  ;;  %v5953_v33 = vsub.s32 0, %v5950_v41  ;;  %v362_v42 = vsub.s32 2, %v5950_v41 }
 0x1d9   :  { %v5957_v44 = vsub.s32 1, %v5950_v41  ;;  %v5375_v41 = vld [vmem:[%s7432_s29 + $0x8] sm:$0xff] }
 0x1da   :  { %432 = vmatmul.mubr.f32.vlgmr.msra.gmra.mrb[0].mxu0 %v300_v36  ;;  %4332 = vmatprep.mubr.f32.mxu1 %v300_v36  ;;  %v293_v38 = vmul.f32 %v3862_v30, %v285_v37  ;;  %v355_v46 = vrot.slane %v350_v43, %v5953_v33  ;;  %v363_v48 = vrot.slane %v350_v43, %v362_v42  ;;  %v207_v30 = vld [vmem:[%s7433_s26 + $0x10] sm:$0xff]  ;;  %v209_v37 = vld [vmem:[%s7433_s26 + $0x20] sm:$0xff] }
 0x1db   :  { %437 = vmatprep.mubr.f32.mxu0 %v5699_v7  ;;  %v359_v49 = vrot.slane %v350_v43, %v5957_v44 }
 0x1dc   :  { %v301_v39 = vadd.f32 %v3863_v32, %v293_v38  ;;  %v210_v38 = vld [vmem:[%s7433_s26 + $0x28] sm:$0xff] }
 0x1de   :  { %438 = vmatmul.mubr.f32.gmra.mrb[2].mxu0 %v301_v39  ;;  %4333 = vmatmul.mubr.f32.vlgmr.msra.gmra.mrb[0].mxu1 %v301_v39 }
 0x1df   :  { %4339 = vmatprep.mubr.msk.f32.mxu1 %vm519_vm0, %v177_v40 }
 0x2ad   :  { %v433_v45 = vpop.f32.mrb[0].mxu0 }
 0x2ae   :  { %v435_v47 = vpop.f32.mrb[1].mxu0  ;;  %v434_v52 = vadd.f32 %v433_v45, %v355_v46  ;;  %v211_v45 = vld [vmem:[%s7433_s26 + $0x30] sm:$0xff] }
 0x2af   :  { %v436_v57 = vadd.f32 %v435_v47, %v359_v49 }
 0x2b1   :  { %v439_v50 = vpop.f32.mrb[2].mxu0  ;;  %v4334_v51 = vpop.f32.mrb[0].mxu1 }
 0x2b2   :  { %v440_v53 = vadd.f32 %v439_v50, %v355_v46  ;;  %v516_v54 = vadd.f32 %v4334_v51, %v363_v48  ;;  %v441_v55 = vpop.f32.mrb[3].mxu0  ;;  %v510_v56 = vpop.f32.mrb[1].mxu1  ;;  %v212_v46 = vld [vmem:[%s7433_s26 + $0x38] sm:$0xff]  ;;  %v213_v51 = vld [vmem:[%s7433_s26 + $0x40] sm:$0xff] }
 0x2b3   :  { %v442_v58 = vadd.f32 %v441_v55, %v359_v49  ;;  %v511_v59 = vadd.f32 %v510_v56, %v363_v48 }
 0x2b4   :  { %v4744_v60 = vpack.c.bf16 %v440_v53, %v434_v52  ;;  %v214_v52 = vld [vmem:[%s7433_s26 + $0x48] sm:$0xff] }
 0x2b5   :  { %v4748_v61 = vpack.c.bf16 %v442_v58, %v436_v57  ;;  %v4752_v62 = vpack.c.bf16 %v516_v54, %v511_v59  ;;  %v215_v57 = vld [vmem:[%s7433_s26 + $0x50] sm:$0xff]  ;;  %v216_v58 = vld [vmem:[%s7433_s26 + $0x58] sm:$0xff] }
 0x2b6   :  { %4745 = vmatprep.subr.bf16.mxu1 %v4744_v60 }
 0x2b7   :  { %4747 = vmatpush3.bf16.msra.mxu1 %v4744_v60  ;;  %4749 = vmatprep.subr.bf16.mxu0 %v4748_v61 }
 0x2b8   :  { %4751 = vmatpush3.bf16.xpose.msra.mxu0 %v4748_v61  ;;  %4753 = vmatprep.subr.bf16.mxu1 %v4752_v62 }
 0x2ba   :  { %4340 = vmatmul.mubr.msk.f32.vlgmr.msra.gmra.mrb[2].mxu1 %vm519_vm0, %v178_v63  ;;  %v217_v63 = vld [vmem:[%s7433_s26 + $0x60] sm:$0xff] }
 0x2bb   :  { %4755 = vmatpush3.bf16.msra.mxu1 %v4752_v62  ;;  %4342 = vmatprep.mubr.msk.f32.mxu1 %vm519_vm0, %v179_v0  ;;  %v218_v0 = vld [vmem:[%s7433_s26 + $0x68] sm:$0xff] }
 0x2be   :  { %4343 = vmatmul.mubr.msk.f32.gmra.mrb[4].mxu1 %vm519_vm0, %v180_v1 }
 0x2bf   :  { %4345 = vmatprep.mubr.msk.f32.mxu1 %vm519_vm0, %v181_v2 }
 0x2c2   :  { %4346 = vmatmul.mubr.msk.f32.gmra.mrb[6].mxu1 %vm519_vm0, %v182_v3 }
 0x2c3   :  { %4348 = vmatprep.mubr.msk.f32.mxu1 %vm519_vm0, %v183_v4 }
 0x2c6   :  { %4349 = vmatmul.mubr.msk.f32.gmra.mrb[8].mxu1 %vm519_vm0, %v184_v5  ;;  %v219_v5 = vld [vmem:[%s7433_s26 + $0x70] sm:$0xff] }
 0x2c7   :  { %4351 = vmatprep.mubr.msk.f32.mxu1 %vm519_vm0, %v185_v6  ;;  %v220_v6 = vld [vmem:[%s7433_s26 + $0x78] sm:$0xff] }
 0x2ca   :  { %4352 = vmatmul.mubr.msk.f32.gmra.mrb[10].mxu1 %vm519_vm0, %v186_v8 }
 0x2cb   :  { %4354 = vmatprep.mubr.msk.f32.mxu1 %vm519_vm0, %v187_v9 }
 0x2ce   :  { %4355 = vmatmul.mubr.msk.f32.gmra.mrb[12].mxu1 %vm519_vm0, %v188_v10 }
 0x2cf   :  { %4357 = vmatprep.mubr.msk.f32.mxu1 %vm519_vm0, %v189_v11 }
 0x2d2   :  { %4358 = vmatmul.mubr.msk.f32.gmra.mrb[14].mxu1 %vm519_vm0, %v190_v12  ;;  %v221_v12 = vld [vmem:[%s7433_s26 + $0x80] sm:$0xff] }
 0x2d3   :  { %4360 = vmatprep.mubr.msk.f32.mxu1 %vm519_vm0, %v191_v13  ;;  %v222_v13 = vld [vmem:[%s7433_s26 + $0x88] sm:$0xff] }
 0x2d6   :  { %4361 = vmatmul.mubr.msk.f32.gmra.mrb[16].mxu1 %vm519_vm0, %v192_v14 }
 0x2d7   :  { %4363 = vmatprep.mubr.msk.f32.mxu1 %vm519_vm0, %v193_v15 }
 0x2da   :  { %4364 = vmatmul.mubr.msk.f32.gmra.mrb[18].mxu1 %vm519_vm0, %v194_v16 }
 0x2db   :  { %4366 = vmatprep.mubr.msk.f32.mxu1 %vm519_vm0, %v195_v17 }
 0x2de   :  { %4367 = vmatmul.mubr.msk.f32.gmra.mrb[20].mxu1 %vm519_vm0, %v196_v18  ;;  %v223_v18 = vld [vmem:[%s7433_s26 + $0x90] sm:$0xff] }
 0x2df   :  { %4369 = vmatprep.mubr.msk.f32.mxu1 %vm519_vm0, %v197_v19  ;;  %v224_v19 = vld [vmem:[%s7433_s26 + $0x98] sm:$0xff] }
 0x2e2   :  { %4370 = vmatmul.mubr.msk.f32.gmra.mrb[22].mxu1 %vm519_vm0, %v198_v20 }
 0x2e3   :  { %4372 = vmatprep.mubr.msk.f32.mxu1 %vm519_vm0, %v199_v21 }
 0x2e6   :  { %4373 = vmatmul.mubr.msk.f32.gmra.mrb[24].mxu1 %vm519_vm0, %v200_v22 }
 0x38d   :  { %v4341_v25 = vpop.f32.mrb[2].mxu1 }
 0x38e   :  { %v658_v26 = vpop.f32.mrb[3].mxu1  ;;  %v778_v28 = vmul.f32 %v4341_v25, %v206_v24  ;;  %v225_v24 = vld [vmem:[%s7433_s26 + $0xa0] sm:$0xff]  ;;  %v226_v25 = vld [vmem:[%s7433_s26 + $0xa8] sm:$0xff] }
 0x38f   :  { %v777_v27 = vmul.f32 %v658_v26, %v205_v23 }
 0x391   :  { %v4344_v32 = vpop.f32.mrb[4].mxu1  ;;  %4379 = vmatprep.mubr.f32.mxu0 %v777_v27 }
 0x392   :  { %v668_v34 = vpop.f32.mrb[5].mxu1  ;;  %4380 = vmatmul.mubr.f32.vlgmr.msra.gmra.mrb[4].mxu0 %v778_v28  ;;  %v780_v36 = vmul.f32 %v4344_v32, %v208_v31  ;;  %v227_v31 = vld [vmem:[%s7433_s26 + $0xb0] sm:$0xff]  ;;  %v228_v32 = vld [vmem:[%s7433_s26 + $0xb8] sm:$0xff] }
 0x393   :  { %v779_v35 = vmul.f32 %v668_v34, %v207_v30 }
 0x395   :  { %v4347_v39 = vpop.f32.mrb[6].mxu1  ;;  %4382 = vmatprep.mubr.f32.mxu0 %v779_v35 }
 0x396   :  { %v678_v40 = vpop.f32.mrb[7].mxu1  ;;  %4383 = vmatmul.mubr.f32.gmra.mrb[6].mxu0 %v780_v36  ;;  %v782_v43 = vmul.f32 %v4347_v39, %v210_v38 }
 0x397   :  { %v781_v29 = vmul.f32 %v678_v40, %v209_v37 }
 0x399   :  { %v4350_v47 = vpop.f32.mrb[8].mxu1  ;;  %4385 = vmatprep.mubr.f32.mxu0 %v781_v29 }
 0x39a   :  { %v688_v48 = vpop.f32.mrb[9].mxu1  ;;  %4386 = vmatmul.mubr.f32.gmra.mrb[8].mxu0 %v782_v43  ;;  %v784_v50 = vmul.f32 %v4350_v47, %v212_v46 }
 0x39b   :  { %v783_v49 = vmul.f32 %v688_v48, %v211_v45 }
 0x39d   :  { %v4353_v53 = vpop.f32.mrb[10].mxu1  ;;  %4388 = vmatprep.mubr.f32.mxu0 %v783_v49 }
 0x39e   :  { %v698_v54 = vpop.f32.mrb[11].mxu1  ;;  %4389 = vmatmul.mubr.f32.gmra.mrb[10].mxu0 %v784_v50  ;;  %v786_v56 = vmul.f32 %v4353_v53, %v214_v52 }
 0x39f   :  { %v785_v55 = vmul.f32 %v698_v54, %v213_v51 }
 0x3a1   :  { %v4356_v59 = vpop.f32.mrb[12].mxu1  ;;  %4391 = vmatprep.mubr.f32.mxu0 %v785_v55 }
 0x3a2   :  { %v708_v60 = vpop.f32.mrb[13].mxu1  ;;  %4392 = vmatmul.mubr.f32.gmra.mrb[12].mxu0 %v786_v56  ;;  %v788_v62 = vmul.f32 %v4356_v59, %v216_v58 }
 0x3a3   :  { %v787_v61 = vmul.f32 %v708_v60, %v215_v57 }
 0x3a5   :  { %v4359_v1 = vpop.f32.mrb[14].mxu1  ;;  %4394 = vmatprep.mubr.f32.mxu0 %v787_v61 }
 0x3a6   :  { %v718_v2 = vpop.f32.mrb[15].mxu1  ;;  %4395 = vmatmul.mubr.f32.gmra.mrb[14].mxu0 %v788_v62  ;;  %v790_v4 = vmul.f32 %v4359_v1, %v218_v0 }
 0x3a7   :  { %v789_v3 = vmul.f32 %v718_v2, %v217_v63 }
 0x3a9   :  { %v4362_v8 = vpop.f32.mrb[16].mxu1  ;;  %4397 = vmatprep.mubr.f32.mxu0 %v789_v3 }
 0x3aa   :  { %v728_v9 = vpop.f32.mrb[17].mxu1  ;;  %4398 = vmatmul.mubr.f32.gmra.mrb[16].mxu0 %v790_v4  ;;  %v792_v11 = vmul.f32 %v4362_v8, %v220_v6 }
 0x3ab   :  { %v791_v10 = vmul.f32 %v728_v9, %v219_v5 }
 0x3ad   :  { %v4365_v14 = vpop.f32.mrb[18].mxu1  ;;  %4400 = vmatprep.mubr.f32.mxu0 %v791_v10 }
 0x3ae   :  { %v738_v15 = vpop.f32.mrb[19].mxu1  ;;  %4401 = vmatmul.mubr.f32.gmra.mrb[18].mxu0 %v792_v11  ;;  %v794_v17 = vmul.f32 %v4365_v14, %v222_v13 }
 0x3af   :  { %v793_v16 = vmul.f32 %v738_v15, %v221_v12 }
 0x3b1   :  { %v4368_v20 = vpop.f32.mrb[20].mxu1  ;;  %4403 = vmatprep.mubr.f32.mxu0 %v793_v16 }
 0x3b2   :  { %v748_v21 = vpop.f32.mrb[21].mxu1  ;;  %4404 = vmatmul.mubr.f32.gmra.mrb[20].mxu0 %v794_v17  ;;  %v796_v23 = vmul.f32 %v4368_v20, %v224_v19 }
 0x3b3   :  { %v795_v22 = vmul.f32 %v748_v21, %v223_v18 }
 0x3b5   :  { %v4371_v26 = vpop.f32.mrb[22].mxu1  ;;  %4406 = vmatprep.mubr.f32.mxu0 %v795_v22 }
 0x3b6   :  { %v758_v27 = vpop.f32.mrb[23].mxu1  ;;  %4407 = vmatmul.mubr.f32.gmra.mrb[22].mxu0 %v796_v23  ;;  %v798_v30 = vmul.f32 %v4371_v26, %v226_v25 }
 0x3b7   :  { %v797_v28 = vmul.f32 %v758_v27, %v225_v24 }
 0x3b9   :  { %v4374_v34 = vpop.f32.mrb[24].mxu1  ;;  %4409 = vmatprep.mubr.f32.mxu0 %v797_v28 }
 0x3ba   :  { %v768_v35 = vpop.f32.mrb[25].mxu1  ;;  %4410 = vmatmul.mubr.f32.gmra.mrb[24].mxu0 %v798_v30  ;;  %v800_v37 = vmul.f32 %v4374_v34, %v228_v32 }
 0x3bb   :  { %v799_v36 = vmul.f32 %v768_v35, %v227_v31 }
 0x3bd   :  { %4412 = vmatprep.mubr.f32.mxu0 %v799_v36 }
 0x3be   :  { %4413 = vmatmul.mubr.f32.gmra.mrb[26].mxu0 %v800_v37 }
 0x465   :  { %v4381_v38 = vpop.f32.mrb[4].mxu0 }
 0x466   :  { %v6127_v39 = vmul.f32 0.5, %v4381_v38  ;;  %v867_v40 = vpop.f32.mrb[5].mxu0 }
 0x467   :  { %v6129_v29 = vmul.f32 0.5, %v867_v40 }
 0x468   :  { %v1013_v43 = vsel %vm519_vm0, %v6127_v39, -inf }
 0x469   :  { %1014 = vmax.xlane.f32.xlu1 %v1013_v43  ;;  %v4384_v45 = vpop.f32.mrb[6].mxu0  ;;  %v1010_v46 = vsel %vm519_vm0, %v6129_v29, -inf }
 0x46a   :  { %v6135_v47 = vmul.f32 0.5, %v4384_v45  ;;  %1011 = vmax.xlane.f32.xlu0 %v1010_v46  ;;  %v877_v48 = vpop.f32.mrb[7].mxu0 }
 0x46b   :  { %v6137_v49 = vmul.f32 0.5, %v877_v48 }
 0x46c   :  { %v1019_v50 = vsel %vm519_vm0, %v6135_v47, -inf }
 0x46d   :  { %1020 = vmax.xlane.f32.xlu1 %v1019_v50  ;;  %v4387_v51 = vpop.f32.mrb[8].mxu0  ;;  %v1016_v52 = vsel %vm519_vm0, %v6137_v49, -inf }
 0x46e   :  { %v6143_v53 = vmul.f32 0.5, %v4387_v51  ;;  %1017 = vmax.xlane.f32.xlu0 %v1016_v52  ;;  %v887_v54 = vpop.f32.mrb[9].mxu0 }
 0x46f   :  { %v6145_v55 = vmul.f32 0.5, %v887_v54 }
 0x470   :  { %v1025_v56 = vsel %vm519_vm0, %v6143_v53, -inf }
 0x471   :  { %1026 = vmax.xlane.f32.xlu1 %v1025_v56  ;;  %v4390_v57 = vpop.f32.mrb[10].mxu0  ;;  %v1022_v58 = vsel %vm519_vm0, %v6145_v55, -inf }
 0x472   :  { %v6151_v59 = vmul.f32 0.5, %v4390_v57  ;;  %1023 = vmax.xlane.f32.xlu0 %v1022_v58  ;;  %v897_v60 = vpop.f32.mrb[11].mxu0 }
 0x473   :  { %v6153_v61 = vmul.f32 0.5, %v897_v60 }
 0x474   :  { %v1031_v62 = vsel %vm519_vm0, %v6151_v59, -inf }
 0x475   :  { %1032 = vmax.xlane.f32.xlu1 %v1031_v62  ;;  %v4393_v63 = vpop.f32.mrb[12].mxu0  ;;  %v1028_v0 = vsel %vm519_vm0, %v6153_v61, -inf }
 0x476   :  { %v6159_v1 = vmul.f32 0.5, %v4393_v63  ;;  %1029 = vmax.xlane.f32.xlu0 %v1028_v0  ;;  %v907_v2 = vpop.f32.mrb[13].mxu0 }
 0x477   :  { %v6161_v3 = vmul.f32 0.5, %v907_v2 }
 0x478   :  { %v1037_v4 = vsel %vm519_vm0, %v6159_v1, -inf }
 0x479   :  { %1038 = vmax.xlane.f32.xlu1 %v1037_v4  ;;  %v4396_v5 = vpop.f32.mrb[14].mxu0  ;;  %v1034_v6 = vsel %vm519_vm0, %v6161_v3, -inf }
 0x47a   :  { %v6167_v8 = vmul.f32 0.5, %v4396_v5  ;;  %1035 = vmax.xlane.f32.xlu0 %v1034_v6  ;;  %v917_v9 = vpop.f32.mrb[15].mxu0 }
 0x47b   :  { %v6169_v10 = vmul.f32 0.5, %v917_v9 }
 0x47c   :  { %v1043_v11 = vsel %vm519_vm0, %v6167_v8, -inf }
 0x47d   :  { %1044 = vmax.xlane.f32.xlu1 %v1043_v11  ;;  %v4399_v12 = vpop.f32.mrb[16].mxu0  ;;  %v1040_v13 = vsel %vm519_vm0, %v6169_v10, -inf }
 0x47e   :  { %v6175_v14 = vmul.f32 0.5, %v4399_v12  ;;  %1041 = vmax.xlane.f32.xlu0 %v1040_v13  ;;  %v927_v15 = vpop.f32.mrb[17].mxu0 }
 0x47f   :  { %v6177_v16 = vmul.f32 0.5, %v927_v15 }
 0x480   :  { %v1049_v17 = vsel %vm519_vm0, %v6175_v14, -inf }
 0x481   :  { %1050 = vmax.xlane.f32.xlu1 %v1049_v17  ;;  %v4402_v18 = vpop.f32.mrb[18].mxu0  ;;  %v1046_v19 = vsel %vm519_vm0, %v6177_v16, -inf }
 0x482   :  { %v6183_v20 = vmul.f32 0.5, %v4402_v18  ;;  %1047 = vmax.xlane.f32.xlu0 %v1046_v19  ;;  %v937_v21 = vpop.f32.mrb[19].mxu0 }
 0x483   :  { %v6185_v22 = vmul.f32 0.5, %v937_v21 }
 0x484   :  { %v1055_v23 = vsel %vm519_vm0, %v6183_v20, -inf }
 0x485   :  { %1056 = vmax.xlane.f32.xlu1 %v1055_v23  ;;  %v4405_v24 = vpop.f32.mrb[20].mxu0  ;;  %v1052_v25 = vsel %vm519_vm0, %v6185_v22, -inf }
 0x486   :  { %v6191_v26 = vmul.f32 0.5, %v4405_v24  ;;  %1053 = vmax.xlane.f32.xlu0 %v1052_v25  ;;  %v947_v27 = vpop.f32.mrb[21].mxu0 }
 0x487   :  { %v6193_v28 = vmul.f32 0.5, %v947_v27 }
 0x488   :  { %v1061_v30 = vsel %vm519_vm0, %v6191_v26, -inf }
 0x489   :  { %1062 = vmax.xlane.f32.xlu1 %v1061_v30  ;;  %v4408_v31 = vpop.f32.mrb[22].mxu0  ;;  %v1058_v32 = vsel %vm519_vm0, %v6193_v28, -inf }
 0x48a   :  { %v6199_v34 = vmul.f32 0.5, %v4408_v31  ;;  %1059 = vmax.xlane.f32.xlu0 %v1058_v32  ;;  %v957_v35 = vpop.f32.mrb[23].mxu0 }
 0x48b   :  { %v6201_v36 = vmul.f32 0.5, %v957_v35 }
 0x48c   :  { %v1067_v37 = vsel %vm519_vm0, %v6199_v34, -inf }
 0x48d   :  { %1068 = vmax.xlane.f32.xlu1 %v1067_v37  ;;  %v4411_v38 = vpop.f32.mrb[24].mxu0  ;;  %v1064_v40 = vsel %vm519_vm0, %v6201_v36, -inf }
 0x48e   :  { %v6207_v43 = vmul.f32 0.5, %v4411_v38  ;;  %1065 = vmax.xlane.f32.xlu0 %v1064_v40  ;;  %v967_v45 = vpop.f32.mrb[25].mxu0 }
 0x48f   :  { %v6209_v46 = vmul.f32 0.5, %v967_v45  ;;  %v231_v45 = vld [vmem:[%s7434_s0 + $0x10] sm:$0xff] }
 0x490   :  { %v1073_v48 = vsel %vm519_vm0, %v6207_v43, -inf }
 0x491   :  { %1074 = vmax.xlane.f32.xlu1 %v1073_v48  ;;  %v4414_v50 = vpop.f32.mrb[26].mxu0  ;;  %v1070_v51 = vsel %vm519_vm0, %v6209_v46, -inf }
 0x492   :  { %v6215_v52 = vmul.f32 0.5, %v4414_v50  ;;  %1071 = vmax.xlane.f32.xlu0 %v1070_v51  ;;  %v977_v54 = vpop.f32.mrb[27].mxu0 }
 0x493   :  { %v6217_v56 = vmul.f32 0.5, %v977_v54 }
 0x494   :  { %v1079_v57 = vsel %vm519_vm0, %v6215_v52, -inf }
 0x495   :  { %1080 = vmax.xlane.f32.xlu1 %v1079_v57  ;;  %v1076_v58 = vsel %vm519_vm0, %v6217_v56, -inf }
 0x496   :  { %1077 = vmax.xlane.f32.xlu0 %v1076_v58 }
 0x4f6   :  { %v1015_v60 = vpop.xlane.xlu1 %1014 }
 0x4f7   :  { %v1083_v62 = vsub.f32 %v6127_v39, %v1015_v60  ;;  %v1012_v63 = vpop.xlane.xlu0 %1011 }
 0x4f8   :  { %v1082_v0 = vsub.f32 %v6129_v29, %v1012_v63  ;;  %v234_v63 = vld [vmem:[%s7434_s0 + $0x28] sm:$0xff] }
 0x4f9   :  { %v1108_v2 = vmul.f32 1.442695, %v1083_v62 }
 0x4fa   :  { %v1106_v4 = vmul.f32 1.442695, %v1082_v0  ;;  %v1021_v5 = vpop.xlane.xlu1 %1020 }
 0x4fb   :  { %5122 = vpow2.f32 %v1108_v2  ;;  %v1085_v6 = vsub.f32 %v6135_v47, %v1021_v5  ;;  %v1018_v9 = vpop.xlane.xlu0 %1017 }
 0x4fc   :  { %5124 = vpow2.f32 %v1106_v4  ;;  %v1084_v11 = vsub.f32 %v6137_v49, %v1018_v9  ;;  %v230_v49 = vld [vmem:[%s7434_s0 + $0x8] sm:$0xff]  ;;  %v233_v4 = vld [vmem:[%s7434_s0 + $0x20] sm:$0xff] }
 0x4fd   :  { %v1112_v12 = vmul.f32 1.442695, %v1085_v6 }
 0x4fe   :  { %v1110_v13 = vmul.f32 1.442695, %v1084_v11  ;;  %v1027_v15 = vpop.xlane.xlu1 %1026 }
 0x4ff   :  { %5126 = vpow2.f32 %v1112_v12  ;;  %v1087_v17 = vsub.f32 %v6143_v53, %v1027_v15  ;;  %v1024_v39 = vpop.xlane.xlu0 %1023  ;;  %v229_v53 = vld [vmem:[%s7434_s0] sm:$0xff] }
 0x500   :  { %5128 = vpow2.f32 %v1110_v13  ;;  %v1086_v29 = vsub.f32 %v6145_v55, %v1024_v39  ;;  %v236_v39 = vld [vmem:[%s7434_s0 + $0x38] sm:$0xff] }
 0x501   :  { %v1116_v18 = vmul.f32 1.442695, %v1087_v17 }
 0x502   :  { %v1114_v19 = vmul.f32 1.442695, %v1086_v29  ;;  %v1033_v21 = vpop.xlane.xlu1 %1032 }
 0x503   :  { %5130 = vpow2.f32 %v1116_v18  ;;  %v1089_v47 = vsub.f32 %v6151_v59, %v1033_v21  ;;  %v1030_v23 = vpop.xlane.xlu0 %1029 }
 0x504   :  { %5132 = vpow2.f32 %v1114_v19  ;;  %v1088_v24 = vsub.f32 %v6153_v61, %v1030_v23  ;;  %v232_v61 = vld [vmem:[%s7434_s0 + $0x18] sm:$0xff]  ;;  %v235_v19 = vld [vmem:[%s7434_s0 + $0x30] sm:$0xff] }
 0x505   :  { %v5123_v25 = vpop.eup %5122  ;;  %v1120_v55 = vmul.f32 1.442695, %v1089_v47 }
 0x506   :  { %v5125_v27 = vpop.eup %5124  ;;  %v1118_v30 = vmul.f32 1.442695, %v1088_v24  ;;  %v1039_v31 = vpop.xlane.xlu1 %1038  ;;  %v6237_v32 = vmul.f32 %v5123_v25, %v230_v49 }
 0x507   :  { %5134 = vpow2.f32 %v1120_v55  ;;  %v1091_v59 = vsub.f32 %v6159_v1, %v1039_v31  ;;  %v1036_v35 = vpop.xlane.xlu0 %1035  ;;  %v6240_v37 = vmul.f32 %v5125_v27, %v229_v53  ;;  %v238_v27 = vld [vmem:[%s7434_s0 + $0x48] sm:$0xff] }
 0x508   :  { %5136 = vpow2.f32 %v1118_v30  ;;  %v1090_v38 = vsub.f32 %v6161_v3, %v1036_v35  ;;  %v1181_v40 = vsel %vm519_vm0, %v6237_v32, 0.0 }
 0x509   :  { %v5127_v48 = vpop.eup %5126  ;;  %v1124_v50 = vmul.f32 1.442695, %v1091_v59  ;;  %1182 = vadd.xlane.f32.xlu1 %v1181_v40  ;;  %v1178_v1 = vsel %vm519_vm0, %v6240_v37, 0.0  ;;  %v237_v59 = vld [vmem:[%s7434_s0 + $0x40] sm:$0xff] }
 0x50a   :  { %v5129_v51 = vpop.eup %5128  ;;  %v1122_v54 = vmul.f32 1.442695, %v1090_v38  ;;  %v1045_v57 = vpop.xlane.xlu1 %1044  ;;  %1179 = vadd.xlane.f32.xlu0 %v1178_v1  ;;  %v6253_v58 = vmul.f32 %v5127_v48, %v232_v61 }
 0x50b   :  { %5138 = vpow2.f32 %v1124_v50  ;;  %v1093_v3 = vsub.f32 %v6167_v8, %v1045_v57  ;;  %v1042_v60 = vpop.xlane.xlu0 %1041  ;;  %v6256_v62 = vmul.f32 %v5129_v51, %v231_v45  ;;  %v240_v51 = vld [vmem:[%s7434_s0 + $0x58] sm:$0xff] }
 0x50c   :  { %5140 = vpow2.f32 %v1122_v54  ;;  %v1092_v0 = vsub.f32 %v6169_v10, %v1042_v60  ;;  %v1187_v2 = vsel %vm519_vm0, %v6253_v58, 0.0 }
 0x50d   :  { %v5131_v5 = vpop.eup %5130  ;;  %v1128_v6 = vmul.f32 1.442695, %v1093_v3  ;;  %1188 = vadd.xlane.f32.xlu1 %v1187_v2  ;;  %v1184_v8 = vsel %vm519_vm0, %v6256_v62, 0.0  ;;  %v239_v3 = vld [vmem:[%s7434_s0 + $0x50] sm:$0xff] }
 0x50e   :  { %v5133_v9 = vpop.eup %5132  ;;  %v1126_v11 = vmul.f32 1.442695, %v1092_v0  ;;  %v1051_v12 = vpop.xlane.xlu1 %1050  ;;  %1185 = vadd.xlane.f32.xlu0 %v1184_v8  ;;  %v6269_v13 = vmul.f32 %v5131_v5, %v234_v63 }
 0x50f   :  { %5142 = vpow2.f32 %v1128_v6  ;;  %v1095_v10 = vsub.f32 %v6175_v14, %v1051_v12  ;;  %v1048_v15 = vpop.xlane.xlu0 %1047  ;;  %v6272_v17 = vmul.f32 %v5133_v9, %v233_v4  ;;  %v242_v9 = vld [vmem:[%s7434_s0 + $0x68] sm:$0xff] }
 0x510   :  { %5144 = vpow2.f32 %v1126_v11  ;;  %v1094_v29 = vsub.f32 %v6177_v16, %v1048_v15  ;;  %v1193_v18 = vsel %vm519_vm0, %v6269_v13, 0.0 }
 0x511   :  { %v5135_v21 = vpop.eup %5134  ;;  %v1132_v47 = vmul.f32 1.442695, %v1095_v10  ;;  %1194 = vadd.xlane.f32.xlu1 %v1193_v18  ;;  %v1190_v14 = vsel %vm519_vm0, %v6272_v17, 0.0  ;;  %v241_v10 = vld [vmem:[%s7434_s0 + $0x60] sm:$0xff] }
 0x512   :  { %v5137_v23 = vpop.eup %5136  ;;  %v1130_v49 = vmul.f32 1.442695, %v1094_v29  ;;  %v1057_v24 = vpop.xlane.xlu1 %1056  ;;  %1191 = vadd.xlane.f32.xlu0 %v1190_v14  ;;  %v6285_v53 = vmul.f32 %v5135_v21, %v236_v39 }
 0x513   :  { %5146 = vpow2.f32 %v1132_v47  ;;  %v1097_v16 = vsub.f32 %v6183_v20, %v1057_v24  ;;  %v1054_v25 = vpop.xlane.xlu0 %1053  ;;  %v6288_v55 = vmul.f32 %v5137_v23, %v235_v19  ;;  %v244_v23 = vld [vmem:[%s7434_s0 + $0x78] sm:$0xff] }
 0x514   :  { %5148 = vpow2.f32 %v1130_v49  ;;  %v1096_v30 = vsub.f32 %v6185_v22, %v1054_v25  ;;  %v1199_v31 = vsel %vm519_vm0, %v6285_v53, 0.0 }
 0x515   :  { %v5139_v35 = vpop.eup %5138  ;;  %v1136_v61 = vmul.f32 1.442695, %v1097_v16  ;;  %1200 = vadd.xlane.f32.xlu1 %v1199_v31  ;;  %v1196_v20 = vsel %vm519_vm0, %v6288_v55, 0.0  ;;  %v243_v16 = vld [vmem:[%s7434_s0 + $0x70] sm:$0xff] }
 0x516   :  { %v5141_v38 = vpop.eup %5140  ;;  %v1134_v40 = vmul.f32 1.442695, %v1096_v30  ;;  %v1063_v45 = vpop.xlane.xlu1 %1062  ;;  %1197 = vadd.xlane.f32.xlu0 %v1196_v20  ;;  %v6301_v48 = vmul.f32 %v5139_v35, %v238_v27 }
 0x517   :  { %5150 = vpow2.f32 %v1136_v61  ;;  %v1099_v22 = vsub.f32 %v6191_v26, %v1063_v45  ;;  %v1060_v50 = vpop.xlane.xlu0 %1059  ;;  %v6304_v1 = vmul.f32 %v5141_v38, %v237_v59  ;;  %v246_v38 = vld [vmem:[%s7434_s0 + $0x88] sm:$0xff] }
 0x518   :  { %5152 = vpow2.f32 %v1134_v40  ;;  %v1098_v54 = vsub.f32 %v6193_v28, %v1060_v50  ;;  %v1205_v57 = vsel %vm519_vm0, %v6301_v48, 0.0 }
 0x519   :  { %v5143_v60 = vpop.eup %5142  ;;  %v1140_v63 = vmul.f32 1.442695, %v1099_v22  ;;  %1206 = vadd.xlane.f32.xlu1 %v1205_v57  ;;  %v1202_v26 = vsel %vm519_vm0, %v6304_v1, 0.0  ;;  %v245_v22 = vld [vmem:[%s7434_s0 + $0x80] sm:$0xff] }
 0x51a   :  { %v5145_v0 = vpop.eup %5144  ;;  %v1138_v2 = vmul.f32 1.442695, %v1098_v54  ;;  %v1069_v4 = vpop.xlane.xlu1 %1068  ;;  %1203 = vadd.xlane.f32.xlu0 %v1202_v26  ;;  %v6317_v5 = vmul.f32 %v5143_v60, %v240_v51  ;;  %v248_v60 = vld [vmem:[%s7434_s0 + $0x98] sm:$0xff]  ;;  %v247_v26 = vld [vmem:[%s7434_s0 + $0x90] sm:$0xff] }
 0x51b   :  { %5154 = vpow2.f32 %v1140_v63  ;;  %v1101_v28 = vsub.f32 %v6199_v34, %v1069_v4  ;;  %v1066_v6 = vpop.xlane.xlu0 %1065  ;;  %v6320_v8 = vmul.f32 %v5145_v0, %v239_v3 }
 0x51c   :  { %5156 = vpow2.f32 %v1138_v2  ;;  %v1100_v11 = vsub.f32 %v6201_v36, %v1066_v6  ;;  %v1211_v12 = vsel %vm519_vm0, %v6317_v5, 0.0 }
 0x51d   :  { %v5147_v15 = vpop.eup %5146  ;;  %v1144_v39 = vmul.f32 1.442695, %v1101_v28  ;;  %1212 = vadd.xlane.f32.xlu1 %v1211_v12  ;;  %v1208_v34 = vsel %vm519_vm0, %v6320_v8, 0.0  ;;  %v249_v12 = vld [vmem:[%s7434_s0 + $0xa0] sm:$0xff] }
 0x51e   :  { %v5149_v29 = vpop.eup %5148  ;;  %v1142_v18 = vmul.f32 1.442695, %v1100_v11  ;;  %v1075_v19 = vpop.xlane.xlu1 %1074  ;;  %1209 = vadd.xlane.f32.xlu0 %v1208_v34  ;;  %v6333_v21 = vmul.f32 %v5147_v15, %v242_v9  ;;  %v250_v9 = vld [vmem:[%s7434_s0 + $0xa8] sm:$0xff] }
 0x51f   :  { %5158 = vpow2.f32 %v1144_v39  ;;  %v1103_v36 = vsub.f32 %v6207_v43, %v1075_v19  ;;  %v1072_v47 = vpop.xlane.xlu0 %1071  ;;  %v6336_v14 = vmul.f32 %v5149_v29, %v241_v10 }
 0x520   :  { %5160 = vpow2.f32 %v1142_v18  ;;  %v1102_v49 = vsub.f32 %v6209_v46, %v1072_v47  ;;  %v1217_v24 = vsel %vm519_vm0, %v6333_v21, 0.0  ;;  %v252_v18 = vld [vmem:[%s7434_s0 + $0xb8] sm:$0xff] }
 0x521   :  { %v5151_v25 = vpop.eup %5150  ;;  %v1148_v27 = vmul.f32 1.442695, %v1103_v36  ;;  %1218 = vadd.xlane.f32.xlu1 %v1217_v24  ;;  %v1214_v43 = vsel %vm519_vm0, %v6336_v14, 0.0  ;;  %v251_v36 = vld [vmem:[%s7434_s0 + $0xb0] sm:$0xff] }
 0x522   :  { %v5153_v30 = vpop.eup %5152  ;;  %v1146_v31 = vmul.f32 1.442695, %v1102_v49  ;;  %v1081_v59 = vpop.xlane.xlu1 %1080  ;;  %1215 = vadd.xlane.f32.xlu0 %v1214_v43  ;;  %v6349_v35 = vmul.f32 %v5151_v25, %v244_v23 }
 0x523   :  { %5162 = vpow2.f32 %v1148_v27  ;;  %v1105_v46 = vsub.f32 %v6215_v52, %v1081_v59  ;;  %v1078_v61 = vpop.xlane.xlu0 %1077  ;;  %v6352_v20 = vmul.f32 %v5153_v30, %v243_v16 }
 0x524   :  { %5164 = vpow2.f32 %v1146_v31  ;;  %v1104_v40 = vsub.f32 %v6217_v56, %v1078_v61  ;;  %v1223_v45 = vsel %vm519_vm0, %v6349_v35, 0.0 }
 0x525   :  { %v5155_v50 = vpop.eup %5154  ;;  %v1152_v51 = vmul.f32 1.442695, %v1105_v46  ;;  %1224 = vadd.xlane.f32.xlu1 %v1223_v45  ;;  %v1220_v52 = vsel %vm519_vm0, %v6352_v20, 0.0 }
 0x526   :  { %v5157_v54 = vpop.eup %5156  ;;  %v1150_v57 = vmul.f32 1.442695, %v1104_v40  ;;  %1221 = vadd.xlane.f32.xlu0 %v1220_v52  ;;  %v6365_v3 = vmul.f32 %v5155_v50, %v246_v38 }
 0x527   :  { %5166 = vpow2.f32 %v1152_v51  ;;  %v6367_v56 = vmul.f32 %v5157_v54, %v245_v22 }
 0x528   :  { %5168 = vpow2.f32 %v1150_v57  ;;  %v1229_v63 = vsel %vm519_vm0, %v6365_v3, 0.0 }
 0x529   :  { %v5159_v0 = vpop.eup %5158  ;;  %1230 = vadd.xlane.f32.xlu1 %v1229_v63  ;;  %v1226_v2 = vsel %vm519_vm0, %v6367_v56, 0.0 }
 0x52a   :  { %v5161_v4 = vpop.eup %5160  ;;  %1227 = vadd.xlane.f32.xlu0 %v1226_v2  ;;  %v6379_v28 = vmul.f32 %v5159_v0, %v248_v60 }
 0x52b   :  { %v6381_v6 = vmul.f32 %v5161_v4, %v247_v26 }
 0x52c   :  { %v1235_v11 = vsel %vm519_vm0, %v6379_v28, 0.0 }
 0x52d   :  { %v5163_v10 = vpop.eup %5162  ;;  %1236 = vadd.xlane.f32.xlu1 %v1235_v11  ;;  %v1232_v15 = vsel %vm519_vm0, %v6381_v6, 0.0 }
 0x52e   :  { %v5165_v39 = vpop.eup %5164  ;;  %1233 = vadd.xlane.f32.xlu0 %v1232_v15  ;;  %v6393_v34 = vmul.f32 %v5163_v10, %v250_v9 }
 0x52f   :  { %v6395_v29 = vmul.f32 %v5165_v39, %v249_v12 }
 0x530   :  { %v1241_v19 = vsel %vm519_vm0, %v6393_v34, 0.0 }
 0x531   :  { %v5167_v47 = vpop.eup %5166  ;;  %1242 = vadd.xlane.f32.xlu1 %v1241_v19  ;;  %v1238_v23 = vsel %vm519_vm0, %v6395_v29, 0.0 }
 0x532   :  { %v5169_v49 = vpop.eup %5168  ;;  %1239 = vadd.xlane.f32.xlu0 %v1238_v23  ;;  %v6407_v24 = vmul.f32 %v5167_v47, %v252_v18 }
 0x533   :  { %v6409_v16 = vmul.f32 %v5169_v49, %v251_v36 }
 0x534   :  { %v1247_v25 = vsel %vm519_vm0, %v6407_v24, 0.0 }
 0x535   :  { %1248 = vadd.xlane.f32.xlu1 %v1247_v25  ;;  %v1244_v27 = vsel %vm519_vm0, %v6409_v16, 0.0 }
 0x536   :  { %1245 = vadd.xlane.f32.xlu0 %v1244_v27 }
 0x596   :  { %v1183_v43 = vpop.xlane.xlu1 %1182 }
 0x597   :  { %5170 = vrcp.f32 %v1183_v43  ;;  %v1180_v30 = vpop.xlane.xlu0 %1179 }
 0x598   :  { %5172 = vrcp.f32 %v1180_v30 }
 0x59a   :  { %v1189_v31 = vpop.xlane.xlu1 %1188 }
 0x59b   :  { %5174 = vrcp.f32 %v1189_v31  ;;  %v1186_v59 = vpop.xlane.xlu0 %1185 }
 0x59c   :  { %5176 = vrcp.f32 %v1186_v59 }
 0x59e   :  { %v1195_v46 = vpop.xlane.xlu1 %1194 }
 0x59f   :  { %5178 = vrcp.f32 %v1195_v46  ;;  %v1192_v61 = vpop.xlane.xlu0 %1191 }
 0x5a0   :  { %5180 = vrcp.f32 %v1192_v61 }
 0x5a1   :  { %v5171_v38 = vpop.eup %5170 }
 0x5a2   :  { %v5173_v40 = vpop.eup %5172  ;;  %v1201_v45 = vpop.xlane.xlu1 %1200  ;;  %v1275_v51 = vmul.f32 %v5171_v38, %v6237_v32 }
 0x5a3   :  { %5182 = vrcp.f32 %v1201_v45  ;;  %v1198_v22 = vpop.xlane.xlu0 %1197  ;;  %v1274_v50 = vmul.f32 %v5173_v40, %v6240_v37 }
 0x5a4   :  { %5184 = vrcp.f32 %v1198_v22 }
 0x5a5   :  { %v5175_v52 = vpop.eup %5174  ;;  %4419 = vmatprep.mubr.msk.f32.mxu1 %vm519_vm0, %v1274_v50 }
 0x5a6   :  { %v5177_v54 = vpop.eup %5176  ;;  %v1207_v57 = vpop.xlane.xlu1 %1206  ;;  %4420 = vmatmul.mubr.msk.f32.vlgmr.msra.gmra.mrb[26].mxu1 %vm519_vm0, %v1275_v51  ;;  %v1277_v26 = vmul.f32 %v5175_v52, %v6253_v58 }
 0x5a7   :  { %5186 = vrcp.f32 %v1207_v57  ;;  %v1204_v60 = vpop.xlane.xlu0 %1203  ;;  %v1276_v63 = vmul.f32 %v5177_v54, %v6256_v62 }
 0x5a8   :  { %5188 = vrcp.f32 %v1204_v60 }
 0x5a9   :  { %v5179_v0 = vpop.eup %5178  ;;  %4422 = vmatprep.mubr.msk.f32.mxu1 %vm519_vm0, %v1276_v63 }
 0x5aa   :  { %v5181_v37 = vpop.eup %5180  ;;  %v1213_v32 = vpop.xlane.xlu1 %1212  ;;  %4423 = vmatmul.mubr.msk.f32.gmra.mrb[28].mxu1 %vm519_vm0, %v1277_v26  ;;  %v1279_v9 = vmul.f32 %v5179_v0, %v6269_v13  ;;  %v5700_v26 = vmov 0.0|0.0  }
 0x5ab   :  { %5190 = vrcp.f32 %v1213_v32  ;;  %v1210_v2 = vpop.xlane.xlu0 %1209  ;;  %v1278_v4 = vmul.f32 %v5181_v37, %v6272_v17  ;;  %4756 = vmatprep.subr.bf16.mxu0 %v5700_v26  ;;  %v5347_v37 = vld [vmem:[%s7433_s26] sm:$0xff] }
 0x5ac   :  { %5192 = vrcp.f32 %v1210_v2 }
 0x5ad   :  { %v5183_v11 = vpop.eup %5182  ;;  %4425 = vmatprep.mubr.msk.f32.mxu1 %vm519_vm0, %v1278_v4 }
 0x5ae   :  { %v5185_v62 = vpop.eup %5184  ;;  %v1219_v12 = vpop.xlane.xlu1 %1218  ;;  %4426 = vmatmul.mubr.msk.f32.gmra.mrb[30].mxu1 %vm519_vm0, %v1279_v9  ;;  %v1281_v15 = vmul.f32 %v5183_v11, %v6285_v53  ;;  %v5348_v9 = vld [vmem:[%s7433_s26 + $0x18] sm:$0xff] }
 0x5af   :  { %5194 = vrcp.f32 %v1219_v12  ;;  %v1216_v58 = vpop.xlane.xlu0 %1215  ;;  %v1280_v10 = vmul.f32 %v5185_v62, %v6288_v55  ;;  %v5349_v12 = vld [vmem:[%s7433_s26 + $0x10] sm:$0xff] }
 0x5b0   :  { %5196 = vrcp.f32 %v1216_v58 }
 0x5b1   :  { %v5187_v39 = vpop.eup %5186  ;;  %4428 = vmatprep.mubr.msk.f32.mxu1 %vm519_vm0, %v1280_v10 }
 0x5b2   :  { %v5189_v17 = vpop.eup %5188  ;;  %v1225_v18 = vpop.xlane.xlu1 %1224  ;;  %4429 = vmatmul.mubr.msk.f32.gmra.mrb[32].mxu1 %vm519_vm0, %v1281_v15  ;;  %v1283_v36 = vmul.f32 %v5187_v39, %v6301_v48  ;;  %v5350_v39 = vld [vmem:[%s7433_s26 + $0x28] sm:$0xff] }
 0x5b3   :  { %5198 = vrcp.f32 %v1225_v18  ;;  %v1222_v13 = vpop.xlane.xlu0 %1221  ;;  %v1282_v19 = vmul.f32 %v5189_v17, %v6304_v1 }
 0x5b4   :  { %5200 = vrcp.f32 %v1222_v13  ;;  %v5351_v13 = vld [vmem:[%s7433_s26 + $0x20] sm:$0xff] }
 0x5b5   :  { %v5191_v47 = vpop.eup %5190  ;;  %4431 = vmatprep.mubr.msk.f32.mxu1 %vm519_vm0, %v1282_v19 }
 0x5b6   :  { %v5193_v55 = vpop.eup %5192  ;;  %v1231_v23 = vpop.xlane.xlu1 %1230  ;;  %4432 = vmatmul.mubr.msk.f32.gmra.mrb[34].mxu1 %vm519_vm0, %v1283_v36  ;;  %v1285_v25 = vmul.f32 %v5191_v47, %v6317_v5 }
 0x5b7   :  { %5202 = vrcp.f32 %v1231_v23  ;;  %v1228_v53 = vpop.xlane.xlu0 %1227  ;;  %v1284_v49 = vmul.f32 %v5193_v55, %v6320_v8  ;;  %v5352_v55 = vld [vmem:[%s7433_s26 + $0x38] sm:$0xff] }
 0x5b8   :  { %5204 = vrcp.f32 %v1228_v53 }
 0x5b9   :  { %v5195_v27 = vpop.eup %5194  ;;  %4434 = vmatprep.mubr.msk.f32.mxu1 %vm519_vm0, %v1284_v49  ;;  %v5353_v49 = vld [vmem:[%s7433_s26 + $0x30] sm:$0xff] }
 0x5ba   :  { %v5197_v1 = vpop.eup %5196  ;;  %v1237_v43 = vpop.xlane.xlu1 %1236  ;;  %4435 = vmatmul.mubr.msk.f32.gmra.mrb[36].mxu1 %vm519_vm0, %v1285_v25  ;;  %v1287_v31 = vmul.f32 %v5195_v27, %v6333_v21 }
 0x5bb   :  { %5206 = vrcp.f32 %v1237_v43  ;;  %v1234_v48 = vpop.xlane.xlu0 %1233  ;;  %v1286_v30 = vmul.f32 %v5197_v1, %v6336_v14  ;;  %v5354_v43 = vld [vmem:[%s7433_s26 + $0x48] sm:$0xff] }
 0x5bc   :  { %5208 = vrcp.f32 %v1234_v48 }
 0x5bd   :  { %v5199_v59 = vpop.eup %5198  ;;  %4437 = vmatprep.mubr.msk.f32.mxu1 %vm519_vm0, %v1286_v30 }
 0x5be   :  { %v5201_v8 = vpop.eup %5200  ;;  %v1243_v46 = vpop.xlane.xlu1 %1242  ;;  %4438 = vmatmul.mubr.msk.f32.gmra.mrb[38].mxu1 %vm519_vm0, %v1287_v31  ;;  %v1289_v38 = vmul.f32 %v5199_v59, %v6349_v35  ;;  %v5355_v31 = vld [vmem:[%s7433_s26 + $0x40] sm:$0xff] }
 0x5bf   :  { %5210 = vrcp.f32 %v1243_v46  ;;  %v1240_v5 = vpop.xlane.xlu0 %1239  ;;  %v1288_v61 = vmul.f32 %v5201_v8, %v6352_v20 }
 0x5c0   :  { %5212 = vrcp.f32 %v1240_v5  ;;  %v5356_v5 = vld [vmem:[%s7433_s26 + $0x58] sm:$0xff] }
 0x5c1   :  { %v5203_v40 = vpop.eup %5202  ;;  %4440 = vmatprep.mubr.msk.f32.mxu1 %vm519_vm0, %v1288_v61 }
 0x5c2   :  { %v5205_v14 = vpop.eup %5204  ;;  %v1249_v45 = vpop.xlane.xlu1 %1248  ;;  %4441 = vmatmul.mubr.msk.f32.gmra.mrb[40].mxu1 %vm519_vm0, %v1289_v38  ;;  %v1291_v50 = vmul.f32 %v5203_v40, %v6365_v3  ;;  %v5357_v40 = vld [vmem:[%s7433_s26 + $0x50] sm:$0xff] }
 0x5c3   :  { %5214 = vrcp.f32 %v1249_v45  ;;  %v1246_v21 = vpop.xlane.xlu0 %1245  ;;  %v1290_v22 = vmul.f32 %v5205_v14, %v6367_v56 }
 0x5c4   :  { %5216 = vrcp.f32 %v1246_v21 }
 0x5c5   :  { %v5207_v51 = vpop.eup %5206  ;;  %4443 = vmatprep.mubr.msk.f32.mxu1 %vm519_vm0, %v1290_v22  ;;  %v5358_v22 = vld [vmem:[%s7433_s26 + $0x68] sm:$0xff] }
 0x5c6   :  { %v5209_v20 = vpop.eup %5208  ;;  %4444 = vmatmul.mubr.msk.f32.gmra.mrb[42].mxu1 %vm519_vm0, %v1291_v50  ;;  %v1293_v52 = vmul.f32 %v5207_v51, %v6379_v28 }
 0x5c7   :  { %v1292_v35 = vmul.f32 %v5209_v20, %v6381_v6  ;;  %v5359_v20 = vld [vmem:[%s7433_s26 + $0x60] sm:$0xff] }
 0x5c9   :  { %v5211_v54 = vpop.eup %5210  ;;  %4446 = vmatprep.mubr.msk.f32.mxu1 %vm519_vm0, %v1292_v35 }
 0x5ca   :  { %v5213_v57 = vpop.eup %5212  ;;  %4447 = vmatmul.mubr.msk.f32.gmra.mrb[44].mxu1 %vm519_vm0, %v1293_v52  ;;  %v1295_v3 = vmul.f32 %v5211_v54, %v6393_v34  ;;  %v202_v34 = vld [vmem:[%s7435_s20 + $0x8] sm:$0xff] }
 0x5cb   :  { %v1294_v56 = vmul.f32 %v5213_v57, %v6395_v29  ;;  %3912 = vmatprep.mubr.msk.f32.mxu0 %vm1579_vm1, %v202_v34  ;;  %v5360_v57 = vld [vmem:[%s7433_s26 + $0x78] sm:$0xff]  ;;  %v5362_v34 = vld [vmem:[%s7433_s26 + $0x88] sm:$0xff] }
 0x5cd   :  { %v5215_v60 = vpop.eup %5214  ;;  %4449 = vmatprep.mubr.msk.f32.mxu1 %vm519_vm0, %v1294_v56 }
 0x5ce   :  { %v5217_v63 = vpop.eup %5216  ;;  %4450 = vmatmul.mubr.msk.f32.gmra.mrb[46].mxu1 %vm519_vm0, %v1295_v3  ;;  %v1297_v28 = vmul.f32 %v5215_v60, %v6407_v24  ;;  %v5346_v24 = vld [vmem:[%s7433_s26 + $0x8] sm:$0xff]  ;;  %v5361_v60 = vld [vmem:[%s7433_s26 + $0x70] sm:$0xff] }
 0x5cf   :  { %v1296_v6 = vmul.f32 %v5217_v63, %v6409_v16 }
 0x5d1   :  { %4452 = vmatprep.mubr.msk.f32.mxu1 %vm519_vm0, %v1296_v6 }
 0x5d2   :  { %4453 = vmatmul.mubr.msk.f32.gmra.mrb[48].mxu1 %vm519_vm0, %v1297_v28 }
 0x5d3   :  { %1911 = vmatprep.mubr.f32.mxu1 %v5699_v7 }
 0x679   :  { %v4421_v29 = vpop.f32.mrb[26].mxu1 }
 0x67a   :  { %v1556_v16 = vmul.f32 %v5346_v24, %v4421_v29  ;;  %v1436_v0 = vpop.f32.mrb[27].mxu1 }
 0x67b   :  { %v1555_v32 = vmul.f32 %v5347_v37, %v1436_v0 }
 0x67d   :  { %v4757_v2 = vpack.c.bf16 %v1556_v16, %v1555_v32  ;;  %v4424_v4 = vpop.f32.mrb[28].mxu1  ;;  %v5363_v16 = vld [vmem:[%s7433_s26 + $0x80] sm:$0xff] }
 0x67e   :  { %v1558_v11 = vmul.f32 %v5348_v9, %v4424_v4  ;;  %v1446_v62 = vpop.f32.mrb[29].mxu1 }
 0x67f   :  { %v1557_v58 = vmul.f32 %v5349_v12, %v1446_v62  ;;  %4758 = vmatpush1.bf16.msra.mxu0 %v4757_v2  ;;  %v5364_v2 = vld [vmem:[%s7433_s26 + $0x98] sm:$0xff] }
 0x680   :  { %4759 = vmatprep.subr.bf16.mxu0 %v5700_v26 }
 0x681   :  { %v4760_v10 = vpack.c.bf16 %v1558_v11, %v1557_v58  ;;  %v4427_v15 = vpop.f32.mrb[30].mxu1  ;;  %v5365_v11 = vld [vmem:[%s7433_s26 + $0x90] sm:$0xff] }
 0x682   :  { %v1560_v17 = vmul.f32 %v5350_v39, %v4427_v15  ;;  %v1456_v18 = vpop.f32.mrb[31].mxu1 }
 0x683   :  { %v1559_v19 = vmul.f32 %v5351_v13, %v1456_v18  ;;  %4761 = vmatpush1.bf16.msra.mxu0 %v4760_v10  ;;  %v5366_v10 = vld [vmem:[%s7433_s26 + $0xa8] sm:$0xff] }
 0x684   :  { %4762 = vmatprep.subr.bf16.mxu0 %v5700_v26 }
 0x685   :  { %v4763_v36 = vpack.c.bf16 %v1560_v17, %v1559_v19  ;;  %v4430_v47 = vpop.f32.mrb[32].mxu1  ;;  %v5367_v17 = vld [vmem:[%s7433_s26 + $0xa0] sm:$0xff] }
 0x686   :  { %v1562_v23 = vmul.f32 %v5352_v55, %v4430_v47  ;;  %v1466_v53 = vpop.f32.mrb[33].mxu1  ;;  %v1662_v47 = vld [vmem:[%s7402_s10 + $0x8] sm:$0xff]  ;;  %v5368_v55 = vld [vmem:[%s7433_s26 + $0xb8] sm:$0xff] }
 0x687   :  { %v1561_v25 = vmul.f32 %v5353_v49, %v1466_v53  ;;  %4764 = vmatpush1.bf16.msra.mxu0 %v4763_v36  ;;  %v1661_v36 = vld [vmem:[%s7402_s10] sm:$0xff]  ;;  %v5369_v49 = vld [vmem:[%s7433_s26 + $0xb0] sm:$0xff] }
 0x688   :  { %4765 = vmatprep.subr.bf16.mxu0 %v5700_v26 }
 0x689   :  { %v4766_v27 = vpack.c.bf16 %v1562_v23, %v1561_v25  ;;  %v4433_v1 = vpop.f32.mrb[34].mxu1 }
 0x68a   :  { %v1564_v48 = vmul.f32 %v5354_v43, %v4433_v1  ;;  %v1476_v30 = vpop.f32.mrb[35].mxu1  ;;  %v1663_v43 = vld [vmem:[%s7402_s10 + $0x10] sm:$0xff] }
 0x68b   :  { %v1563_v59 = vmul.f32 %v5355_v31, %v1476_v30  ;;  %4767 = vmatpush1.bf16.msra.mxu0 %v4766_v27  ;;  %v4792_v27 = vpack.c.bf16 %v1662_v47, %v1661_v36  ;;  %v201_v30 = vld [vmem:[%s7435_s20] sm:$0xff]  ;;  %v204_v31 = vld [vmem:[%s7435_s20 + $0x18] sm:$0xff] }
 0x68c   :  { %4768 = vmatprep.subr.bf16.mxu0 %v5700_v26  ;;  %v1814_v36 = vld [vmem:[#allocation13 + $0x58] sm:$0xff] }
 0x68d   :  { %v4769_v8 = vpack.c.bf16 %v1564_v48, %v1563_v59  ;;  %v4436_v46 = vpop.f32.mrb[36].mxu1  ;;  %v1664_v48 = vld [vmem:[%s7402_s10 + $0x18] sm:$0xff] }
 0x68e   :  { %v1566_v61 = vmul.f32 %v5356_v5, %v4436_v46  ;;  %v1486_v38 = vpop.f32.mrb[37].mxu1  ;;  %v4796_v59 = vpack.c.bf16 %v1664_v48, %v1663_v43  ;;  %v1666_v46 = vld [vmem:[%s7402_s10 + $0x28] sm:$0xff]  ;;  %v203_v5 = vld [vmem:[%s7435_s20 + $0x10] sm:$0xff]  ;;  %v1815_v43 = vld [vmem:[#allocation13 + $0x60] sm:$0xff] }
 0x68f   :  { %v1565_v14 = vmul.f32 %v5357_v40, %v1486_v38  ;;  %4770 = vmatpush1.bf16.msra.mxu0 %v4769_v8  ;;  %v1665_v8 = vld [vmem:[%s7402_s10 + $0x20] sm:$0xff]  ;;  %v1667_v38 = vld [vmem:[%s7402_s10 + $0x30] sm:$0xff]  ;;  %v1668_v40 = vld [vmem:[%s7402_s10 + $0x38] sm:$0xff] }
 0x690   :  { %4771 = vmatprep.subr.bf16.mxu0 %v5700_v26  ;;  %v1817_v48 = vld [vmem:[#allocation13 + $0x70] sm:$0xff] }
 0x691   :  { %v4772_v45 = vpack.c.bf16 %v1566_v61, %v1565_v14  ;;  %v4439_v21 = vpop.f32.mrb[38].mxu1  ;;  %v4800_v61 = vpack.c.bf16 %v1666_v46, %v1665_v8  ;;  %v4804_v14 = vpack.c.bf16 %v1668_v40, %v1667_v38  ;;  %v1819_v46 = vld [vmem:[#allocation13 + $0x80] sm:$0xff] }
 0x692   :  { %v1568_v50 = vmul.f32 %v5358_v22, %v4439_v21  ;;  %v1496_v51 = vpop.f32.mrb[39].mxu1  ;;  %v1670_v21 = vld [vmem:[%s7402_s10 + $0x48] sm:$0xff] }
 0x693   :  { %v1567_v35 = vmul.f32 %v5359_v20, %v1496_v51  ;;  %4773 = vmatpush1.bf16.msra.mxu0 %v4772_v45  ;;  %v1669_v45 = vld [vmem:[%s7402_s10 + $0x40] sm:$0xff]  ;;  %v1672_v51 = vld [vmem:[%s7402_s10 + $0x58] sm:$0xff] }
 0x694   :  { %4774 = vmatprep.subr.bf16.mxu0 %v5700_v26  ;;  %v4808_v22 = vpack.c.bf16 %v1670_v21, %v1669_v45 }
 0x695   :  { %v4775_v52 = vpack.c.bf16 %v1568_v50, %v1567_v35  ;;  %v4442_v54 = vpop.f32.mrb[40].mxu1  ;;  %v1671_v50 = vld [vmem:[%s7402_s10 + $0x50] sm:$0xff]  ;;  %v1673_v35 = vld [vmem:[%s7402_s10 + $0x60] sm:$0xff] }
 0x696   :  { %v1570_v56 = vmul.f32 %v5360_v57, %v4442_v54  ;;  %v1506_v3 = vpop.f32.mrb[41].mxu1  ;;  %v4812_v20 = vpack.c.bf16 %v1672_v51, %v1671_v50  ;;  %v1675_v57 = vld [vmem:[%s7402_s10 + $0x70] sm:$0xff]  ;;  %v6625_v50 = vld [vmem:[%s7397_s5] ss:$0 sm:$0xff] }
 0x697   :  { %v1569_v63 = vmul.f32 %v5361_v60, %v1506_v3  ;;  %4776 = vmatpush1.bf16.msra.mxu0 %v4775_v52  ;;  %v1674_v52 = vld [vmem:[%s7402_s10 + $0x68] sm:$0xff] }
 0x698   :  { %4777 = vmatprep.subr.bf16.mxu0 %v5700_v26  ;;  %v4816_v54 = vpack.c.bf16 %v1674_v52, %v1673_v35 }
 0x699   :  { %v4778_v6 = vpack.c.bf16 %v1570_v56, %v1569_v63  ;;  %v4445_v28 = vpop.f32.mrb[42].mxu1  ;;  %v1676_v56 = vld [vmem:[%s7402_s10 + $0x78] sm:$0xff] }
 0x69a   :  { %v1572_v29 = vmul.f32 %v5362_v34, %v4445_v28  ;;  %v1516_v24 = vpop.f32.mrb[43].mxu1  ;;  %v4820_v3 = vpack.c.bf16 %v1676_v56, %v1675_v57  ;;  %v3914_v34 = vld [vmem:[#allocation11] ss:$0 sm:$0xff] }
 0x69b   :  { %v1571_v0 = vmul.f32 %v5363_v16, %v1516_v24  ;;  %4779 = vmatpush1.bf16.msra.mxu0 %v4778_v6  ;;  %v1826_v57 = vld [vmem:[#allocation13 + $0xb8] sm:$0xff] }
 0x69c   :  { %4780 = vmatprep.subr.bf16.mxu0 %v5700_v26 }
 0x69d   :  { %v4781_v37 = vpack.c.bf16 %v1572_v29, %v1571_v0  ;;  %v4448_v32 = vpop.f32.mrb[44].mxu1 }
 0x69e   :  { %v1574_v4 = vmul.f32 %v5364_v2, %v4448_v32  ;;  %v1526_v9 = vpop.f32.mrb[45].mxu1  ;;  %v5371_v2 = vld [vmem:[#allocation2] sm:$0xff] }
 0x69f   :  { %v1573_v62 = vmul.f32 %v5365_v11, %v1526_v9  ;;  %4782 = vmatpush1.bf16.msra.mxu0 %v4781_v37  ;;  %v5370_v37 = vld [vmem:[#allocation2 + $0x8] sm:$0xff]  ;;  %v1806_v11 = vld [vmem:[#allocation13 + $0x18] sm:$0xff] }
 0x6a0   :  { %4783 = vmatprep.subr.bf16.mxu0 %v5700_v26  ;;  %v1804_v9 = vld [vmem:[#allocation13 + $0x8] sm:$0xff] }
 0x6a1   :  { %v4784_v12 = vpack.c.bf16 %v1574_v4, %v1573_v62  ;;  %v4451_v58 = vpop.f32.mrb[46].mxu1  ;;  %v1803_v62 = vld [vmem:[#allocation13] sm:$0xff] }
 0x6a2   :  { %v1576_v15 = vmul.f32 %v5366_v10, %v4451_v58  ;;  %v1536_v39 = vpop.f32.mrb[47].mxu1  ;;  %v1805_v58 = vld [vmem:[#allocation13 + $0x10] sm:$0xff]  ;;  %v1808_v10 = vld [vmem:[#allocation13 + $0x28] sm:$0xff] }
 0x6a3   :  { %v1575_v18 = vmul.f32 %v5367_v17, %v1536_v39  ;;  %4785 = vmatpush1.bf16.msra.mxu0 %v4784_v12  ;;  %v4824_v12 = vpack.c.bf16 %v1806_v11, %v1804_v9  ;;  %v4826_v39 = vpack.c.bf16 %v1805_v58, %v1803_v62  ;;  %v1831_v9 = vld [vmem:[#allocation13 + $0xe0] sm:$0xff]  ;;  %v1833_v11 = vld [vmem:[#allocation13 + $0xf0] sm:$0xff]  ;;  %v1961_v58 = vld [vmem:[#allocation14 + $0x88] sm:$0xff] }
 0x6a4   :  { %4786 = vmatprep.subr.bf16.mxu0 %v5700_v26  ;;  %v4854_v62 = vpack.c.bf16 %v1833_v11, %v1831_v9  ;;  %v1972_v9 = vld [vmem:[#allocation14 + $0xe0] sm:$0xff]  ;;  %v1973_v11 = vld [vmem:[#allocation14 + $0xe8] sm:$0xff] }
 0x6a5   :  { %v4787_v13 = vpack.c.bf16 %v1576_v15, %v1575_v18  ;;  %v4454_v19 = vpop.f32.mrb[48].mxu1  ;;  %v1810_v15 = vld [vmem:[#allocation13 + $0x38] sm:$0xff]  ;;  %v1807_v18 = vld [vmem:[#allocation13 + $0x20] sm:$0xff]  ;;  %4825 = vmatprep.subr.bf16.mxu1 %v4824_v12 }
 0x6a6   :  { %v1578_v23 = vmul.f32 %v5368_v55, %v4454_v19  ;;  %v1546_v53 = vpop.f32.mrb[49].mxu1  ;;  %v4828_v17 = vpack.c.bf16 %v1810_v15, %v1808_v10  ;;  %v1812_v19 = vld [vmem:[#allocation13 + $0x48] sm:$0xff]  ;;  %4827 = vmatpush1.bf16.msra.mxu1 %v4826_v39  ;;  %v1960_v12 = vld [vmem:[#allocation14 + $0x80] sm:$0xff] }
 0x6a7   :  { %v1577_v25 = vmul.f32 %v5369_v49, %v1546_v53  ;;  %4788 = vmatpush1.bf16.msra.mxu0 %v4787_v13  ;;  %v1809_v13 = vld [vmem:[#allocation13 + $0x30] sm:$0xff]  ;;  %v4832_v55 = vpack.c.bf16 %v1814_v36, %v1812_v19  ;;  %v1816_v49 = vld [vmem:[#allocation13 + $0x68] sm:$0xff]  ;;  %v1944_v10 = vld [vmem:[#allocation14] sm:$0xff]  ;;  %v4856_v15 = vpack.c.bf16 %v1961_v58, %v1960_v12 }
 0x6a8   :  { %4789 = vmatprep.subr.bf16.mxu0 %v5700_v26  ;;  %v4830_v47 = vpack.c.bf16 %v1809_v13, %v1807_v18  ;;  %4829 = vmatprep.subr.bf16.mxu1 %v4828_v17  ;;  %v1813_v53 = vld [vmem:[#allocation13 + $0x50] sm:$0xff]  ;;  %v1945_v39 = vld [vmem:[#allocation14 + $0x8] sm:$0xff]  ;;  %v1963_v18 = vld [vmem:[#allocation14 + $0x98] sm:$0xff] }
 0x6a9   :  { %v4790_v1 = vpack.c.bf16 %v1578_v23, %v1577_v25  ;;  %v1811_v23 = vld [vmem:[#allocation13 + $0x40] sm:$0xff]  ;;  %v1818_v25 = vld [vmem:[#allocation13 + $0x78] sm:$0xff]  ;;  %v1962_v17 = vld [vmem:[#allocation14 + $0x90] sm:$0xff]  ;;  %v4858_v13 = vpack.c.bf16 %v1945_v39, %v1944_v10 }
 0x6aa   :  { %4831 = vmatpush1.bf16.msra.mxu1 %v4830_v47  ;;  %v4860_v19 = vpack.c.bf16 %v1963_v18, %v1962_v17  ;;  %v1946_v36 = vld [vmem:[#allocation14 + $0x10] sm:$0xff]  ;;  %v1947_v47 = vld [vmem:[#allocation14 + $0x18] sm:$0xff]  ;;  %v1956_v12 = vld [vmem:[#allocation14 + $0x60] sm:$0xff] }
 0x6ab   :  { %4791 = vmatpush1.bf16.msra.mxu0 %v4790_v1  ;;  %4833 = vmatprep.subr.bf16.mxu1 %v4832_v55  ;;  %v4836_v1 = vpack.c.bf16 %v1818_v25, %v1816_v49  ;;  %v1964_v55 = vld [vmem:[#allocation14 + $0xa0] sm:$0xff]  ;;  %v1957_v58 = vld [vmem:[#allocation14 + $0x68] sm:$0xff]  ;;  %v1975_v39 = vld [vmem:[#allocation14 + $0xf8] sm:$0xff] }
 0x6ac   :  { %4793 = vmatprep.subr.bf16.mxu0 %v4792_v27  ;;  %v1948_v25 = vld [vmem:[#allocation14 + $0x20] sm:$0xff]  ;;  %v4882_v10 = vpack.c.bf16 %v1957_v58, %v1956_v12  ;;  %v1958_v18 = vld [vmem:[#allocation14 + $0x70] sm:$0xff] }
 0x6ad   :  { %v2110_v12 = vld [vmem:[#allocation8 + $0x198] sm:$0xff] }
 0x6ae   :  { %1651 = vmatmul.mubr.f32.vlgmr.msra.gmra.mrb[28].mxu0 %v201_v30  ;;  %v1820_v30 = vld [vmem:[#allocation13 + $0x88] sm:$0xff]  ;;  %v2114_v58 = vld [vmem:[#allocation8 + $0x1b8] sm:$0xff] }
 0x6af   :  { %3913 = vmatprep.mubr.msk.f32.mxu0 %vm1579_vm1, %v204_v31  ;;  %4795 = vmatpush3.bf16.msra.mxu0 %v4792_v27  ;;  %v4834_v27 = vpack.c.bf16 %v1813_v53, %v1811_v23  ;;  %v1822_v31 = vld [vmem:[#allocation13 + $0x98] sm:$0xff]  ;;  %v1965_v23 = vld [vmem:[#allocation14 + $0xa8] sm:$0xff]  ;;  %v4862_v53 = vpack.c.bf16 %v1947_v47, %v1946_v36  ;;  %v1835_v36 = vld [vmem:[%s7407_s15] sm:$0x3] }
 0x6b0   :  { %4797 = vmatprep.subr.bf16.mxu0 %v4796_v59  ;;  %v4840_v8 = vpack.c.bf16 %v1822_v31, %v1820_v30  ;;  %v4864_v49 = vpack.c.bf16 %v1965_v23, %v1964_v55  ;;  %v1840_v47 = vrot.slane %v1835_v36, %v5953_v33  ;;  %v1844_v55 = vrot.slane %v1835_v36, %v5957_v44  ;;  %v2123_v36 = vld [vmem:[#allocation8 + $0x200] sm:$0xff] }
 0x6b1   :  { %4835 = vmatpush1.bf16.msra.mxu1 %v4834_v27  ;;  %v1949_v27 = vld [vmem:[#allocation14 + $0x28] sm:$0xff] }
 0x6b2   :  { %1656 = vmatmul.mubr.f32.gmra.mrb[30].mxu0 %v203_v5  ;;  %4837 = vmatprep.subr.bf16.mxu1 %v4836_v1  ;;  %v1821_v5 = vld [vmem:[#allocation13 + $0x90] sm:$0xff]  ;;  %v4866_v1 = vpack.c.bf16 %v1949_v27, %v1948_v25 }
 0x6b3   :  { %4799 = vmatpush3.bf16.msra.mxu0 %v4796_v59  ;;  %v4838_v59 = vpack.c.bf16 %v1817_v48, %v1815_v43 }
 0x6b4   :  { %4801 = vmatprep.subr.bf16.mxu0 %v4800_v61 }
 0x6b5   :  { %4839 = vmatpush1.bf16.msra.mxu1 %v4838_v59 }
 0x6b6   :  { %4841 = vmatprep.subr.bf16.mxu1 %v4840_v8 }
 0x6b7   :  { %4803 = vmatpush3.bf16.msra.mxu0 %v4800_v61  ;;  %v4842_v61 = vpack.c.bf16 %v1821_v5, %v1819_v46 }
 0x6b8   :  { %4805 = vmatprep.subr.bf16.mxu0 %v4804_v14 }
 0x6b9   :  { %4843 = vmatpush1.bf16.msra.mxu1 %v4842_v61  ;;  %v3915_v61 = vld [vmem:[%s7404_s12] ss:$0 sm:$0xff] }
 0x6bb   :  { %4807 = vmatpush3.bf16.msra.mxu0 %v4804_v14 }
 0x6bc   :  { %4809 = vmatprep.subr.bf16.mxu0 %v4808_v22 }
 0x6bf   :  { %4811 = vmatpush3.bf16.msra.mxu0 %v4808_v22 }
 0x6c0   :  { %4813 = vmatprep.subr.bf16.mxu0 %v4812_v20 }
 0x6c3   :  { %4815 = vmatpush3.bf16.msra.mxu0 %v4812_v20 }
 0x6c4   :  { %4817 = vmatprep.subr.bf16.mxu0 %v4816_v54 }
 0x6c7   :  { %4819 = vmatpush3.bf16.msra.mxu0 %v4816_v54  ;;  %v1824_v54 = vld [vmem:[#allocation13 + $0xa8] sm:$0xff] }
 0x6c8   :  { %4821 = vmatprep.subr.bf16.mxu0 %v4820_v3  ;;  %v4844_v56 = vpack.c.bf16 %v1826_v57, %v1824_v54  ;;  %v1967_v54 = vld [vmem:[#allocation14 + $0xb8] sm:$0xff] }
 0x6ca   :  { %4845 = vmatprep.subr.bf16.mxu1 %v4844_v56  ;;  %v1951_v56 = vld [vmem:[#allocation14 + $0x38] sm:$0xff] }
 0x6cb   :  { %4823 = vmatpush3.bf16.msra.mxu0 %v4820_v3  ;;  %v1823_v3 = vld [vmem:[#allocation13 + $0xa0] sm:$0xff] }
 0x6cc   :  { %4857 = vmatprep.subr.bf16.mxu0 %v4856_v15  ;;  %v1974_v15 = vld [vmem:[#allocation14 + $0xf0] sm:$0xff] }
 0x6cd   :  { %v4884_v17 = vpack.c.bf16 %v1975_v39, %v1974_v15  ;;  %v2109_v39 = vld [vmem:[#allocation8 + $0x190] sm:$0xff] }
 0x781   :  { %v1652_v60 = vpop.f32.mrb[28].mxu0 }
 0x782   :  { %v1654_v63 = vpop.f32.mrb[29].mxu0  ;;  %4487 = vmatprep.mubr.f32.mxu0 %v1652_v60  ;;  %v1825_v60 = vld [vmem:[#allocation13 + $0xb0] sm:$0xff] }
 0x783   :  { %v4846_v63 = vpack.c.bf16 %v1825_v60, %v1823_v3  ;;  %v1968_v3 = vld [vmem:[#allocation14 + $0xc0] sm:$0xff]  ;;  %v1969_v60 = vld [vmem:[#allocation14 + $0xc8] sm:$0xff] }
 0x785   :  { %v1657_v6 = vpop.f32.mrb[30].mxu0  ;;  %4847 = vmatpush1.bf16.msra.mxu1 %v4846_v63  ;;  %v4872_v63 = vpack.c.bf16 %v1969_v60, %v1968_v3 }
 0x786   :  { %v1659_v28 = vpop.f32.mrb[31].mxu0  ;;  %4488 = vmatmul.mubr.f32.vlgmr.msra.gmra.mrb[32].mxu0 %v1657_v6  ;;  %v1828_v6 = vld [vmem:[#allocation13 + $0xc8] sm:$0xff] }
 0x787   :  { %v1830_v28 = vld [vmem:[#allocation13 + $0xd8] sm:$0xff]  ;;  %4859 = vmatpush3.bf16.msra.mxu0 %v4858_v13 }
 0x788   :  { %4861 = vmatprep.subr.bf16.mxu0 %v4860_v19  ;;  %v1959_v13 = vld [vmem:[#allocation14 + $0x78] sm:$0xff] }
 0x789   :  { %v4886_v19 = vpack.c.bf16 %v1959_v13, %v1958_v18  ;;  %v2113_v18 = vld [vmem:[#allocation8 + $0x1b0] sm:$0xff]  ;;  %v2116_v13 = vld [vmem:[#allocation8 + $0x1c8] sm:$0xff] }
 0x78b   :  { %4863 = vmatpush3.bf16.msra.mxu0 %v4862_v53 }
 0x78c   :  { %4865 = vmatprep.subr.bf16.mxu0 %v4864_v49 }
 0x78f   :  { %4867 = vmatpush3.bf16.msra.mxu0 %v4866_v1 }
 0x859   :  { %v4489_v29 = vpop.f32.mrb[32].mxu0 }
 0x85a   :  { %v1756_v24 = vadd.f32 %v4489_v29, %v3914_v34  ;;  %v1750_v16 = vpop.f32.mrb[33].mxu0  ;;  %v1827_v29 = vld [vmem:[#allocation13 + $0xc0] sm:$0xff] }
 0x85b   :  { %v1751_v0 = vadd.f32 %v3914_v34, %v1750_v16  ;;  %v4848_v34 = vpack.c.bf16 %v1830_v28, %v1828_v6  ;;  %v1952_v6 = vld [vmem:[#allocation14 + $0x40] sm:$0xff]  ;;  %v1953_v28 = vld [vmem:[#allocation14 + $0x48] sm:$0xff] }
 0x85c   :  { %v6610_v32 = vadd.f32 %v5370_v37, %v1756_v24  ;;  %v1829_v24 = vld [vmem:[#allocation13 + $0xd0] sm:$0xff]  ;;  %v1834_v37 = vld [vmem:[#allocation13 + $0xf8] sm:$0xff] }
 0x85d   :  { %v6612_v4 = vadd.f32 %v5371_v2, %v1751_v0  ;;  %v4850_v16 = vpack.c.bf16 %v1829_v24, %v1827_v29  ;;  %4849 = vmatprep.subr.bf16.mxu1 %v4848_v34  ;;  %v1832_v0 = vld [vmem:[#allocation13 + $0xe8] sm:$0xff]  ;;  %v4874_v34 = vpack.c.bf16 %v1953_v28, %v1952_v6  ;;  %v1970_v29 = vld [vmem:[#allocation14 + $0xd0] sm:$0xff]  ;;  %v1971_v24 = vld [vmem:[#allocation14 + $0xd8] sm:$0xff] }
 0x85e   :  { %1765 = vadd.xlane.f32.xlu1 %v6610_v32  ;;  %v4852_v2 = vpack.c.bf16 %v1834_v37, %v1832_v0  ;;  %v1954_v0 = vld [vmem:[#allocation14 + $0x50] sm:$0xff]  ;;  %v1955_v37 = vld [vmem:[#allocation14 + $0x58] sm:$0xff]  ;;  %v3917_v6 = vld [vmem:[%s7409_s17] ss:$0 sm:$0xff] }
 0x85f   :  { %1763 = vadd.xlane.f32.xlu0 %v6612_v4  ;;  %4851 = vmatpush1.bf16.msra.mxu1 %v4850_v16  ;;  %v4876_v16 = vpack.c.bf16 %v1971_v24, %v1970_v29 }
 0x860   :  { %4853 = vmatprep.subr.bf16.mxu1 %v4852_v2  ;;  %v4878_v2 = vpack.c.bf16 %v1955_v37, %v1954_v0 }
 0x863   :  { %4855 = vmatpush1.bf16.msra.mxu1 %v4854_v62  ;;  %v4880_v62 = vpack.c.bf16 %v1973_v11, %v1972_v9  ;;  %v2111_v9 = vld [vmem:[#allocation8 + $0x1a0] sm:$0xff] }
 0x864   :  { %v2107_v11 = vld [vmem:[#allocation8 + $0x180] sm:$0xff] }
 0x8eb   :  { %v1766_v38 = vpop.xlane.xlu1 %1765 }
 0x8ec   :  { %v1768_v40 = vmul.f32 0.020833334, %v1766_v38  ;;  %v1764_v14 = vpop.xlane.xlu0 %1763 }
 0x8ed   :  { %v1767_v45 = vmul.f32 0.020833334, %v1764_v14  ;;  %v3916_v14 = vld [vmem:[%s7405_s13] ss:$0 sm:$0xff] }
 0x8ee   :  { %v6617_v21 = vsub.f32 %v6610_v32, %v1768_v40 }
 0x8ef   :  { %v6620_v22 = vsub.f32 %v6612_v4, %v1767_v45 }
 0x8f0   :  { %v1772_v51 = vmul.f32 %v6625_v50, %v6617_v21 }
 0x8f1   :  { %v1771_v20 = vmul.f32 %v6625_v50, %v6620_v22 }
 0x8f2   :  { %v1774_v35 = vmul.f32 %v1772_v51, %v1772_v51 }
 0x8f3   :  { %v1773_v52 = vmul.f32 %v1771_v20, %v1771_v20 }
 0x8f4   :  { %1777 = vadd.xlane.f32.xlu1 %v1774_v35 }
 0x8f5   :  { %1775 = vadd.xlane.f32.xlu0 %v1773_v52  ;;  %v1966_v52 = vld [vmem:[#allocation14 + $0xb0] sm:$0xff] }
 0x8f6   :  { %v4868_v57 = vpack.c.bf16 %v1967_v54, %v1966_v52 }
 0x8f8   :  { %4869 = vmatprep.subr.bf16.mxu0 %v4868_v57 }
 0x981   :  { %v1778_v43 = vpop.xlane.xlu1 %1777 }
 0x982   :  { %v1780_v48 = vmul.f32 0.020833334, %v1778_v43  ;;  %v1776_v30 = vpop.xlane.xlu0 %1775 }
 0x983   :  { %v1779_v31 = vmul.f32 0.020833334, %v1776_v30 }
 0x984   :  { %v1782_v59 = vadd.f32 1e-05, %v1780_v48 }
 0x985   :  { %v1781_v8 = vadd.f32 1e-05, %v1779_v31 }
 0x986   :  { %5218 = vrsqrt.f32 %v1782_v59 }
 0x987   :  { %5220 = vrsqrt.f32 %v1781_v8 }
 0x990   :  { %v5219_v46 = vpop.eup %5218 }
 0x991   :  { %v5221_v5 = vpop.eup %5220  ;;  %v1786_v40 = vmul.f32 %v5219_v46, %v6617_v21 }
 0x992   :  { %v1785_v38 = vmul.f32 %v5221_v5, %v6620_v22  ;;  %v1950_v22 = vld [vmem:[#allocation14 + $0x30] sm:$0xff] }
 0x993   :  { %v1794_v20 = vmul.f32 %v3915_v61, %v1786_v40  ;;  %v4870_v21 = vpack.c.bf16 %v1951_v56, %v1950_v22 }
 0x994   :  { %v1793_v45 = vmul.f32 %v3915_v61, %v1785_v38 }
 0x995   :  { %v1802_v35 = vadd.f32 %v3916_v14, %v1794_v20  ;;  %4871 = vmatpush3.bf16.msra.mxu0 %v4870_v21 }
 0x996   :  { %v1801_v51 = vadd.f32 %v3916_v14, %v1793_v45  ;;  %4873 = vmatprep.subr.bf16.mxu0 %v4872_v63 }
 0x998   :  { %1912 = vmatmul.mubr.f32.vlgmr.msra.gmra.mrb[50].mxu1 %v1801_v51 }
 0x999   :  { %1917 = vmatprep.mubr.f32.mxu1 %v5699_v7  ;;  %4875 = vmatpush3.bf16.msra.mxu0 %v4874_v34 }
 0x99a   :  { %4877 = vmatprep.subr.bf16.mxu0 %v4876_v16 }
 0x99c   :  { %1918 = vmatmul.mubr.f32.gmra.mrb[52].mxu1 %v1802_v35 }
 0x99d   :  { %2237 = vmatprep.mubr.f32.mxu1 %v5699_v7  ;;  %4879 = vmatpush3.bf16.msra.mxu0 %v4878_v2  ;;  %v2108_v2 = vld [vmem:[#allocation8 + $0x188] sm:$0xff] }
 0x99e   :  { %4881 = vmatprep.subr.bf16.mxu0 %v4880_v62  ;;  %v4888_v62 = vpack.c.bf16 %v2111_v9, %v2108_v2  ;;  %v2136_v2 = vld [vmem:[#allocation8 + $0x268] sm:$0xff]  ;;  %v2137_v9 = vld [vmem:[#allocation8 + $0x270] sm:$0xff] }
 0x9a0   :  { %4889 = vmatprep.subr.bf16.mxu1 %v4888_v62 }
 0x9a1   :  { %4883 = vmatpush3.bf16.msra.mxu0 %v4882_v10  ;;  %v4890_v10 = vpack.c.bf16 %v2110_v12, %v2107_v11  ;;  %v2140_v11 = vld [vmem:[#allocation8 + $0x288] sm:$0xff] }
 0x9a2   :  { %4885 = vmatprep.subr.bf16.mxu0 %v4884_v17  ;;  %v2112_v17 = vld [vmem:[#allocation8 + $0x1a8] sm:$0xff]  ;;  %v4910_v12 = vpack.c.bf16 %v2140_v11, %v2137_v9 }
 0x9a3   :  { %4891 = vmatpush1.bf16.msra.mxu1 %v4890_v10  ;;  %v2139_v10 = vld [vmem:[#allocation8 + $0x280] sm:$0xff] }
 0x9a5   :  { %4887 = vmatpush3.bf16.msra.mxu0 %v4886_v19  ;;  %v2120_v19 = vld [vmem:[#allocation8 + $0x1e8] sm:$0xff] }
 0xa6b   :  { %v1913_v23 = vpop.f32.mrb[50].mxu1 }
 0xa6c   :  { %v1914_v53 = vadd.f32 %v1913_v23, %v1840_v47  ;;  %v1915_v49 = vpop.f32.mrb[51].mxu1  ;;  %v2118_v23 = vld [vmem:[#allocation8 + $0x1d8] sm:$0xff] }
 0xa6d   :  { %v1916_v25 = vadd.f32 %v1915_v49, %v1844_v55 }
 0xa6e   :  { %v1928_v27 = vmul.f32 0.70710677, %v1914_v53  ;;  %v1924_v14 = vmul.f32 0.5, %v1914_v53  ;;  %v4896_v53 = vpack.c.bf16 %v2123_v36, %v2120_v19  ;;  %v2150_v19 = vld [vmem:[#allocation8 + $0x2d8] sm:$0xff]  ;;  %v2153_v36 = vld [vmem:[#allocation8 + $0x2f0] sm:$0xff] }
 0xa6f   :  { %v1929_v1 = vmul.f32 0.70710677, %v1916_v25  ;;  %v1919_v43 = vpop.f32.mrb[52].mxu1  ;;  %v1925_v38 = vmul.f32 0.5, %v1916_v25  ;;  %v2119_v25 = vld [vmem:[#allocation8 + $0x1e0] sm:$0xff] }
 0xa70   :  { %5222 = verf.f32 %v1928_v27  ;;  %v1920_v48 = vadd.f32 %v1919_v43, %v1840_v47  ;;  %v1921_v30 = vpop.f32.mrb[53].mxu1  ;;  %v4894_v47 = vpack.c.bf16 %v2116_v13, %v2113_v18  ;;  %v2122_v27 = vld [vmem:[#allocation8 + $0x1f8] sm:$0xff] }
 0xa71   :  { %5224 = verf.f32 %v1929_v1  ;;  %v1922_v31 = vadd.f32 %v1921_v30, %v1844_v55  ;;  %v2115_v55 = vld [vmem:[#allocation8 + $0x1c0] sm:$0xff]  ;;  %v4898_v1 = vpack.c.bf16 %v2122_v27, %v2119_v25  ;;  %v2146_v18 = vld [vmem:[#allocation8 + $0x2b8] sm:$0xff] }
 0xa72   :  { %v1930_v59 = vmul.f32 0.70710677, %v1920_v48  ;;  %v1926_v22 = vmul.f32 0.5, %v1920_v48  ;;  %v4924_v49 = vpack.c.bf16 %v2118_v23, %v2115_v55  ;;  %v4916_v55 = vpack.c.bf16 %v2153_v36, %v2150_v19  ;;  %v2148_v23 = vld [vmem:[#allocation8 + $0x2c8] sm:$0xff]  ;;  %v5384_v19 = vld [vmem:[%s7432_s29 + $0x68] sm:$0xff]  ;;  %v5385_v36 = vld [vmem:[%s7432_s29 + $0x30] sm:$0xff] }
 0xa73   :  { %v1931_v8 = vmul.f32 0.70710677, %v1922_v31  ;;  %v1927_v54 = vmul.f32 0.5, %v1922_v31 }
 0xa74   :  { %5226 = verf.f32 %v1930_v59 }
 0xa75   :  { %5228 = verf.f32 %v1931_v8 }
 0xa7a   :  { %v5223_v46 = vpop.eup %5222 }
 0xa7b   :  { %v5225_v5 = vpop.eup %5224  ;;  %v1936_v61 = vadd.f32 1.0, %v5223_v46 }
 0xa7c   :  { %v1937_v40 = vadd.f32 1.0, %v5225_v5 }
 0xa7d   :  { %v1940_v35 = vmul.f32 %v1936_v61, %v1924_v14  ;;  %v2129_v14 = vld [vmem:[#allocation8 + $0x230] sm:$0xff] }
 0xa7e   :  { %v5227_v45 = vpop.eup %5226  ;;  %v1941_v51 = vmul.f32 %v1937_v40, %v1925_v38  ;;  %v2126_v40 = vld [vmem:[#allocation8 + $0x218] sm:$0xff] }
 0xa7f   :  { %v5229_v20 = vpop.eup %5228  ;;  %v1938_v52 = vadd.f32 1.0, %v5227_v45  ;;  %v2121_v45 = vld [vmem:[#allocation8 + $0x1f0] sm:$0xff] }
 0xa80   :  { %v1939_v57 = vadd.f32 1.0, %v5229_v20  ;;  %2040 = vmatprep.mubr.f32.mxu0 %v1941_v51  ;;  %v4900_v51 = vpack.c.bf16 %v2129_v14, %v2126_v40  ;;  %v2124_v20 = vld [vmem:[#allocation8 + $0x208] sm:$0xff]  ;;  %v3918_v14 = vld [vmem:[#allocation5 + $0x1] ss:$0 sm:$0xff] }
 0xa81   :  { %2041 = vmatmul.mubr.f32.vlgmr.msra.gmra.mrb[34].mxu0 %v1940_v35  ;;  %v1942_v21 = vmul.f32 %v1938_v52, %v1926_v22  ;;  %v2125_v35 = vld [vmem:[#allocation8 + $0x210] sm:$0xff]  ;;  %v2128_v52 = vld [vmem:[#allocation8 + $0x228] sm:$0xff] }
 0xa82   :  { %v1943_v56 = vmul.f32 %v1939_v57, %v1927_v54  ;;  %v4928_v54 = vpack.c.bf16 %v2124_v20, %v2121_v45  ;;  %v4902_v57 = vpack.c.bf16 %v2128_v52, %v2125_v35  ;;  %v2132_v22 = vld [vmem:[#allocation8 + $0x248] sm:$0xff] }
 0xa84   :  { %2045 = vmatprep.mubr.f32.mxu0 %v1943_v56  ;;  %v2135_v56 = vld [vmem:[#allocation8 + $0x260] sm:$0xff] }
 0xa85   :  { %2046 = vmatmul.mubr.f32.gmra.mrb[36].mxu0 %v1942_v21  ;;  %v2127_v21 = vld [vmem:[#allocation8 + $0x220] sm:$0xff] }
 0xb54   :  { %v4142_v3 = vpop.f32.mrb[34].mxu0 }
 0xb55   :  { %v4143_v60 = vpop.f32.mrb[35].mxu0 }
 0xb56   :  { %v4144_v63 = vadd.f32 %v4143_v60, %v4142_v3  ;;  %v4904_v3 = vpack.c.bf16 %v2135_v56, %v2132_v22  ;;  %v2131_v60 = vld [vmem:[#allocation8 + $0x240] sm:$0xff]  ;;  %v5373_v56 = vld [vmem:[%s7432_s29] sm:$0xff] }
 0xb58   :  { %v2051_v28 = vadd.f32 %v4144_v63, %v6612_v4  ;;  %v4145_v34 = vpop.f32.mrb[36].mxu0  ;;  %v2117_v4 = vld [vmem:[#allocation8 + $0x1d0] sm:$0xff]  ;;  %v2134_v63 = vld [vmem:[#allocation8 + $0x258] sm:$0xff] }
 0xb59   :  { %v4146_v29 = vpop.f32.mrb[37].mxu0  ;;  %v4892_v15 = vpack.c.bf16 %v2117_v4, %v2114_v58  ;;  %v2144_v58 = vld [vmem:[#allocation8 + $0x2a8] sm:$0xff]  ;;  %v2147_v4 = vld [vmem:[#allocation8 + $0x2c0] sm:$0xff] }
 0xb5a   :  { %v4147_v24 = vadd.f32 %v4146_v29, %v4145_v34  ;;  %v6650_v16 = vadd.f32 %v3917_v6, %v2051_v28  ;;  %v4906_v28 = vpack.c.bf16 %v2134_v63, %v2131_v60  ;;  %v2138_v34 = vld [vmem:[#allocation8 + $0x278] sm:$0xff]  ;;  %v2141_v29 = vld [vmem:[#allocation8 + $0x290] sm:$0xff] }
 0xb5b   :  { %4893 = vmatprep.subr.bf16.mxu1 %v4892_v15  ;;  %v4912_v15 = vpack.c.bf16 %v2147_v4, %v2144_v58 }
 0xb5c   :  { %v2052_v0 = vadd.f32 %v4147_v24, %v6610_v32  ;;  %2066 = vadd.xlane.f32.xlu0 %v6650_v16  ;;  %v4920_v32 = vpack.c.bf16 %v2112_v17, %v2109_v39  ;;  %4895 = vmatpush1.bf16.msra.mxu1 %v4894_v47  ;;  %v2133_v24 = vld [vmem:[#allocation8 + $0x250] sm:$0xff]  ;;  %v2142_v39 = vld [vmem:[#allocation8 + $0x298] sm:$0xff]  ;;  %v2143_v17 = vld [vmem:[#allocation8 + $0x2a0] sm:$0xff] }
 0xb5d   :  { %4897 = vmatprep.subr.bf16.mxu1 %v4896_v53  ;;  %v4936_v62 = vpack.c.bf16 %v2136_v2, %v2133_v24  ;;  %v4914_v13 = vpack.c.bf16 %v2146_v18, %v2143_v17  ;;  %v2145_v47 = vld [vmem:[#allocation8 + $0x2b0] sm:$0xff]  ;;  %v5380_v17 = vld [vmem:[%s7432_s29 + $0x58] sm:$0xff] }
 0xb5e   :  { %v6654_v37 = vadd.f32 %v3917_v6, %v2052_v0  ;;  %4921 = vmatprep.subr.bf16.mxu0 %v4920_v32  ;;  %v4908_v0 = vpack.c.bf16 %v2141_v29, %v2138_v34  ;;  %v2149_v53 = vld [vmem:[#allocation8 + $0x2d0] sm:$0xff]  ;;  %v4944_v25 = vpack.c.bf16 %v2148_v23, %v2145_v47  ;;  %v5386_v47 = vld [vmem:[%s7432_s29 + $0x70] sm:$0xff]  ;;  %v5388_v23 = vld [vmem:[%s7432_s29 + $0x78] sm:$0xff] }
 0xb5f   :  { %4923 = vmatpush3.bf16.msra.mxu0 %v4920_v32  ;;  %v4940_v32 = vpack.c.bf16 %v2142_v39, %v2139_v10  ;;  %v5377_v10 = vld [vmem:[%s7432_s29 + $0x10] sm:$0xff]  ;;  %v5379_v39 = vld [vmem:[%s7432_s29 + $0x18] sm:$0xff]  ;;  %v5381_v18 = vld [vmem:[%s7432_s29 + $0x20] sm:$0xff] }
 0xb60   :  { %2068 = vadd.xlane.f32.xlu1 %v6654_v37  ;;  %4925 = vmatprep.subr.bf16.mxu0 %v4924_v49 }
 0xb61   :  { %4899 = vmatpush1.bf16.msra.mxu1 %v4898_v1  ;;  %v2151_v1 = vld [vmem:[#allocation8 + $0x2e0] sm:$0xff] }
 0xb62   :  { %4901 = vmatprep.subr.bf16.mxu1 %v4900_v51  ;;  %v3919_v51 = vld [vmem:[#allocation7 + $0x1] ss:$0 sm:$0xff] }
 0xb63   :  { %4927 = vmatpush3.bf16.msra.mxu0 %v4924_v49  ;;  %v2152_v49 = vld [vmem:[#allocation8 + $0x2e8] sm:$0xff] }
 0xb64   :  { %4929 = vmatprep.subr.bf16.mxu0 %v4928_v54  ;;  %v4918_v27 = vpack.c.bf16 %v2152_v49, %v2149_v53  ;;  %v5389_v53 = vld [vmem:[%s7432_s29 + $0x80] sm:$0xff]  ;;  %v5390_v49 = vld [vmem:[%s7432_s29 + $0x88] sm:$0xff] }
 0xb65   :  { %4903 = vmatpush1.bf16.msra.mxu1 %v4902_v57 }
 0xb66   :  { %4905 = vmatprep.subr.bf16.mxu1 %v4904_v3 }
 0xb67   :  { %4931 = vmatpush3.bf16.msra.mxu0 %v4928_v54 }
 0xb69   :  { %4907 = vmatpush1.bf16.msra.mxu1 %v4906_v28 }
 0xb6a   :  { %4909 = vmatprep.subr.bf16.mxu1 %v4908_v0 }
 0xb6d   :  { %4911 = vmatpush1.bf16.msra.mxu1 %v4910_v12 }
 0xb6e   :  { %4913 = vmatprep.subr.bf16.mxu1 %v4912_v15  ;;  %v5378_v15 = vld [vmem:[%s7432_s29 + $0x50] sm:$0xff] }
 0xb71   :  { %4915 = vmatpush1.bf16.msra.mxu1 %v4914_v13  ;;  %v5383_v13 = vld [vmem:[%s7432_s29 + $0x28] sm:$0xff] }
 0xb72   :  { %4917 = vmatprep.subr.bf16.mxu1 %v4916_v55  ;;  %v5387_v55 = vld [vmem:[%s7432_s29 + $0x38] sm:$0xff] }
 0xb75   :  { %4919 = vmatpush1.bf16.msra.mxu1 %v4918_v27  ;;  %v5392_v27 = vld [vmem:[%s7432_s29 + $0x98] sm:$0xff] }
 0xbe9   :  { %v2067_v43 = vpop.xlane.xlu0 %2066 }
 0xbea   :  { %v2070_v48 = vmul.f32 0.020833334, %v2067_v43  ;;  %v2154_v43 = vld [vmem:[#allocation8 + $0x2f8] sm:$0xff] }
 0xbec   :  { %v6658_v30 = vsub.f32 %v6650_v16, %v2070_v48  ;;  %v4948_v48 = vpack.c.bf16 %v2154_v43, %v2151_v1  ;;  %v5393_v1 = vld [vmem:[%s7432_s29 + $0xa0] sm:$0xff]  ;;  %v5394_v43 = vld [vmem:[%s7432_s29 + $0xa8] sm:$0xff] }
 0xbed   :  { %v2069_v31 = vpop.xlane.xlu1 %2068 }
 0xbee   :  { %v2071_v59 = vmul.f32 0.020833334, %v2069_v31  ;;  %v2074_v8 = vmul.f32 %v6625_v50, %v6658_v30 }
 0xbf0   :  { %v6663_v46 = vsub.f32 %v6654_v37, %v2071_v59  ;;  %v2076_v5 = vmul.f32 %v2074_v8, %v2074_v8 }
 0xbf2   :  { %2078 = vadd.xlane.f32.xlu0 %v2076_v5  ;;  %v2075_v61 = vmul.f32 %v6625_v50, %v6663_v46  ;;  %v2130_v50 = vld [vmem:[#allocation8 + $0x238] sm:$0xff] }
 0xbf3   :  { %v4932_v6 = vpack.c.bf16 %v2130_v50, %v2127_v21 }
 0xbf4   :  { %v2077_v38 = vmul.f32 %v2075_v61, %v2075_v61 }
 0xbf5   :  { %4933 = vmatprep.subr.bf16.mxu0 %v4932_v6 }
 0xbf6   :  { %2080 = vadd.xlane.f32.xlu1 %v2077_v38  ;;  %4935 = vmatpush3.bf16.msra.mxu0 %v4932_v6 }
 0xbf7   :  { %4937 = vmatprep.subr.bf16.mxu0 %v4936_v62 }
 0xbfa   :  { %4939 = vmatpush3.bf16.msra.mxu0 %v4936_v62 }
 0xbfb   :  { %4941 = vmatprep.subr.bf16.mxu0 %v4940_v32 }
 0xbfe   :  { %4943 = vmatpush3.bf16.msra.mxu0 %v4940_v32  ;;  %v5382_v32 = vld [vmem:[%s7432_s29 + $0x60] sm:$0xff] }
 0xbff   :  { %4945 = vmatprep.subr.bf16.mxu0 %v4944_v25 }
 0xc02   :  { %4947 = vmatpush3.bf16.msra.mxu0 %v4944_v25  ;;  %v5391_v25 = vld [vmem:[%s7432_s29 + $0x90] sm:$0xff] }
 0xc03   :  { %4949 = vmatprep.subr.bf16.mxu0 %v4948_v48 }
 0xc06   :  { %4951 = vmatpush3.bf16.msra.mxu0 %v4948_v48  ;;  %v5395_v48 = vld [vmem:[%s7432_s29 + $0xb0] sm:$0xff] }
 0xc7f   :  { %v2079_v31 = vpop.xlane.xlu0 %2078 }
 0xc80   :  { %v2082_v59 = vmul.f32 0.020833334, %v2079_v31  ;;  %v5396_v31 = vld [vmem:[%s7432_s29 + $0xb8] sm:$0xff] }
 0xc82   :  { %v2084_v8 = vadd.f32 1e-05, %v2082_v59 }
 0xc83   :  { %v2081_v5 = vpop.xlane.xlu1 %2080 }
 0xc84   :  { %5230 = vrsqrt.f32 %v2084_v8  ;;  %v2083_v61 = vmul.f32 0.020833334, %v2081_v5 }
 0xc86   :  { %v2085_v38 = vadd.f32 1e-05, %v2083_v61 }
 0xc88   :  { %5232 = vrsqrt.f32 %v2085_v38  ;;  %v5397_v38 = vld [vmem:[%s7433_s26] sm:$0xff] }
 0xc8e   :  { %v5231_v40 = vpop.eup %5230 }
 0xc8f   :  { %v2088_v45 = vmul.f32 %v5231_v40, %v6658_v30  ;;  %v5374_v30 = vld [vmem:[%s7432_s29 + $0x40] sm:$0xff] }
 0xc91   :  { %v2096_v20 = vmul.f32 %v3918_v14, %v2088_v45 }
 0xc92   :  { %v5233_v35 = vpop.eup %5232 }
 0xc93   :  { %v2104_v52 = vadd.f32 %v3919_v51, %v2096_v20  ;;  %v2089_v54 = vmul.f32 %v5233_v35, %v6663_v46  ;;  %v2156_v46 = vld [vmem:[#allocation10 + $0x3] sm:$0x7] }
 0xc94   :  { %v2161_v3 = vrot.slane %v2156_v46, %v5953_v33  ;;  %v2169_v60 = vrot.slane %v2156_v46, %v362_v42  ;;  %v2165_v63 = vrot.slane %v2156_v46, %v5957_v44  ;;  %v5376_v42 = vld [vmem:[%s7432_s29 + $0x48] sm:$0xff] }
 0xc95   :  { %2238 = vmatmul.mubr.f32.vlgmr.msra.gmra.mrb[54].mxu1 %v2104_v52  ;;  %4522 = vmatprep.mubr.f32.mxu0 %v2104_v52  ;;  %v2097_v57 = vmul.f32 %v3918_v14, %v2089_v54  ;;  %v5398_v14 = vld [vmem:[%s7433_s26 + $0x8] sm:$0xff]  ;;  %v5399_v54 = vld [vmem:[%s7433_s26 + $0x10] sm:$0xff] }
 0xc96   :  { %2243 = vmatprep.mubr.f32.mxu1 %v5699_v7 }
 0xc97   :  { %v2105_v22 = vadd.f32 %v3919_v51, %v2097_v57 }
 0xc99   :  { %2244 = vmatmul.mubr.f32.gmra.mrb[56].mxu1 %v2105_v22  ;;  %4523 = vmatmul.mubr.f32.vlgmr.msra.gmra.mrb[38].mxu0 %v2105_v22  ;;  %v5400_v22 = vld [vmem:[%s7433_s26 + $0x18] sm:$0xff] }
 0xc9a   :  { %4529 = vmatprep.mubr.msk.f32.mxu0 %vm519_vm0, %v5373_v56  ;;  %4541 = vmatprep.mubr.msk.f32.mxu1 %vm519_vm0, %v5374_v30 }
 0xd68   :  { %v2239_v21 = vpop.f32.mrb[54].mxu1 }
 0xd69   :  { %v2241_v50 = vpop.f32.mrb[55].mxu1  ;;  %v2240_v34 = vadd.f32 %v2239_v21, %v2161_v3 }
 0xd6a   :  { %v2242_v9 = vadd.f32 %v2241_v50, %v2165_v63  ;;  %v5401_v50 = vld [vmem:[%s7433_s26 + $0x20] sm:$0xff] }
 0xd6c   :  { %v2245_v6 = vpop.f32.mrb[56].mxu1  ;;  %v4524_v28 = vpop.f32.mrb[38].mxu0 }
 0xd6d   :  { %v2246_v29 = vadd.f32 %v2245_v6, %v2161_v3  ;;  %v2322_v24 = vadd.f32 %v4524_v28, %v2169_v60  ;;  %v2247_v0 = vpop.f32.mrb[57].mxu1  ;;  %v2316_v2 = vpop.f32.mrb[39].mxu0 }
 0xd6e   :  { %v2248_v11 = vadd.f32 %v2247_v0, %v2165_v63  ;;  %v2317_v62 = vadd.f32 %v2316_v2, %v2169_v60  ;;  %v5402_v63 = vld [vmem:[%s7433_s26 + $0x28] sm:$0xff]  ;;  %v5403_v0 = vld [vmem:[%s7433_s26 + $0x30] sm:$0xff] }
 0xd6f   :  { %v4952_v12 = vpack.c.bf16 %v2246_v29, %v2240_v34 }
 0xd70   :  { %v4956_v58 = vpack.c.bf16 %v2248_v11, %v2242_v9  ;;  %v4960_v4 = vpack.c.bf16 %v2322_v24, %v2317_v62  ;;  %v5404_v9 = vld [vmem:[%s7433_s26 + $0x40] sm:$0xff]  ;;  %v6798_v62 = vld [vmem:[%s7433_s26 + $0x38] sm:$0xff] }
 0xd71   :  { %4953 = vmatprep.subr.bf16.mxu0 %v4952_v12  ;;  %5096 = vmatprep.subr.bf16.mxu1 %v4952_v12 }
 0xd72   :  { %4955 = vmatpush3.bf16.msra.mxu0 %v4952_v12  ;;  %5097 = vmatpush3.bf16.msra.mxu1 %v4952_v12 }
 0xd73   :  { %4957 = vmatprep.subr.bf16.mxu0 %v4956_v58  ;;  %4961 = vmatprep.subr.bf16.mxu1 %v4960_v4 }
 0xd75   :  { %4530 = vmatmul.mubr.msk.f32.vlgmr.msra.gmra.mrb[40].mxu0 %vm519_vm0, %v5375_v41  ;;  %4542 = vmatmul.mubr.msk.f32.vlgmr.msra.gmra.mrb[58].mxu1 %vm519_vm0, %v5376_v42  ;;  %v5406_v41 = vld [vmem:[%s7433_s26 + $0x50] sm:$0xff] }
 0xd76   :  { %4963 = vmatpush3.bf16.msra.mxu1 %v4960_v4  ;;  %4532 = vmatprep.mubr.msk.f32.mxu0 %vm519_vm0, %v5377_v10  ;;  %v6807_v10 = vld [vmem:[%s7433_s26 + $0x48] sm:$0xff] }
 0xd77   :  { %4544 = vmatprep.mubr.msk.f32.mxu1 %vm519_vm0, %v5378_v15 }
 0xd79   :  { %4533 = vmatmul.mubr.msk.f32.gmra.mrb[42].mxu0 %vm519_vm0, %v5379_v39  ;;  %4545 = vmatmul.mubr.msk.f32.gmra.mrb[60].mxu1 %vm519_vm0, %v5380_v17 }
 0xd7a   :  { %4535 = vmatprep.mubr.msk.f32.mxu0 %vm519_vm0, %v5381_v18  ;;  %4547 = vmatprep.mubr.msk.f32.mxu1 %vm519_vm0, %v5382_v32  ;;  %v5408_v18 = vld [vmem:[%s7433_s26 + $0x60] sm:$0xff] }
 0xd7b   :  { %4959 = vmatpush3.bf16.xpose.msra.mxu0 %v4956_v58 }
 0xd7c   :  { %4964 = vmatprep.subr.bf16.mxu0 %v5700_v26 }
 0xd7d   :  { %4536 = vmatmul.mubr.msk.f32.gmra.mrb[44].mxu0 %vm519_vm0, %v5383_v13  ;;  %4548 = vmatmul.mubr.msk.f32.gmra.mrb[62].mxu1 %vm519_vm0, %v5384_v19  ;;  %v5409_v13 = vld [vmem:[%s7433_s26 + $0x58] sm:$0xff] }
 0xd7e   :  { %4538 = vmatprep.mubr.msk.f32.mxu0 %vm519_vm0, %v5385_v36  ;;  %4550 = vmatprep.mubr.msk.f32.mxu1 %vm519_vm0, %v5386_v47 }
 0xd81   :  { %4539 = vmatmul.mubr.msk.f32.gmra.mrb[46].mxu0 %vm519_vm0, %v5387_v55  ;;  %4551 = vmatmul.mubr.msk.f32.gmra.mrb[64].mxu1 %vm519_vm0, %v5388_v23  ;;  %v5410_v55 = vld [vmem:[%s7433_s26 + $0x70] sm:$0xff] }
 0xd82   :  { %4553 = vmatprep.mubr.msk.f32.mxu1 %vm519_vm0, %v5389_v53  ;;  %v5411_v53 = vld [vmem:[%s7433_s26 + $0x68] sm:$0xff] }
 0xd85   :  { %4554 = vmatmul.mubr.msk.f32.gmra.mrb[66].mxu1 %vm519_vm0, %v5390_v49 }
 0xd86   :  { %4556 = vmatprep.mubr.msk.f32.mxu1 %vm519_vm0, %v5391_v25 }
 0xd89   :  { %4557 = vmatmul.mubr.msk.f32.gmra.mrb[68].mxu1 %vm519_vm0, %v5392_v27 }
 0xd8a   :  { %4559 = vmatprep.mubr.msk.f32.mxu1 %vm519_vm0, %v5393_v1  ;;  %v5412_v1 = vld [vmem:[%s7433_s26 + $0x80] sm:$0xff] }
 0xd8d   :  { %4560 = vmatmul.mubr.msk.f32.gmra.mrb[70].mxu1 %vm519_vm0, %v5394_v43 }
 0xd8e   :  { %4562 = vmatprep.mubr.msk.f32.mxu1 %vm519_vm0, %v5395_v48  ;;  %v5413_v48 = vld [vmem:[%s7433_s26 + $0x78] sm:$0xff] }
 0xd91   :  { %4563 = vmatmul.mubr.msk.f32.gmra.mrb[72].mxu1 %vm519_vm0, %v5396_v31 }
 0xe48   :  { %v4531_v59 = vpop.f32.mrb[40].mxu0  ;;  %v4543_v8 = vpop.f32.mrb[58].mxu1 }
 0xe49   :  { %v2391_v5 = vpop.f32.mrb[41].mxu0  ;;  %v2431_v61 = vpop.f32.mrb[59].mxu1  ;;  %v2511_v45 = vmul.f32 %v5398_v14, %v4531_v59  ;;  %v2519_v15 = vmul.f32 %v6807_v10, %v4543_v8  ;;  %v5414_v59 = vld [vmem:[%s7433_s26 + $0x90] sm:$0xff]  ;;  %v5417_v14 = vld [vmem:[%s7433_s26 + $0x98] sm:$0xff] }
 0xe4a   :  { %v2510_v40 = vmul.f32 %v5397_v38, %v2391_v5  ;;  %v2518_v11 = vmul.f32 %v5404_v9, %v2431_v61  ;;  %v5415_v5 = vld [vmem:[%s7433_s26 + $0x88] sm:$0xff]  ;;  %v5416_v38 = vld [vmem:[%s7433_s26 + $0xa0] sm:$0xff] }
 0xe4c   :  { %v4534_v51 = vpop.f32.mrb[42].mxu0  ;;  %4569 = vmatprep.mubr.f32.mxu0 %v2510_v40  ;;  %v4546_v20 = vpop.f32.mrb[60].mxu1 }
 0xe4d   :  { %v2401_v35 = vpop.f32.mrb[43].mxu0  ;;  %4570 = vmatmul.mubr.f32.vlgmr.msra.gmra.mrb[48].mxu0 %v2511_v45  ;;  %v2441_v52 = vpop.f32.mrb[61].mxu1  ;;  %v2513_v56 = vmul.f32 %v5400_v22, %v4534_v51  ;;  %v2521_v19 = vmul.f32 %v5409_v13, %v4546_v20  ;;  %v5418_v51 = vld [vmem:[%s7433_s26 + $0xb0] sm:$0xff]  ;;  %v5421_v22 = vld [vmem:[%s7435_s20 + $0x8] sm:$0xff] }
 0xe4e   :  { %v2512_v57 = vmul.f32 %v5399_v54, %v2401_v35  ;;  %v2520_v42 = vmul.f32 %v5406_v41, %v2441_v52  ;;  %v5419_v35 = vld [vmem:[%s7433_s26 + $0xa8] sm:$0xff]  ;;  %v5420_v54 = vld [vmem:[%s7433_s26 + $0xb8] sm:$0xff] }
 0xe50   :  { %v4537_v30 = vpop.f32.mrb[44].mxu0  ;;  %4572 = vmatprep.mubr.f32.mxu0 %v2512_v57  ;;  %v4549_v46 = vpop.f32.mrb[62].mxu1 }
 0xe51   :  { %v2411_v21 = vpop.f32.mrb[45].mxu0  ;;  %4573 = vmatmul.mubr.f32.gmra.mrb[50].mxu0 %v2513_v56  ;;  %v2451_v3 = vpop.f32.mrb[63].mxu1  ;;  %v2515_v6 = vmul.f32 %v5402_v63, %v4537_v30  ;;  %v2523_v49 = vmul.f32 %v5411_v53, %v4549_v46 }
 0xe52   :  { %v2514_v60 = vmul.f32 %v5401_v50, %v2411_v21  ;;  %v2522_v32 = vmul.f32 %v5408_v18, %v2451_v3 }
 0xe54   :  { %v4540_v28 = vpop.f32.mrb[46].mxu0  ;;  %4575 = vmatprep.mubr.f32.mxu0 %v2514_v60  ;;  %v4552_v34 = vpop.f32.mrb[64].mxu1 }
 0xe55   :  { %v2421_v29 = vpop.f32.mrb[47].mxu0  ;;  %4576 = vmatmul.mubr.f32.gmra.mrb[52].mxu0 %v2515_v6  ;;  %v2461_v24 = vpop.f32.mrb[65].mxu1  ;;  %v2517_v12 = vmul.f32 %v6798_v62, %v4540_v28  ;;  %v2525_v31 = vmul.f32 %v5413_v48, %v4552_v34 }
 0xe56   :  { %v2516_v2 = vmul.f32 %v5403_v0, %v2421_v29  ;;  %v2524_v23 = vmul.f32 %v5410_v55, %v2461_v24 }
 0xe58   :  { %4578 = vmatprep.mubr.f32.mxu0 %v2516_v2  ;;  %v4555_v58 = vpop.f32.mrb[66].mxu1 }
 0xe59   :  { %4579 = vmatmul.mubr.f32.gmra.mrb[54].mxu0 %v2517_v12  ;;  %v2471_v4 = vpop.f32.mrb[67].mxu1  ;;  %v2527_v61 = vmul.f32 %v5415_v5, %v4555_v58 }
 0xe5a   :  { %4581 = vmatprep.mubr.f32.mxu0 %v2518_v11  ;;  %v2526_v43 = vmul.f32 %v5412_v1, %v2471_v4 }
 0xe5c   :  { %v4558_v39 = vpop.f32.mrb[68].mxu1 }
 0xe5d   :  { %4582 = vmatmul.mubr.f32.gmra.mrb[56].mxu0 %v2519_v15  ;;  %v2481_v17 = vpop.f32.mrb[69].mxu1  ;;  %v2529_v45 = vmul.f32 %v5417_v14, %v4558_v39 }
 0xe5e   :  { %4584 = vmatprep.mubr.f32.mxu0 %v2520_v42  ;;  %v2528_v8 = vmul.f32 %v5414_v59, %v2481_v17 }
 0xe60   :  { %v4561_v36 = vpop.f32.mrb[70].mxu1 }
 0xe61   :  { %4585 = vmatmul.mubr.f32.gmra.mrb[58].mxu0 %v2521_v19  ;;  %v2491_v47 = vpop.f32.mrb[71].mxu1  ;;  %v2531_v52 = vmul.f32 %v5419_v35, %v4561_v36 }
 0xe62   :  { %4587 = vmatprep.mubr.f32.mxu0 %v2522_v32  ;;  %v2530_v40 = vmul.f32 %v5416_v38, %v2491_v47 }
 0xe64   :  { %v4564_v25 = vpop.f32.mrb[72].mxu1 }
 0xe65   :  { %4588 = vmatmul.mubr.f32.gmra.mrb[60].mxu0 %v2523_v49  ;;  %v2501_v27 = vpop.f32.mrb[73].mxu1  ;;  %v2533_v57 = vmul.f32 %v5420_v54, %v4564_v25 }
 0xe66   :  { %4590 = vmatprep.mubr.f32.mxu0 %v2524_v23  ;;  %v2532_v20 = vmul.f32 %v5418_v51, %v2501_v27 }
 0xe69   :  { %4591 = vmatmul.mubr.f32.gmra.mrb[62].mxu0 %v2525_v31 }
 0xe6a   :  { %4593 = vmatprep.mubr.f32.mxu0 %v2526_v43 }
 0xe6d   :  { %4594 = vmatmul.mubr.f32.gmra.mrb[64].mxu0 %v2527_v61 }
 0xe6e   :  { %4596 = vmatprep.mubr.f32.mxu0 %v2528_v8 }
 0xe71   :  { %4597 = vmatmul.mubr.f32.gmra.mrb[66].mxu0 %v2529_v45 }
 0xe72   :  { %4599 = vmatprep.mubr.f32.mxu0 %v2530_v40 }
 0xe75   :  { %4600 = vmatmul.mubr.f32.gmra.mrb[68].mxu0 %v2531_v52 }
 0xe76   :  { %4602 = vmatprep.mubr.f32.mxu0 %v2532_v20 }
 0xe79   :  { %4603 = vmatmul.mubr.f32.gmra.mrb[70].mxu0 %v2533_v57 }
 0xe7a   :  { %3968 = vmatprep.mubr.msk.f32.mxu0 %vm1579_vm1, %v5421_v22 }
 0xf20   :  { %v4571_v56 = vpop.f32.mrb[48].mxu0 }
 0xf21   :  { %v6853_v30 = vmul.f32 0.5, %v4571_v56  ;;  %v2600_v46 = vpop.f32.mrb[49].mxu0 }
 0xf22   :  { %v6855_v21 = vmul.f32 0.5, %v2600_v46 }
 0xf23   :  { %v2746_v3 = vsel %vm519_vm0, %v6853_v30, -inf }
 0xf24   :  { %2747 = vmax.xlane.f32.xlu1 %v2746_v3  ;;  %v4574_v50 = vpop.f32.mrb[50].mxu0  ;;  %v2743_v60 = vsel %vm519_vm0, %v6855_v21, -inf }
 0xf25   :  { %v6861_v63 = vmul.f32 0.5, %v4574_v50  ;;  %2744 = vmax.xlane.f32.xlu0 %v2743_v60  ;;  %v2610_v6 = vpop.f32.mrb[51].mxu0 }
 0xf26   :  { %v6863_v28 = vmul.f32 0.5, %v2610_v6 }
 0xf27   :  { %v2752_v34 = vsel %vm519_vm0, %v6861_v63, -inf }
 0xf28   :  { %2753 = vmax.xlane.f32.xlu1 %v2752_v34  ;;  %v4577_v29 = vpop.f32.mrb[52].mxu0  ;;  %v2749_v24 = vsel %vm519_vm0, %v6863_v28, -inf }
 0xf29   :  { %v6869_v0 = vmul.f32 0.5, %v4577_v29  ;;  %2750 = vmax.xlane.f32.xlu0 %v2749_v24  ;;  %v2620_v2 = vpop.f32.mrb[53].mxu0 }
 0xf2a   :  { %v6871_v9 = vmul.f32 0.5, %v2620_v2 }
 0xf2b   :  { %v2758_v11 = vsel %vm519_vm0, %v6869_v0, -inf }
 0xf2c   :  { %2759 = vmax.xlane.f32.xlu1 %v2758_v11  ;;  %v4580_v12 = vpop.f32.mrb[54].mxu0  ;;  %v2755_v58 = vsel %vm519_vm0, %v6871_v9, -inf }
 0xf2d   :  { %v6877_v4 = vmul.f32 0.5, %v4580_v12  ;;  %2756 = vmax.xlane.f32.xlu0 %v2755_v58  ;;  %v2630_v41 = vpop.f32.mrb[55].mxu0 }
 0xf2e   :  { %v6879_v42 = vmul.f32 0.5, %v2630_v41 }
 0xf2f   :  { %v2764_v15 = vsel %vm519_vm0, %v6877_v4, -inf }
 0xf30   :  { %2765 = vmax.xlane.f32.xlu1 %v2764_v15  ;;  %v4583_v39 = vpop.f32.mrb[56].mxu0  ;;  %v2761_v17 = vsel %vm519_vm0, %v6879_v42, -inf }
 0xf31   :  { %v6885_v18 = vmul.f32 0.5, %v4583_v39  ;;  %2762 = vmax.xlane.f32.xlu0 %v2761_v17  ;;  %v2640_v32 = vpop.f32.mrb[57].mxu0 }
 0xf32   :  { %v6887_v13 = vmul.f32 0.5, %v2640_v32 }
 0xf33   :  { %v2770_v19 = vsel %vm519_vm0, %v6885_v18, -inf }
 0xf34   :  { %2771 = vmax.xlane.f32.xlu1 %v2770_v19  ;;  %v4586_v36 = vpop.f32.mrb[58].mxu0  ;;  %v2767_v47 = vsel %vm519_vm0, %v6887_v13, -inf }
 0xf35   :  { %v6893_v55 = vmul.f32 0.5, %v4586_v36  ;;  %2768 = vmax.xlane.f32.xlu0 %v2767_v47  ;;  %v2650_v23 = vpop.f32.mrb[59].mxu0 }
 0xf36   :  { %v6895_v53 = vmul.f32 0.5, %v2650_v23 }
 0xf37   :  { %v2776_v49 = vsel %vm519_vm0, %v6893_v55, -inf }
 0xf38   :  { %2777 = vmax.xlane.f32.xlu1 %v2776_v49  ;;  %v4589_v25 = vpop.f32.mrb[60].mxu0  ;;  %v2773_v27 = vsel %vm519_vm0, %v6895_v53, -inf }
 0xf39   :  { %v6901_v1 = vmul.f32 0.5, %v4589_v25  ;;  %2774 = vmax.xlane.f32.xlu0 %v2773_v27  ;;  %v2660_v43 = vpop.f32.mrb[61].mxu0 }
 0xf3a   :  { %v6903_v48 = vmul.f32 0.5, %v2660_v43 }
 0xf3b   :  { %v2782_v31 = vsel %vm519_vm0, %v6901_v1, -inf }
 0xf3c   :  { %2783 = vmax.xlane.f32.xlu1 %v2782_v31  ;;  %v4592_v59 = vpop.f32.mrb[62].mxu0  ;;  %v2779_v8 = vsel %vm519_vm0, %v6903_v48, -inf }
 0xf3d   :  { %v6909_v5 = vmul.f32 0.5, %v4592_v59  ;;  %2780 = vmax.xlane.f32.xlu0 %v2779_v8  ;;  %v2670_v61 = vpop.f32.mrb[63].mxu0 }
 0xf3e   :  { %v6911_v38 = vmul.f32 0.5, %v2670_v61 }
 0xf3f   :  { %v2788_v40 = vsel %vm519_vm0, %v6909_v5, -inf }
 0xf40   :  { %2789 = vmax.xlane.f32.xlu1 %v2788_v40  ;;  %v4595_v14 = vpop.f32.mrb[64].mxu0  ;;  %v2785_v45 = vsel %vm519_vm0, %v6911_v38, -inf }
 0xf41   :  { %v6917_v51 = vmul.f32 0.5, %v4595_v14  ;;  %2786 = vmax.xlane.f32.xlu0 %v2785_v45  ;;  %v2680_v20 = vpop.f32.mrb[65].mxu0 }
 0xf42   :  { %v6919_v35 = vmul.f32 0.5, %v2680_v20 }
 0xf43   :  { %v2794_v52 = vsel %vm519_vm0, %v6917_v51, -inf }
 0xf44   :  { %2795 = vmax.xlane.f32.xlu1 %v2794_v52  ;;  %v4598_v54 = vpop.f32.mrb[66].mxu0  ;;  %v2791_v57 = vsel %vm519_vm0, %v6919_v35, -inf }
 0xf45   :  { %v6925_v22 = vmul.f32 0.5, %v4598_v54  ;;  %2792 = vmax.xlane.f32.xlu0 %v2791_v57  ;;  %v2690_v56 = vpop.f32.mrb[67].mxu0 }
 0xf46   :  { %v6927_v46 = vmul.f32 0.5, %v2690_v56 }
 0xf47   :  { %v2800_v3 = vsel %vm519_vm0, %v6925_v22, -inf }
 0xf48   :  { %2801 = vmax.xlane.f32.xlu1 %v2800_v3  ;;  %v4601_v50 = vpop.f32.mrb[68].mxu0  ;;  %v2797_v60 = vsel %vm519_vm0, %v6927_v46, -inf }
 0xf49   :  { %v6933_v6 = vmul.f32 0.5, %v4601_v50  ;;  %2798 = vmax.xlane.f32.xlu0 %v2797_v60  ;;  %v2700_v34 = vpop.f32.mrb[69].mxu0 }
 0xf4a   :  { %v6935_v29 = vmul.f32 0.5, %v2700_v34 }
 0xf4b   :  { %v2806_v24 = vsel %vm519_vm0, %v6933_v6, -inf }
 0xf4c   :  { %2807 = vmax.xlane.f32.xlu1 %v2806_v24  ;;  %v4604_v2 = vpop.f32.mrb[70].mxu0  ;;  %v2803_v11 = vsel %vm519_vm0, %v6935_v29, -inf }
 0xf4d   :  { %v6941_v12 = vmul.f32 0.5, %v4604_v2  ;;  %2804 = vmax.xlane.f32.xlu0 %v2803_v11  ;;  %v2710_v58 = vpop.f32.mrb[71].mxu0 }
 0xf4e   :  { %v6943_v41 = vmul.f32 0.5, %v2710_v58 }
 0xf4f   :  { %v2812_v15 = vsel %vm519_vm0, %v6941_v12, -inf }
 0xf50   :  { %2813 = vmax.xlane.f32.xlu1 %v2812_v15  ;;  %v2809_v39 = vsel %vm519_vm0, %v6943_v41, -inf }
 0xf51   :  { %2810 = vmax.xlane.f32.xlu0 %v2809_v39 }
 0xfb1   :  { %v2748_v17 = vpop.xlane.xlu1 %2747 }
 0xfb2   :  { %v2816_v32 = vsub.f32 %v6853_v30, %v2748_v17  ;;  %v2745_v19 = vpop.xlane.xlu0 %2744  ;;  %v5424_v17 = vld [vmem:[%s7434_s0 + $0x18] sm:$0xff] }
 0xfb3   :  { %v2815_v36 = vsub.f32 %v6855_v21, %v2745_v19 }
 0xfb4   :  { %v2841_v47 = vmul.f32 1.442695, %v2816_v32 }
 0xfb5   :  { %v2839_v23 = vmul.f32 1.442695, %v2815_v36  ;;  %v2754_v49 = vpop.xlane.xlu1 %2753  ;;  %v5425_v36 = vld [vmem:[%s7434_s0 + $0x10] sm:$0xff] }
 0xfb6   :  { %5234 = vpow2.f32 %v2841_v47  ;;  %v2818_v25 = vsub.f32 %v6861_v63, %v2754_v49  ;;  %v2751_v27 = vpop.xlane.xlu0 %2750 }
 0xfb7   :  { %5236 = vpow2.f32 %v2839_v23  ;;  %v2817_v43 = vsub.f32 %v6863_v28, %v2751_v27 }
 0xfb8   :  { %v2845_v31 = vmul.f32 1.442695, %v2818_v25 }
 0xfb9   :  { %v2843_v59 = vmul.f32 1.442695, %v2817_v43  ;;  %v2760_v8 = vpop.xlane.xlu1 %2759 }
 0xfba   :  { %5238 = vpow2.f32 %v2845_v31  ;;  %v2820_v61 = vsub.f32 %v6869_v0, %v2760_v8  ;;  %v2757_v30 = vpop.xlane.xlu0 %2756  ;;  %v5422_v0 = vld [vmem:[%s7434_s0 + $0x8] sm:$0xff] }
 0xfbb   :  { %5240 = vpow2.f32 %v2843_v59  ;;  %v2819_v21 = vsub.f32 %v6871_v9, %v2757_v30  ;;  %v5426_v8 = vld [vmem:[%s7434_s0 + $0x28] sm:$0xff] }
 0xfbc   :  { %v2849_v40 = vmul.f32 1.442695, %v2820_v61 }
 0xfbd   :  { %v2847_v14 = vmul.f32 1.442695, %v2819_v21  ;;  %v2766_v45 = vpop.xlane.xlu1 %2765  ;;  %v5427_v21 = vld [vmem:[%s7434_s0 + $0x20] sm:$0xff] }
 0xfbe   :  { %5242 = vpow2.f32 %v2849_v40  ;;  %v2822_v63 = vsub.f32 %v6877_v4, %v2766_v45  ;;  %v2763_v20 = vpop.xlane.xlu0 %2762  ;;  %v5423_v4 = vld [vmem:[%s7434_s0] sm:$0xff] }
 0xfbf   :  { %5244 = vpow2.f32 %v2847_v14  ;;  %v2821_v28 = vsub.f32 %v6879_v42, %v2763_v20 }
 0xfc0   :  { %v5235_v52 = vpop.eup %5234  ;;  %v2853_v54 = vmul.f32 1.442695, %v2822_v63 }
 0xfc1   :  { %v5237_v57 = vpop.eup %5236  ;;  %v2851_v56 = vmul.f32 1.442695, %v2821_v28  ;;  %v2772_v3 = vpop.xlane.xlu1 %2771  ;;  %v6960_v9 = vmul.f32 %v5422_v0, %v5235_v52  ;;  %v5429_v0 = vld [vmem:[%s7434_s0 + $0x30] sm:$0xff] }
 0xfc2   :  { %5246 = vpow2.f32 %v2853_v54  ;;  %v2824_v50 = vsub.f32 %v6885_v18, %v2772_v3  ;;  %v2769_v60 = vpop.xlane.xlu0 %2768  ;;  %v6966_v42 = vmul.f32 %v5423_v4, %v5237_v57  ;;  %v5428_v57 = vld [vmem:[%s7434_s0 + $0x38] sm:$0xff] }
 0xfc3   :  { %5248 = vpow2.f32 %v2851_v56  ;;  %v2823_v34 = vsub.f32 %v6887_v13, %v2769_v60  ;;  %v2914_v24 = vsel %vm519_vm0, %v6960_v9, 0.0 }
 0xfc4   :  { %v5239_v2 = vpop.eup %5238  ;;  %v2857_v11 = vmul.f32 1.442695, %v2824_v50  ;;  %2915 = vadd.xlane.f32.xlu1 %v2914_v24  ;;  %v2911_v58 = vsel %vm519_vm0, %v6966_v42, 0.0 }
 0xfc5   :  { %v5241_v18 = vpop.eup %5240  ;;  %v2855_v15 = vmul.f32 1.442695, %v2823_v34  ;;  %v2778_v39 = vpop.xlane.xlu1 %2777  ;;  %2912 = vadd.xlane.f32.xlu0 %v2911_v58  ;;  %v6976_v32 = vmul.f32 %v5424_v17, %v5239_v2  ;;  %v5431_v17 = vld [vmem:[%s7434_s0 + $0x40] sm:$0xff] }
 0xfc6   :  { %5250 = vpow2.f32 %v2857_v11  ;;  %v2826_v13 = vsub.f32 %v6893_v55, %v2778_v39  ;;  %v2775_v19 = vpop.xlane.xlu0 %2774  ;;  %v6982_v47 = vmul.f32 %v5425_v36, %v5241_v18  ;;  %v5430_v18 = vld [vmem:[%s7434_s0 + $0x48] sm:$0xff] }
 0xfc7   :  { %5252 = vpow2.f32 %v2855_v15  ;;  %v2825_v23 = vsub.f32 %v6895_v53, %v2775_v19  ;;  %v2920_v49 = vsel %vm519_vm0, %v6976_v32, 0.0 }
 0xfc8   :  { %v5243_v25 = vpop.eup %5242  ;;  %v2861_v27 = vmul.f32 1.442695, %v2826_v13  ;;  %2921 = vadd.xlane.f32.xlu1 %v2920_v49  ;;  %v2917_v43 = vsel %vm519_vm0, %v6982_v47, 0.0 }
 0xfc9   :  { %v5245_v55 = vpop.eup %5244  ;;  %v2859_v31 = vmul.f32 1.442695, %v2825_v23  ;;  %v2784_v59 = vpop.xlane.xlu1 %2783  ;;  %2918 = vadd.xlane.f32.xlu0 %v2917_v43  ;;  %v6992_v61 = vmul.f32 %v5426_v8, %v5243_v25  ;;  %v5433_v8 = vld [vmem:[%s7434_s0 + $0x50] sm:$0xff] }
 0xfca   :  { %5254 = vpow2.f32 %v2861_v27  ;;  %v2828_v53 = vsub.f32 %v6901_v1, %v2784_v59  ;;  %v2781_v30 = vpop.xlane.xlu0 %2780  ;;  %v6998_v40 = vmul.f32 %v5427_v21, %v5245_v55  ;;  %v5432_v55 = vld [vmem:[%s7434_s0 + $0x58] sm:$0xff] }
 0xfcb   :  { %5256 = vpow2.f32 %v2859_v31  ;;  %v2827_v14 = vsub.f32 %v6903_v48, %v2781_v30  ;;  %v2926_v45 = vsel %vm519_vm0, %v6992_v61, 0.0 }
 0xfcc   :  { %v5247_v63 = vpop.eup %5246  ;;  %v2865_v20 = vmul.f32 1.442695, %v2828_v53  ;;  %2927 = vadd.xlane.f32.xlu1 %v2926_v45  ;;  %v2923_v28 = vsel %vm519_vm0, %v6998_v40, 0.0 }
 0xfcd   :  { %v5249_v1 = vpop.eup %5248  ;;  %v2863_v52 = vmul.f32 1.442695, %v2827_v14  ;;  %v2790_v54 = vpop.xlane.xlu1 %2789  ;;  %2924 = vadd.xlane.f32.xlu0 %v2923_v28  ;;  %v7008_v56 = vmul.f32 %v5428_v57, %v5247_v63  ;;  %v5435_v57 = vld [vmem:[%s7434_s0 + $0x60] sm:$0xff] }
 0xfce   :  { %5258 = vpow2.f32 %v2865_v20  ;;  %v2830_v48 = vsub.f32 %v6909_v5, %v2790_v54  ;;  %v2787_v3 = vpop.xlane.xlu0 %2786  ;;  %v7014_v50 = vmul.f32 %v5429_v0, %v5249_v1  ;;  %v5434_v1 = vld [vmem:[%s7434_s0 + $0x68] sm:$0xff] }
 0xfcf   :  { %5260 = vpow2.f32 %v2863_v52  ;;  %v2829_v60 = vsub.f32 %v6911_v38, %v2787_v3  ;;  %v2932_v4 = vsel %vm519_vm0, %v7008_v56, 0.0 }
 0xfd0   :  { %v5251_v34 = vpop.eup %5250  ;;  %v2869_v24 = vmul.f32 1.442695, %v2830_v48  ;;  %2933 = vadd.xlane.f32.xlu1 %v2932_v4  ;;  %v2929_v2 = vsel %vm519_vm0, %v7014_v50, 0.0 }
 0xfd1   :  { %v5253_v5 = vpop.eup %5252  ;;  %v2867_v11 = vmul.f32 1.442695, %v2829_v60  ;;  %v2796_v58 = vpop.xlane.xlu1 %2795  ;;  %2930 = vadd.xlane.f32.xlu0 %v2929_v2  ;;  %v7024_v15 = vmul.f32 %v5430_v18, %v5251_v34  ;;  %v5437_v18 = vld [vmem:[%s7434_s0 + $0x70] sm:$0xff] }
 0xfd2   :  { %5262 = vpow2.f32 %v2869_v24  ;;  %v2832_v38 = vsub.f32 %v6917_v51, %v2796_v58  ;;  %v2793_v39 = vpop.xlane.xlu0 %2792  ;;  %v7030_v13 = vmul.f32 %v5431_v17, %v5253_v5  ;;  %v5436_v5 = vld [vmem:[%s7434_s0 + $0x78] sm:$0xff] }
 0xfd3   :  { %5264 = vpow2.f32 %v2867_v11  ;;  %v2831_v19 = vsub.f32 %v6919_v35, %v2793_v39  ;;  %v2938_v36 = vsel %vm519_vm0, %v7024_v15, 0.0 }
 0xfd4   :  { %v5255_v23 = vpop.eup %5254  ;;  %v2873_v49 = vmul.f32 1.442695, %v2832_v38  ;;  %2939 = vadd.xlane.f32.xlu1 %v2938_v36  ;;  %v2935_v25 = vsel %vm519_vm0, %v7030_v13, 0.0 }
 0xfd5   :  { %v5257_v51 = vpop.eup %5256  ;;  %v2871_v27 = vmul.f32 1.442695, %v2831_v19  ;;  %v2802_v43 = vpop.xlane.xlu1 %2801  ;;  %2936 = vadd.xlane.f32.xlu0 %v2935_v25  ;;  %v7040_v31 = vmul.f32 %v5432_v55, %v5255_v23  ;;  %v5438_v25 = vld [vmem:[%s7434_s0 + $0x88] sm:$0xff] }
 0xfd6   :  { %5266 = vpow2.f32 %v2873_v49  ;;  %v2834_v35 = vsub.f32 %v6925_v22, %v2802_v43  ;;  %v2799_v59 = vpop.xlane.xlu0 %2798  ;;  %v7046_v53 = vmul.f32 %v5433_v8, %v5257_v51  ;;  %v5440_v8 = vld [vmem:[%s7434_s0 + $0x98] sm:$0xff] }
 0xfd7   :  { %5268 = vpow2.f32 %v2871_v27  ;;  %v2833_v30 = vsub.f32 %v6927_v46, %v2799_v59  ;;  %v2944_v21 = vsel %vm519_vm0, %v7040_v31, 0.0 }
 0xfd8   :  { %v5259_v14 = vpop.eup %5258  ;;  %v2877_v45 = vmul.f32 1.442695, %v2834_v35  ;;  %2945 = vadd.xlane.f32.xlu1 %v2944_v21  ;;  %v2941_v63 = vsel %vm519_vm0, %v7046_v53, 0.0  ;;  %v5441_v21 = vld [vmem:[%s7434_s0 + $0x90] sm:$0xff] }
 0xfd9   :  { %v5261_v22 = vpop.eup %5260  ;;  %v2875_v20 = vmul.f32 1.442695, %v2833_v30  ;;  %v2808_v28 = vpop.xlane.xlu1 %2807  ;;  %2942 = vadd.xlane.f32.xlu0 %v2941_v63  ;;  %v7056_v52 = vmul.f32 %v5434_v1, %v5259_v14 }
 0xfda   :  { %5270 = vpow2.f32 %v2877_v45  ;;  %v2836_v46 = vsub.f32 %v6933_v6, %v2808_v28  ;;  %v2805_v54 = vpop.xlane.xlu0 %2804  ;;  %v7062_v48 = vmul.f32 %v5435_v57, %v5261_v22  ;;  %v5442_v28 = vld [vmem:[%s7434_s0 + $0xa8] sm:$0xff] }
 0xfdb   :  { %5272 = vpow2.f32 %v2875_v20  ;;  %v2835_v3 = vsub.f32 %v6935_v29, %v2805_v54  ;;  %v2950_v0 = vsel %vm519_vm0, %v7056_v52, 0.0 }
 0xfdc   :  { %v5263_v60 = vpop.eup %5262  ;;  %v2881_v4 = vmul.f32 1.442695, %v2836_v46  ;;  %2951 = vadd.xlane.f32.xlu1 %v2950_v0  ;;  %v2947_v34 = vsel %vm519_vm0, %v7062_v48, 0.0  ;;  %v5443_v46 = vld [vmem:[%s7434_s0 + $0xa0] sm:$0xff] }
 0xfdd   :  { %v5265_v6 = vpop.eup %5264  ;;  %v2879_v24 = vmul.f32 1.442695, %v2835_v3  ;;  %v2814_v2 = vpop.xlane.xlu1 %2813  ;;  %2948 = vadd.xlane.f32.xlu0 %v2947_v34  ;;  %v7072_v11 = vmul.f32 %v5436_v5, %v5263_v60 }
 0xfde   :  { %5274 = vpow2.f32 %v2881_v4  ;;  %v2838_v29 = vsub.f32 %v6941_v12, %v2814_v2  ;;  %v2811_v58 = vpop.xlane.xlu0 %2810  ;;  %v7078_v38 = vmul.f32 %v5437_v18, %v5265_v6  ;;  %v5444_v4 = vld [vmem:[%s7434_s0 + $0xb8] sm:$0xff]  ;;  %v5445_v6 = vld [vmem:[%s7434_s0 + $0xb0] sm:$0xff] }
 0xfdf   :  { %5276 = vpow2.f32 %v2879_v24  ;;  %v2837_v39 = vsub.f32 %v6943_v41, %v2811_v58  ;;  %v2956_v17 = vsel %vm519_vm0, %v7072_v11, 0.0  ;;  %v5439_v41 = vld [vmem:[%s7434_s0 + $0x80] sm:$0xff] }
 0xfe0   :  { %v5267_v19 = vpop.eup %5266  ;;  %v2885_v36 = vmul.f32 1.442695, %v2838_v29  ;;  %2957 = vadd.xlane.f32.xlu1 %v2956_v17  ;;  %v2953_v23 = vsel %vm519_vm0, %v7078_v38, 0.0 }
 0xfe1   :  { %v5269_v12 = vpop.eup %5268  ;;  %v2883_v49 = vmul.f32 1.442695, %v2837_v39  ;;  %2954 = vadd.xlane.f32.xlu0 %v2953_v23  ;;  %v7088_v51 = vmul.f32 %v5438_v25, %v5267_v19 }
 0xfe2   :  { %5278 = vpow2.f32 %v2885_v36  ;;  %v7093_v27 = vmul.f32 %v5439_v41, %v5269_v12 }
 0xfe3   :  { %5280 = vpow2.f32 %v2883_v49  ;;  %v2962_v43 = vsel %vm519_vm0, %v7088_v51, 0.0 }
 0xfe4   :  { %v5271_v55 = vpop.eup %5270  ;;  %2963 = vadd.xlane.f32.xlu1 %v2962_v43  ;;  %v2959_v35 = vsel %vm519_vm0, %v7093_v27, 0.0 }
 0xfe5   :  { %v5273_v59 = vpop.eup %5272  ;;  %2960 = vadd.xlane.f32.xlu0 %v2959_v35  ;;  %v7102_v30 = vmul.f32 %v5440_v8, %v5271_v55 }
 0xfe6   :  { %v7107_v14 = vmul.f32 %v5441_v21, %v5273_v59 }
 0xfe7   :  { %v2968_v45 = vsel %vm519_vm0, %v7102_v30, 0.0 }
 0xfe8   :  { %v5275_v63 = vpop.eup %5274  ;;  %2969 = vadd.xlane.f32.xlu1 %v2968_v45  ;;  %v2965_v22 = vsel %vm519_vm0, %v7107_v14, 0.0 }
 0xfe9   :  { %v5277_v20 = vpop.eup %5276  ;;  %2966 = vadd.xlane.f32.xlu0 %v2965_v22  ;;  %v7116_v1 = vmul.f32 %v5442_v28, %v5275_v63 }
 0xfea   :  { %v7121_v54 = vmul.f32 %v5443_v46, %v5277_v20 }
 0xfeb   :  { %v2974_v57 = vsel %vm519_vm0, %v7116_v1, 0.0 }
 0xfec   :  { %v5279_v3 = vpop.eup %5278  ;;  %2975 = vadd.xlane.f32.xlu1 %v2974_v57  ;;  %v2971_v0 = vsel %vm519_vm0, %v7121_v54, 0.0 }
 0xfed   :  { %v5281_v60 = vpop.eup %5280  ;;  %2972 = vadd.xlane.f32.xlu0 %v2971_v0  ;;  %v7130_v34 = vmul.f32 %v5444_v4, %v5279_v3 }
 0xfee   :  { %v7135_v24 = vmul.f32 %v5445_v6, %v5281_v60 }
 0xfef   :  { %v2980_v2 = vsel %vm519_vm0, %v7130_v34, 0.0 }
 0xff0   :  { %2981 = vadd.xlane.f32.xlu1 %v2980_v2  ;;  %v2977_v5 = vsel %vm519_vm0, %v7135_v24, 0.0 }
 0xff1   :  { %2978 = vadd.xlane.f32.xlu0 %v2977_v5 }
0x1051   :  { %v2916_v29 = vpop.xlane.xlu1 %2915 }
0x1052   :  { %5282 = vrcp.f32 %v2916_v29  ;;  %v2913_v58 = vpop.xlane.xlu0 %2912 }
0x1053   :  { %5284 = vrcp.f32 %v2913_v58 }
0x1055   :  { %v2922_v18 = vpop.xlane.xlu1 %2921 }
0x1056   :  { %5286 = vrcp.f32 %v2922_v18  ;;  %v2919_v39 = vpop.xlane.xlu0 %2918 }
0x1057   :  { %5288 = vrcp.f32 %v2919_v39 }
0x1059   :  { %v2928_v17 = vpop.xlane.xlu1 %2927 }
0x105a   :  { %5290 = vrcp.f32 %v2928_v17  ;;  %v2925_v19 = vpop.xlane.xlu0 %2924 }
0x105b   :  { %5292 = vrcp.f32 %v2925_v19 }
0x105c   :  { %v5283_v36 = vpop.eup %5282 }
0x105d   :  { %v5285_v23 = vpop.eup %5284  ;;  %v2934_v12 = vpop.xlane.xlu1 %2933  ;;  %v3008_v41 = vmul.f32 %v5283_v36, %v6960_v9 }
0x105e   :  { %5294 = vrcp.f32 %v2934_v12  ;;  %v2931_v49 = vpop.xlane.xlu0 %2930  ;;  %v3007_v25 = vmul.f32 %v5285_v23, %v6966_v42 }
0x105f   :  { %5296 = vrcp.f32 %v2931_v49 }
0x1060   :  { %v5287_v43 = vpop.eup %5286  ;;  %4609 = vmatprep.mubr.msk.f32.mxu1 %vm519_vm0, %v3007_v25 }
0x1061   :  { %v5289_v55 = vpop.eup %5288  ;;  %v2940_v35 = vpop.xlane.xlu1 %2939  ;;  %4610 = vmatmul.mubr.msk.f32.vlgmr.msra.gmra.mrb[74].mxu1 %vm519_vm0, %v3008_v41  ;;  %v3010_v21 = vmul.f32 %v5287_v43, %v6976_v32 }
0x1062   :  { %5298 = vrcp.f32 %v2940_v35  ;;  %v2937_v59 = vpop.xlane.xlu0 %2936  ;;  %v3009_v8 = vmul.f32 %v5289_v55, %v6982_v47 }
0x1063   :  { %5300 = vrcp.f32 %v2937_v59 }
0x1064   :  { %v5291_v45 = vpop.eup %5290  ;;  %4612 = vmatprep.mubr.msk.f32.mxu1 %vm519_vm0, %v3009_v8 }
0x1065   :  { %v5293_v42 = vpop.eup %5292  ;;  %v2946_v9 = vpop.xlane.xlu1 %2945  ;;  %4613 = vmatmul.mubr.msk.f32.gmra.mrb[76].mxu1 %vm519_vm0, %v3010_v21  ;;  %v3012_v20 = vmul.f32 %v5291_v45, %v6992_v61 }
0x1066   :  { %5302 = vrcp.f32 %v2946_v9  ;;  %v2943_v63 = vpop.xlane.xlu0 %2942  ;;  %v3011_v22 = vmul.f32 %v5293_v42, %v6998_v40  ;;  %v3972_v9 = vld [vmem:[%s7402_s10 + $0x90] sm:$0xff] }
0x1067   :  { %5304 = vrcp.f32 %v2943_v63 }
0x1068   :  { %v5295_v28 = vpop.eup %5294  ;;  %4615 = vmatprep.mubr.msk.f32.mxu1 %vm519_vm0, %v3011_v22  ;;  %v3974_v22 = vld [vmem:[%s7402_s10 + $0xa0] sm:$0xff] }
0x1069   :  { %v5297_v47 = vpop.eup %5296  ;;  %v2952_v46 = vpop.xlane.xlu1 %2951  ;;  %4616 = vmatmul.mubr.msk.f32.gmra.mrb[78].mxu1 %vm519_vm0, %v3012_v20  ;;  %v3014_v3 = vmul.f32 %v5295_v28, %v7008_v56  ;;  %v3975_v20 = vld [vmem:[%s7402_s10 + $0xa8] sm:$0xff] }
0x106a   :  { %5306 = vrcp.f32 %v2952_v46  ;;  %v2949_v32 = vpop.xlane.xlu0 %2948  ;;  %v3013_v57 = vmul.f32 %v5297_v47, %v7014_v50  ;;  %v5008_v28 = vpack.c.bf16 %v3975_v20, %v3974_v22  ;;  %v3976_v47 = vld [vmem:[%s7402_s10 + $0xb0] sm:$0xff]  ;;  %v3977_v46 = vld [vmem:[%s7402_s10 + $0xb8] sm:$0xff]  ;;  %v5456_v20 = vld [vmem:[%s7433_s26 + $0x68] sm:$0xff] }
0x106b   :  { %5308 = vrcp.f32 %v2949_v32  ;;  %v5012_v32 = vpack.c.bf16 %v3977_v46, %v3976_v47  ;;  %v5457_v46 = vld [vmem:[%s7433_s26 + $0x60] sm:$0xff] }
0x106c   :  { %v5299_v0 = vpop.eup %5298  ;;  %4618 = vmatprep.mubr.msk.f32.mxu1 %vm519_vm0, %v3013_v57  ;;  %v3978_v57 = vld [vmem:[%s7402_s10 + $0xc0] sm:$0xff] }
0x106d   :  { %v5301_v40 = vpop.eup %5300  ;;  %v2958_v60 = vpop.xlane.xlu1 %2957  ;;  %4619 = vmatmul.mubr.msk.f32.gmra.mrb[80].mxu1 %vm519_vm0, %v3014_v3  ;;  %v3016_v6 = vmul.f32 %v5299_v0, %v7024_v15  ;;  %v3979_v3 = vld [vmem:[%s7402_s10 + $0xc8] sm:$0xff] }
0x106e   :  { %5310 = vrcp.f32 %v2958_v60  ;;  %v2955_v61 = vpop.xlane.xlu0 %2954  ;;  %v3015_v4 = vmul.f32 %v5301_v40, %v7030_v13  ;;  %v5016_v0 = vpack.c.bf16 %v3979_v3, %v3978_v57  ;;  %v3980_v40 = vld [vmem:[%s7402_s10 + $0xd0] sm:$0xff]  ;;  %v3981_v60 = vld [vmem:[%s7402_s10 + $0xd8] sm:$0xff] }
0x106f   :  { %5312 = vrcp.f32 %v2955_v61  ;;  %v5020_v61 = vpack.c.bf16 %v3981_v60, %v3980_v40 }
0x1070   :  { %v5303_v2 = vpop.eup %5302  ;;  %4621 = vmatprep.mubr.msk.f32.mxu1 %vm519_vm0, %v3015_v4  ;;  %v3982_v4 = vld [vmem:[%s7402_s10 + $0xe0] sm:$0xff] }
0x1071   :  { %v5305_v50 = vpop.eup %5304  ;;  %v2964_v5 = vpop.xlane.xlu1 %2963  ;;  %4622 = vmatmul.mubr.msk.f32.gmra.mrb[82].mxu1 %vm519_vm0, %v3016_v6  ;;  %v3018_v58 = vmul.f32 %v5303_v2, %v7040_v31  ;;  %v3983_v6 = vld [vmem:[%s7402_s10 + $0xe8] sm:$0xff] }
0x1072   :  { %5314 = vrcp.f32 %v2964_v5  ;;  %v2961_v56 = vpop.xlane.xlu0 %2960  ;;  %v3017_v29 = vmul.f32 %v5305_v50, %v7046_v53  ;;  %v5024_v2 = vpack.c.bf16 %v3983_v6, %v3982_v4  ;;  %v3984_v50 = vld [vmem:[%s7402_s10 + $0xf0] sm:$0xff]  ;;  %v3985_v5 = vld [vmem:[%s7402_s10 + $0xf8] sm:$0xff] }
0x1073   :  { %5316 = vrcp.f32 %v2961_v56  ;;  %v5028_v56 = vpack.c.bf16 %v3985_v5, %v3984_v50  ;;  %v5460_v50 = vld [vmem:[%s7433_s26 + $0x88] sm:$0xff] }
0x1074   :  { %v5307_v18 = vpop.eup %5306  ;;  %4624 = vmatprep.mubr.msk.f32.mxu1 %vm519_vm0, %v3017_v29 }
0x1075   :  { %v5309_v13 = vpop.eup %5308  ;;  %v2970_v39 = vpop.xlane.xlu1 %2969  ;;  %4625 = vmatmul.mubr.msk.f32.gmra.mrb[84].mxu1 %vm519_vm0, %v3018_v58  ;;  %v3020_v19 = vmul.f32 %v5307_v18, %v7056_v52  ;;  %v5446_v58 = vld [vmem:[%s7433_s26 + $0x8] sm:$0xff] }
0x1076   :  { %5318 = vrcp.f32 %v2970_v39  ;;  %v2967_v15 = vpop.xlane.xlu0 %2966  ;;  %v3019_v17 = vmul.f32 %v5309_v13, %v7062_v48  ;;  %v5447_v39 = vld [vmem:[%s7433_s26] sm:$0xff] }
0x1077   :  { %5320 = vrcp.f32 %v2967_v15 }
0x1078   :  { %v5311_v36 = vpop.eup %5310  ;;  %4627 = vmatprep.mubr.msk.f32.mxu1 %vm519_vm0, %v3019_v17 }
0x1079   :  { %v5313_v53 = vpop.eup %5312  ;;  %v2976_v23 = vpop.xlane.xlu1 %2975  ;;  %4628 = vmatmul.mubr.msk.f32.gmra.mrb[86].mxu1 %vm519_vm0, %v3020_v19  ;;  %v3022_v49 = vmul.f32 %v5311_v36, %v7072_v11  ;;  %v5448_v36 = vld [vmem:[%s7433_s26 + $0x18] sm:$0xff] }
0x107a   :  { %5322 = vrcp.f32 %v2976_v23  ;;  %v2973_v31 = vpop.xlane.xlu0 %2972  ;;  %v3021_v12 = vmul.f32 %v5313_v53, %v7078_v38 }
0x107b   :  { %5324 = vrcp.f32 %v2973_v31  ;;  %v5449_v31 = vld [vmem:[%s7433_s26 + $0x10] sm:$0xff] }
0x107c   :  { %v5315_v25 = vpop.eup %5314  ;;  %4630 = vmatprep.mubr.msk.f32.mxu1 %vm519_vm0, %v3021_v12 }
0x107d   :  { %v5317_v48 = vpop.eup %5316  ;;  %v2982_v41 = vpop.xlane.xlu1 %2981  ;;  %4631 = vmatmul.mubr.msk.f32.gmra.mrb[88].mxu1 %vm519_vm0, %v3022_v49  ;;  %v3024_v55 = vmul.f32 %v5315_v25, %v7088_v51 }
0x107e   :  { %5326 = vrcp.f32 %v2982_v41  ;;  %v2979_v52 = vpop.xlane.xlu0 %2978  ;;  %v3023_v43 = vmul.f32 %v5317_v48, %v7093_v27  ;;  %v5450_v48 = vld [vmem:[%s7433_s26 + $0x28] sm:$0xff] }
0x107f   :  { %5328 = vrcp.f32 %v2979_v52 }
0x1080   :  { %v5319_v35 = vpop.eup %5318  ;;  %4633 = vmatprep.mubr.msk.f32.mxu1 %vm519_vm0, %v3023_v43  ;;  %v5451_v43 = vld [vmem:[%s7433_s26 + $0x20] sm:$0xff] }
0x1081   :  { %v5321_v38 = vpop.eup %5320  ;;  %4634 = vmatmul.mubr.msk.f32.gmra.mrb[90].mxu1 %vm519_vm0, %v3024_v55  ;;  %v3026_v59 = vmul.f32 %v5319_v35, %v7102_v30 }
0x1082   :  { %v3025_v11 = vmul.f32 %v5321_v38, %v7107_v14 }
0x1084   :  { %v5323_v8 = vpop.eup %5322  ;;  %4636 = vmatprep.mubr.msk.f32.mxu1 %vm519_vm0, %v3025_v11 }
0x1085   :  { %v5325_v21 = vpop.eup %5324  ;;  %4637 = vmatmul.mubr.msk.f32.gmra.mrb[92].mxu1 %vm519_vm0, %v3026_v59  ;;  %v3028_v51 = vmul.f32 %v5323_v8, %v7116_v1  ;;  %v3971_v1 = vld [vmem:[%s7402_s10 + $0x88] sm:$0xff]  ;;  %v5452_v8 = vld [vmem:[%s7433_s26 + $0x30] sm:$0xff] }
0x1086   :  { %v3027_v27 = vmul.f32 %v5325_v21, %v7121_v54  ;;  %v3970_v54 = vld [vmem:[%s7402_s10 + $0x80] sm:$0xff] }
0x1087   :  { %v5000_v63 = vpack.c.bf16 %v3971_v1, %v3970_v54  ;;  %v5454_v1 = vld [vmem:[%s7433_s26 + $0x58] sm:$0xff] }
0x1088   :  { %v5327_v45 = vpop.eup %5326  ;;  %4639 = vmatprep.mubr.msk.f32.mxu1 %vm519_vm0, %v3027_v27 }
0x1089   :  { %v5329_v42 = vpop.eup %5328  ;;  %4640 = vmatmul.mubr.msk.f32.gmra.mrb[94].mxu1 %vm519_vm0, %v3028_v51  ;;  %v3030_v30 = vmul.f32 %v5327_v45, %v7130_v34  ;;  %v3973_v34 = vld [vmem:[%s7402_s10 + $0x98] sm:$0xff]  ;;  %5001 = vmatprep.subr.bf16.mxu1 %v5000_v63 }
0x108a   :  { %v3029_v14 = vmul.f32 %v5329_v42, %v7135_v24  ;;  %v5004_v24 = vpack.c.bf16 %v3973_v34, %v3972_v9  ;;  %5003 = vmatpush3.bf16.msra.mxu1 %v5000_v63 }
0x108c   :  { %4642 = vmatprep.mubr.msk.f32.mxu1 %vm519_vm0, %v3029_v14  ;;  %5005 = vmatprep.subr.bf16.mxu1 %v5004_v24  ;;  %v5453_v14 = vld [vmem:[%s7433_s26 + $0x40] sm:$0xff] }
0x108d   :  { %4643 = vmatmul.mubr.msk.f32.gmra.mrb[96].mxu1 %vm519_vm0, %v3030_v30 }
0x108e   :  { %5007 = vmatpush3.bf16.msra.mxu1 %v5004_v24 }
0x108f   :  { %5009 = vmatprep.subr.bf16.mxu1 %v5008_v28 }
0x1092   :  { %5011 = vmatpush3.bf16.msra.mxu1 %v5008_v28 }
0x1093   :  { %5013 = vmatprep.subr.bf16.mxu1 %v5012_v32 }
0x1096   :  { %5015 = vmatpush3.bf16.msra.mxu1 %v5012_v32 }
0x1097   :  { %5017 = vmatprep.subr.bf16.mxu1 %v5016_v0 }
0x109a   :  { %5019 = vmatpush3.bf16.msra.mxu1 %v5016_v0  ;;  %v5458_v0 = vld [vmem:[%s7433_s26 + $0x78] sm:$0xff] }
0x109b   :  { %5021 = vmatprep.subr.bf16.mxu1 %v5020_v61 }
0x109e   :  { %5023 = vmatpush3.bf16.msra.mxu1 %v5020_v61  ;;  %v5459_v61 = vld [vmem:[%s7433_s26 + $0x70] sm:$0xff] }
0x109f   :  { %5025 = vmatprep.subr.bf16.mxu1 %v5024_v2 }
0x10a2   :  { %5027 = vmatpush3.bf16.msra.mxu1 %v5024_v2 }
0x10a3   :  { %5029 = vmatprep.subr.bf16.mxu1 %v5028_v56 }
0x10a6   :  { %5031 = vmatpush3.bf16.msra.mxu1 %v5028_v56 }
0x1134   :  { %v4611_v29 = vpop.f32.mrb[74].mxu1 }
0x1135   :  { %v3289_v18 = vmul.f32 %v5446_v58, %v4611_v29  ;;  %v3169_v13 = vpop.f32.mrb[75].mxu1  ;;  %v5461_v29 = vld [vmem:[%s7433_s26 + $0x80] sm:$0xff] }
0x1136   :  { %v3288_v15 = vmul.f32 %v5447_v39, %v3169_v13  ;;  %v5462_v39 = vld [vmem:[%s7433_s26 + $0x98] sm:$0xff] }
0x1138   :  { %v4965_v17 = vpack.c.bf16 %v3289_v18, %v3288_v15  ;;  %v4614_v19 = vpop.f32.mrb[76].mxu1 }
0x1139   :  { %v3291_v53 = vmul.f32 %v5448_v36, %v4614_v19  ;;  %v3179_v23 = vpop.f32.mrb[77].mxu1  ;;  %v5463_v19 = vld [vmem:[%s7433_s26 + $0x90] sm:$0xff] }
0x113a   :  { %v3290_v12 = vmul.f32 %v5449_v31, %v3179_v23  ;;  %4966 = vmatpush1.bf16.msra.mxu0 %v4965_v17  ;;  %v5464_v31 = vld [vmem:[%s7433_s26 + $0xa8] sm:$0xff] }
0x113b   :  { %4967 = vmatprep.subr.bf16.mxu0 %v5700_v26 }
0x113c   :  { %v4968_v49 = vpack.c.bf16 %v3291_v53, %v3290_v12  ;;  %v4617_v25 = vpop.f32.mrb[78].mxu1 }
0x113d   :  { %v3293_v41 = vmul.f32 %v5450_v48, %v4617_v25  ;;  %v3189_v52 = vpop.f32.mrb[79].mxu1  ;;  %v5465_v25 = vld [vmem:[%s7433_s26 + $0xa0] sm:$0xff] }
0x113e   :  { %v3292_v55 = vmul.f32 %v5451_v43, %v3189_v52  ;;  %4969 = vmatpush1.bf16.msra.mxu0 %v4968_v49  ;;  %v5466_v43 = vld [vmem:[%s7433_s26 + $0xb8] sm:$0xff] }
0x113f   :  { %4970 = vmatprep.subr.bf16.mxu0 %v5700_v26 }
0x1140   :  { %v4971_v35 = vpack.c.bf16 %v3293_v41, %v3292_v55  ;;  %v4620_v38 = vpop.f32.mrb[80].mxu1 }
0x1141   :  { %v3295_v11 = vmul.f32 %v6798_v62, %v4620_v38  ;;  %v3199_v59 = vpop.f32.mrb[81].mxu1  ;;  %v5467_v38 = vld [vmem:[%s7433_s26 + $0xb0] sm:$0xff] }
0x1142   :  { %v3294_v21 = vmul.f32 %v5452_v8, %v3199_v59  ;;  %4972 = vmatpush1.bf16.msra.mxu0 %v4971_v35  ;;  %v5468_v8 = vld [vmem:[%s7435_s20] sm:$0xff] }
0x1143   :  { %4973 = vmatprep.subr.bf16.mxu0 %v5700_v26 }
0x1144   :  { %v4974_v27 = vpack.c.bf16 %v3295_v11, %v3294_v21  ;;  %v4623_v51 = vpop.f32.mrb[82].mxu1  ;;  %v5469_v21 = vld [vmem:[%s7435_s20 + $0x18] sm:$0xff] }
0x1145   :  { %v3297_v45 = vmul.f32 %v6807_v10, %v4623_v51  ;;  %v3209_v42 = vpop.f32.mrb[83].mxu1  ;;  %v5455_v10 = vld [vmem:[%s7433_s26 + $0x50] sm:$0xff] }
0x1146   :  { %v3296_v30 = vmul.f32 %v5453_v14, %v3209_v42  ;;  %4975 = vmatpush1.bf16.msra.mxu0 %v4974_v27  ;;  %v5470_v27 = vld [vmem:[%s7435_s20 + $0x10] sm:$0xff]  ;;  %v3986_v14 = vld [vmem:[#allocation11 + $0x1] ss:$0 sm:$0xff] }
0x1147   :  { %4976 = vmatprep.subr.bf16.mxu0 %v5700_v26 }
0x1148   :  { %v4977_v62 = vpack.c.bf16 %v3297_v45, %v3296_v30  ;;  %v4626_v54 = vpop.f32.mrb[84].mxu1 }
0x1149   :  { %v3299_v9 = vmul.f32 %v5454_v1, %v4626_v54  ;;  %v3219_v63 = vpop.f32.mrb[85].mxu1 }
0x114a   :  { %v3298_v34 = vmul.f32 %v5455_v10, %v3219_v63  ;;  %4978 = vmatpush1.bf16.msra.mxu0 %v4977_v62  ;;  %v3535_v10 = vld [vmem:[#allocation13 + $0x108] sm:$0xff] }
0x114b   :  { %4979 = vmatprep.subr.bf16.mxu0 %v5700_v26 }
0x114c   :  { %v4980_v24 = vpack.c.bf16 %v3299_v9, %v3298_v34  ;;  %v4629_v22 = vpop.f32.mrb[86].mxu1  ;;  %v3537_v34 = vld [vmem:[#allocation13 + $0x118] sm:$0xff] }
0x114d   :  { %v3301_v28 = vmul.f32 %v5456_v20, %v4629_v22  ;;  %v3229_v47 = vpop.f32.mrb[87].mxu1  ;;  %v5032_v22 = vpack.c.bf16 %v3537_v34, %v3535_v10  ;;  %v3536_v20 = vld [vmem:[#allocation13 + $0x110] sm:$0xff]  ;;  %v3693_v10 = vld [vmem:[#allocation14 + $0x180] sm:$0xff]  ;;  %v3694_v34 = vld [vmem:[#allocation14 + $0x188] sm:$0xff] }
0x114e   :  { %v3300_v32 = vmul.f32 %v5457_v46, %v3229_v47  ;;  %4981 = vmatpush1.bf16.msra.mxu0 %v4980_v24  ;;  %v3534_v24 = vld [vmem:[#allocation13 + $0x100] sm:$0xff]  ;;  %v3541_v47 = vld [vmem:[#allocation13 + $0x138] sm:$0xff] }
0x114f   :  { %4982 = vmatprep.subr.bf16.mxu0 %v5700_v26  ;;  %v5034_v46 = vpack.c.bf16 %v3536_v20, %v3534_v24  ;;  %v3677_v24 = vld [vmem:[#allocation14 + $0x100] sm:$0xff]  ;;  %v3678_v20 = vld [vmem:[#allocation14 + $0x108] sm:$0xff] }
0x1150   :  { %v4983_v57 = vpack.c.bf16 %v3301_v28, %v3300_v32  ;;  %v4632_v3 = vpop.f32.mrb[88].mxu1  ;;  %v3539_v28 = vld [vmem:[#allocation13 + $0x128] sm:$0xff] }
0x1151   :  { %v3303_v40 = vmul.f32 %v5458_v0, %v4632_v3  ;;  %v3239_v60 = vpop.f32.mrb[89].mxu1  ;;  %v5036_v32 = vpack.c.bf16 %v3541_v47, %v3539_v28  ;;  %v3540_v3 = vld [vmem:[#allocation13 + $0x130] sm:$0xff]  ;;  %v3545_v0 = vld [vmem:[#allocation13 + $0x158] sm:$0xff] }
0x1152   :  { %v3302_v4 = vmul.f32 %v5459_v61, %v3239_v60  ;;  %4984 = vmatpush1.bf16.msra.mxu0 %v4983_v57  ;;  %v3538_v57 = vld [vmem:[#allocation13 + $0x120] sm:$0xff]  ;;  %v3544_v61 = vld [vmem:[#allocation13 + $0x150] sm:$0xff]  ;;  %v3696_v47 = vld [vmem:[#allocation14 + $0x198] sm:$0xff] }
0x1153   :  { %4985 = vmatprep.subr.bf16.mxu0 %v5700_v26  ;;  %v3542_v60 = vld [vmem:[#allocation13 + $0x140] sm:$0xff]  ;;  %v3695_v28 = vld [vmem:[#allocation14 + $0x190] sm:$0xff] }
0x1154   :  { %v4986_v6 = vpack.c.bf16 %v3303_v40, %v3302_v4  ;;  %v4635_v2 = vpop.f32.mrb[90].mxu1  ;;  %v5042_v4 = vpack.c.bf16 %v3544_v61, %v3542_v60  ;;  %v3681_v60 = vld [vmem:[#allocation14 + $0x120] sm:$0xff]  ;;  %v3682_v61 = vld [vmem:[#allocation14 + $0x128] sm:$0xff] }
0x1155   :  { %v3305_v5 = vmul.f32 %v5460_v50, %v4635_v2  ;;  %v3249_v56 = vpop.f32.mrb[91].mxu1 }
0x1156   :  { %v3304_v58 = vmul.f32 %v5461_v29, %v3249_v56  ;;  %4987 = vmatpush1.bf16.msra.mxu0 %v4986_v6 }
0x1157   :  { %4988 = vmatprep.subr.bf16.mxu0 %v5700_v26 }
0x1158   :  { %v4989_v18 = vpack.c.bf16 %v3305_v5, %v3304_v58  ;;  %v4638_v13 = vpop.f32.mrb[92].mxu1  ;;  %v7344_v58 = vld [vmem:[%s7397_s5] ss:$0 sm:$0xff] }
0x1159   :  { %v3307_v15 = vmul.f32 %v5462_v39, %v4638_v13  ;;  %v3259_v17 = vpop.f32.mrb[93].mxu1 }
0x115a   :  { %v3306_v36 = vmul.f32 %v5463_v19, %v3259_v17  ;;  %4990 = vmatpush1.bf16.msra.mxu0 %v4989_v18  ;;  %v3547_v17 = vld [vmem:[#allocation13 + $0x168] sm:$0xff]  ;;  %v3549_v19 = vld [vmem:[#allocation13 + $0x178] sm:$0xff] }
0x115b   :  { %4991 = vmatprep.subr.bf16.mxu0 %v5700_v26 }
0x115c   :  { %v4992_v53 = vpack.c.bf16 %v3307_v15, %v3306_v36  ;;  %v4641_v23 = vpop.f32.mrb[94].mxu1  ;;  %v5044_v36 = vpack.c.bf16 %v3549_v19, %v3547_v17  ;;  %v3989_v17 = vld [vmem:[%s7404_s12 + $0x1] ss:$0 sm:$0xff] }
0x115d   :  { %v3309_v12 = vmul.f32 %v5464_v31, %v4641_v23  ;;  %v3269_v49 = vpop.f32.mrb[95].mxu1  ;;  %v3548_v23 = vld [vmem:[#allocation13 + $0x170] sm:$0xff] }
0x115e   :  { %v3308_v48 = vmul.f32 %v5465_v25, %v3269_v49  ;;  %4993 = vmatpush1.bf16.msra.mxu0 %v4992_v53  ;;  %v3546_v53 = vld [vmem:[#allocation13 + $0x160] sm:$0xff]  ;;  %v3553_v49 = vld [vmem:[#allocation13 + $0x198] sm:$0xff] }
0x115f   :  { %4994 = vmatprep.subr.bf16.mxu0 %v5700_v26  ;;  %v5046_v31 = vpack.c.bf16 %v3548_v23, %v3546_v53  ;;  %v3990_v53 = vld [vmem:[%s7405_s13 + $0x1] ss:$0 sm:$0xff] }
0x1160   :  { %v4995_v41 = vpack.c.bf16 %v3309_v12, %v3308_v48  ;;  %v4644_v52 = vpop.f32.mrb[96].mxu1  ;;  %v3551_v12 = vld [vmem:[#allocation13 + $0x188] sm:$0xff]  ;;  %v3550_v48 = vld [vmem:[#allocation13 + $0x180] sm:$0xff] }
0x1161   :  { %v3311_v55 = vmul.f32 %v5466_v43, %v4644_v52  ;;  %v3279_v35 = vpop.f32.mrb[97].mxu1  ;;  %v5048_v25 = vpack.c.bf16 %v3553_v49, %v3551_v12  ;;  %v3555_v43 = vld [vmem:[#allocation13 + $0x1a8] sm:$0xff] }
0x1162   :  { %v3310_v11 = vmul.f32 %v5467_v38, %v3279_v35  ;;  %4996 = vmatpush1.bf16.msra.mxu0 %v4995_v41  ;;  %v3552_v41 = vld [vmem:[#allocation13 + $0x190] sm:$0xff]  ;;  %v3554_v38 = vld [vmem:[#allocation13 + $0x1a0] sm:$0xff] }
0x1163   :  { %4997 = vmatprep.subr.bf16.mxu0 %v5700_v26  ;;  %v5050_v52 = vpack.c.bf16 %v3552_v41, %v3550_v48  ;;  %v3700_v48 = vld [vmem:[#allocation14 + $0x1b8] sm:$0xff] }
0x1164   :  { %v4998_v59 = vpack.c.bf16 %v3311_v55, %v3310_v11  ;;  %v3557_v55 = vld [vmem:[#allocation13 + $0x1b8] sm:$0xff]  ;;  %v3556_v11 = vld [vmem:[#allocation13 + $0x1b0] sm:$0xff] }
0x1165   :  { %v5052_v35 = vpack.c.bf16 %v3557_v55, %v3555_v43  ;;  %v3684_v43 = vld [vmem:[#allocation14 + $0x138] sm:$0xff]  ;;  %v3702_v55 = vld [vmem:[#allocation14 + $0x1c8] sm:$0xff] }
0x1166   :  { %4999 = vmatpush1.bf16.msra.mxu0 %v4998_v59  ;;  %v5054_v59 = vpack.c.bf16 %v3556_v11, %v3554_v38  ;;  %v3685_v38 = vld [vmem:[#allocation14 + $0x140] sm:$0xff]  ;;  %v3686_v11 = vld [vmem:[#allocation14 + $0x148] sm:$0xff] }
0x1167   :  { %5033 = vmatprep.subr.bf16.mxu0 %v5032_v22  ;;  %v5064_v22 = vpack.c.bf16 %v3694_v34, %v3693_v10  ;;  %v3708_v10 = vld [vmem:[#allocation14 + $0x1f8] sm:$0xff] }
0x1169   :  { %3377 = vmatmul.mubr.f32.vlgmr.msra.gmra.mrb[72].mxu0 %v5468_v8  ;;  %v3559_v8 = vld [vmem:[#allocation13 + $0x1c8] sm:$0xff]  ;;  %5065 = vmatprep.subr.bf16.mxu1 %v5064_v22  ;;  %v3692_v22 = vld [vmem:[#allocation14 + $0x178] sm:$0xff] }
0x116a   :  { %3969 = vmatprep.mubr.msk.f32.mxu0 %vm1579_vm1, %v5469_v21  ;;  %5035 = vmatpush1.bf16.msra.mxu0 %v5034_v46  ;;  %v3561_v21 = vld [vmem:[#allocation13 + $0x1d8] sm:$0xff]  ;;  %v5066_v46 = vpack.c.bf16 %v3678_v20, %v3677_v24  ;;  %v3691_v24 = vld [vmem:[#allocation14 + $0x170] sm:$0xff] }
0x116b   :  { %5037 = vmatprep.subr.bf16.mxu0 %v5036_v32  ;;  %v5068_v32 = vpack.c.bf16 %v3696_v47, %v3695_v28  ;;  %v5094_v20 = vpack.c.bf16 %v3692_v22, %v3691_v24  ;;  %v3991_v28 = vld [vmem:[%s7407_s15 + $0x2] sm:$0x3] }
0x116c   :  { %v3572_v47 = vrot.slane %v3991_v28, %v5953_v33 }
0x116d   :  { %3382 = vmatmul.mubr.f32.gmra.mrb[74].mxu0 %v5470_v27  ;;  %v5056_v27 = vpack.c.bf16 %v3561_v21, %v3559_v8  ;;  %v3703_v8 = vld [vmem:[#allocation14 + $0x1d0] sm:$0xff] }
0x116e   :  { %3643 = vmatprep.mubr.f32.mxu0 %v5699_v7 }
0x123c   :  { %v3378_v26 = vpop.f32.mrb[72].mxu0 }
0x123d   :  { %v3380_v51 = vpop.f32.mrb[73].mxu0  ;;  %4677 = vmatprep.mubr.f32.mxu1 %v3378_v26  ;;  %v3558_v26 = vld [vmem:[#allocation13 + $0x1c0] sm:$0xff] }
0x123e   :  { %v3560_v51 = vld [vmem:[#allocation13 + $0x1d0] sm:$0xff] }
0x1240   :  { %v3383_v45 = vpop.f32.mrb[74].mxu0 }
0x1241   :  { %v3385_v42 = vpop.f32.mrb[75].mxu0  ;;  %4678 = vmatmul.mubr.f32.vlgmr.msra.gmra.mrb[98].mxu1 %v3383_v45  ;;  %v5058_v45 = vpack.c.bf16 %v3560_v51, %v3558_v26  ;;  %v3688_v26 = vld [vmem:[#allocation14 + $0x158] sm:$0xff] }
0x1242   :  { %v3563_v42 = vld [vmem:[#allocation13 + $0x1e8] sm:$0xff]  ;;  %5067 = vmatpush3.bf16.msra.mxu1 %v5066_v46  ;;  %v3576_v46 = vrot.slane %v3991_v28, %v5957_v44 }
0x1243   :  { %5069 = vmatprep.subr.bf16.mxu1 %v5068_v32 }
0x1314   :  { %v4679_v30 = vpop.f32.mrb[98].mxu1 }
0x1315   :  { %v3484_v62 = vadd.f32 %v4679_v30, %v3986_v14  ;;  %v3478_v54 = vpop.f32.mrb[99].mxu1 }
0x1316   :  { %v3479_v1 = vadd.f32 %v3986_v14, %v3478_v54  ;;  %v3565_v14 = vld [vmem:[#allocation13 + $0x1f8] sm:$0xff]  ;;  %v3564_v54 = vld [vmem:[#allocation13 + $0x1f0] sm:$0xff] }
0x1317   :  { %v7328_v9 = vadd.f32 %v3484_v62, %v6654_v37  ;;  %v3543_v37 = vld [vmem:[#allocation13 + $0x148] sm:$0xff]  ;;  %v5060_v30 = vpack.c.bf16 %v3565_v14, %v3563_v42  ;;  %v3562_v62 = vld [vmem:[#allocation13 + $0x1e0] sm:$0xff] }
0x1318   :  { %v7331_v63 = vadd.f32 %v3479_v1, %v6650_v16  ;;  %v5038_v16 = vpack.c.bf16 %v3540_v3, %v3538_v57  ;;  %v5040_v40 = vpack.c.bf16 %v3545_v0, %v3543_v37  ;;  %v5062_v1 = vpack.c.bf16 %v3564_v54, %v3562_v62  ;;  %v3679_v57 = vld [vmem:[#allocation14 + $0x110] sm:$0xff]  ;;  %v3680_v3 = vld [vmem:[#allocation14 + $0x118] sm:$0xff]  ;;  %v3697_v37 = vld [vmem:[#allocation14 + $0x1a0] sm:$0xff] }
0x1319   :  { %3495 = vadd.xlane.f32.xlu1 %v7328_v9  ;;  %v3698_v0 = vld [vmem:[#allocation14 + $0x1a8] sm:$0xff] }
0x131a   :  { %3493 = vadd.xlane.f32.xlu0 %v7331_v63  ;;  %5039 = vmatpush1.bf16.msra.mxu0 %v5038_v16  ;;  %v5070_v16 = vpack.c.bf16 %v3680_v3, %v3679_v57  ;;  %v3706_v42 = vld [vmem:[#allocation14 + $0x1e8] sm:$0xff] }
0x131b   :  { %5041 = vmatprep.subr.bf16.mxu0 %v5040_v40  ;;  %v5072_v40 = vpack.c.bf16 %v3698_v0, %v3697_v37  ;;  %v3690_v62 = vld [vmem:[#allocation14 + $0x168] sm:$0xff] }
0x131c   :  { %5071 = vmatpush3.bf16.msra.mxu1 %v5070_v16 }
0x131d   :  { %5073 = vmatprep.subr.bf16.mxu1 %v5072_v40 }
0x131e   :  { %5043 = vmatpush1.bf16.msra.mxu0 %v5042_v4  ;;  %v5074_v4 = vpack.c.bf16 %v3682_v61, %v3681_v60 }
0x131f   :  { %5045 = vmatprep.subr.bf16.mxu0 %v5044_v36 }
0x1320   :  { %5075 = vmatpush3.bf16.msra.mxu1 %v5074_v4 }
0x1322   :  { %5047 = vmatpush1.bf16.msra.mxu0 %v5046_v31 }
0x1323   :  { %5049 = vmatprep.subr.bf16.mxu0 %v5048_v25  ;;  %v3699_v25 = vld [vmem:[#allocation14 + $0x1b0] sm:$0xff] }
0x1324   :  { %v5076_v41 = vpack.c.bf16 %v3700_v48, %v3699_v25 }
0x1326   :  { %5051 = vmatpush1.bf16.msra.mxu0 %v5050_v52  ;;  %v3683_v52 = vld [vmem:[#allocation14 + $0x130] sm:$0xff]  ;;  %5077 = vmatprep.subr.bf16.mxu1 %v5076_v41 }
0x1327   :  { %5053 = vmatprep.subr.bf16.mxu0 %v5052_v35 }
0x132a   :  { %5055 = vmatpush1.bf16.msra.mxu0 %v5054_v59  ;;  %v5082_v59 = vpack.c.bf16 %v3686_v11, %v3685_v38 }
0x132b   :  { %5057 = vmatprep.subr.bf16.mxu0 %v5056_v27  ;;  %v3687_v27 = vld [vmem:[#allocation14 + $0x150] sm:$0xff] }
0x132c   :  { %v5086_v51 = vpack.c.bf16 %v3688_v26, %v3687_v27 }
0x132e   :  { %5059 = vmatpush1.bf16.msra.mxu0 %v5058_v45  ;;  %v3705_v45 = vld [vmem:[#allocation14 + $0x1e0] sm:$0xff] }
0x132f   :  { %5061 = vmatprep.subr.bf16.mxu0 %v5060_v30  ;;  %v5088_v14 = vpack.c.bf16 %v3706_v42, %v3705_v45  ;;  %v3689_v30 = vld [vmem:[#allocation14 + $0x160] sm:$0xff] }
0x1330   :  { %v5090_v54 = vpack.c.bf16 %v3690_v62, %v3689_v30 }
0x1332   :  { %5063 = vmatpush1.bf16.msra.mxu0 %v5062_v1  ;;  %v3707_v1 = vld [vmem:[#allocation14 + $0x1f0] sm:$0xff] }
0x1333   :  { %v5092_v34 = vpack.c.bf16 %v3708_v10, %v3707_v1 }
0x13a6   :  { %v3496_v6 = vpop.xlane.xlu1 %3495 }
0x13a7   :  { %v3498_v2 = vmul.f32 0.020833334, %v3496_v6  ;;  %v3494_v50 = vpop.xlane.xlu0 %3493 }
0x13a8   :  { %v3497_v5 = vmul.f32 0.020833334, %v3494_v50 }
0x13a9   :  { %v7336_v56 = vsub.f32 %v7328_v9, %v3498_v2 }
0x13aa   :  { %v7339_v29 = vsub.f32 %v7331_v63, %v3497_v5 }
0x13ab   :  { %v3502_v18 = vmul.f32 %v7344_v58, %v7336_v56 }
0x13ac   :  { %v3501_v13 = vmul.f32 %v7344_v58, %v7339_v29 }
0x13ad   :  { %v3504_v39 = vmul.f32 %v3502_v18, %v3502_v18 }
0x13ae   :  { %v3503_v15 = vmul.f32 %v3501_v13, %v3501_v13 }
0x13af   :  { %3507 = vadd.xlane.f32.xlu1 %v3504_v39 }
0x13b0   :  { %3505 = vadd.xlane.f32.xlu0 %v3503_v15 }
0x143c   :  { %v3508_v6 = vpop.xlane.xlu1 %3507 }
0x143d   :  { %v3510_v2 = vmul.f32 0.020833334, %v3508_v6  ;;  %v3506_v50 = vpop.xlane.xlu0 %3505 }
0x143e   :  { %v3509_v5 = vmul.f32 0.020833334, %v3506_v50 }
0x143f   :  { %v3512_v18 = vadd.f32 1e-05, %v3510_v2 }
0x1440   :  { %v3511_v13 = vadd.f32 1e-05, %v3509_v5 }
0x1441   :  { %5330 = vrsqrt.f32 %v3512_v18 }
0x1442   :  { %5332 = vrsqrt.f32 %v3511_v13 }
0x144b   :  { %v5331_v39 = vpop.eup %5330 }
0x144c   :  { %v5333_v15 = vpop.eup %5332  ;;  %v3516_v36 = vmul.f32 %v5331_v39, %v7336_v56  ;;  %v3701_v56 = vld [vmem:[#allocation14 + $0x1c0] sm:$0xff] }
0x144d   :  { %v3515_v19 = vmul.f32 %v5333_v15, %v7339_v29  ;;  %v5078_v29 = vpack.c.bf16 %v3684_v43, %v3683_v52  ;;  %v5080_v35 = vpack.c.bf16 %v3702_v55, %v3701_v56  ;;  %v3993_v52 = vld [vmem:[%s7409_s17 + $0x1] ss:$0 sm:$0xff] }
0x144e   :  { %v3524_v12 = vmul.f32 %v3989_v17, %v3516_v36 }
0x144f   :  { %v3523_v23 = vmul.f32 %v3989_v17, %v3515_v19  ;;  %5079 = vmatpush3.bf16.msra.mxu1 %v5078_v29 }
0x1450   :  { %v3532_v49 = vadd.f32 %v3990_v53, %v3524_v12  ;;  %5081 = vmatprep.subr.bf16.mxu1 %v5080_v35 }
0x1451   :  { %v3531_v31 = vadd.f32 %v3990_v53, %v3523_v23 }
0x1453   :  { %3644 = vmatmul.mubr.f32.vlgmr.msra.gmra.mrb[76].mxu0 %v3531_v31  ;;  %5083 = vmatpush3.bf16.msra.mxu1 %v5082_v59 }
0x1454   :  { %3649 = vmatprep.mubr.f32.mxu0 %v5699_v7  ;;  %v3704_v7 = vld [vmem:[#allocation14 + $0x1d8] sm:$0xff] }
0x1455   :  { %v5084_v21 = vpack.c.bf16 %v3704_v7, %v3703_v8 }
0x1457   :  { %3650 = vmatmul.mubr.f32.gmra.mrb[78].mxu0 %v3532_v49  ;;  %5085 = vmatprep.subr.bf16.mxu1 %v5084_v21 }
0x1458   :  { %5087 = vmatpush3.bf16.msra.mxu1 %v5086_v51 }
0x1459   :  { %5089 = vmatprep.subr.bf16.mxu1 %v5088_v14 }
0x145c   :  { %5091 = vmatpush3.bf16.msra.mxu1 %v5090_v54 }
0x145d   :  { %5093 = vmatprep.subr.bf16.mxu1 %v5092_v34  ;;  %v3994_v34 = vld [vmem:[%s7410_s18] ss:$0 sm:$0xff] }
0x1460   :  { %5095 = vmatpush3.bf16.msra.mxu1 %v5094_v20 }
0x1526   :  { %v3645_v32 = vpop.f32.mrb[76].mxu0 }
0x1527   :  { %v3646_v57 = vadd.f32 %v3645_v32, %v3572_v47  ;;  %v3647_v3 = vpop.f32.mrb[77].mxu0 }
0x1528   :  { %v3648_v37 = vadd.f32 %v3647_v3, %v3576_v46 }
0x1529   :  { %v3660_v0 = vmul.f32 0.70710677, %v3646_v57  ;;  %v3656_v13 = vmul.f32 0.5, %v3646_v57 }
0x152a   :  { %v3661_v16 = vmul.f32 0.70710677, %v3648_v37  ;;  %v3651_v40 = vpop.f32.mrb[78].mxu0  ;;  %v3657_v44 = vmul.f32 0.5, %v3648_v37 }
0x152b   :  { %5334 = verf.f32 %v3660_v0  ;;  %v3652_v60 = vadd.f32 %v3651_v40, %v3572_v47  ;;  %v3653_v61 = vpop.f32.mrb[79].mxu0 }
0x152c   :  { %5336 = verf.f32 %v3661_v16  ;;  %v3654_v4 = vadd.f32 %v3653_v61, %v3576_v46 }
0x152d   :  { %v3662_v6 = vmul.f32 0.70710677, %v3652_v60  ;;  %v3658_v31 = vmul.f32 0.5, %v3652_v60 }
0x152e   :  { %v3663_v2 = vmul.f32 0.70710677, %v3654_v4  ;;  %v3659_v53 = vmul.f32 0.5, %v3654_v4 }
0x152f   :  { %5338 = verf.f32 %v3662_v6 }
0x1530   :  { %5340 = verf.f32 %v3663_v2 }
0x1535   :  { %v5335_v50 = vpop.eup %5334 }
0x1536   :  { %v5337_v33 = vpop.eup %5336  ;;  %v3668_v5 = vadd.f32 1.0, %v5335_v50 }
0x1537   :  { %v3669_v18 = vadd.f32 1.0, %v5337_v33 }
0x1538   :  { %v3672_v19 = vmul.f32 %v3668_v5, %v3656_v13 }
0x1539   :  { %v5339_v39 = vpop.eup %5338  ;;  %v3673_v15 = vmul.f32 %v3669_v18, %v3657_v44 }
0x153a   :  { %v5341_v17 = vpop.eup %5340  ;;  %v3670_v36 = vadd.f32 1.0, %v5339_v39 }
0x153b   :  { %v3671_v23 = vadd.f32 1.0, %v5341_v17  ;;  %3773 = vmatprep.mubr.f32.mxu1 %v3673_v15 }
0x153c   :  { %3774 = vmatmul.mubr.f32.vlgmr.msra.gmra.mrb[100].mxu1 %v3672_v19  ;;  %v3674_v49 = vmul.f32 %v3670_v36, %v3658_v31 }
0x153d   :  { %v3675_v12 = vmul.f32 %v3671_v23, %v3659_v53 }
0x153f   :  { %3778 = vmatprep.mubr.f32.mxu1 %v3675_v12 }
0x1540   :  { %3779 = vmatmul.mubr.f32.gmra.mrb[102].mxu1 %v3674_v49 }
0x160f   :  { %v4294_v25 = vpop.f32.mrb[100].mxu1 }
0x1610   :  { %v4295_v48 = vpop.f32.mrb[101].mxu1 }
0x1611   :  { %v4296_v41 = vadd.f32 %v4295_v48, %v4294_v25 }
0x1613   :  { %v3784_v43 = vadd.f32 %v4296_v41, %v7331_v63  ;;  %v4297_v29 = vpop.f32.mrb[102].mxu1 }
0x1614   :  { %v4298_v56 = vpop.f32.mrb[103].mxu1 }
0x1615   :  { %v4299_v55 = vadd.f32 %v4298_v56, %v4297_v29  ;;  %v3794_v35 = vadd.f32 %v3993_v52, %v3784_v43 }
0x1617   :  { %v3785_v38 = vadd.f32 %v4299_v55, %v7328_v9  ;;  %3798 = vadd.xlane.f32.xlu0 %v3794_v35 }
0x1619   :  { %v3795_v11 = vadd.f32 %v3993_v52, %v3785_v38 }
0x161b   :  { %3800 = vadd.xlane.f32.xlu1 %v3795_v11 }
0x16a4   :  { %v3799_v59 = vpop.xlane.xlu0 %3798 }
0x16a5   :  { %v3802_v8 = vmul.f32 0.020833334, %v3799_v59 }
0x16a7   :  { %v3804_v7 = vsub.f32 %v3794_v35, %v3802_v8 }
0x16a8   :  { %v3801_v21 = vpop.xlane.xlu1 %3800 }
0x16a9   :  { %v3803_v27 = vmul.f32 0.020833334, %v3801_v21  ;;  %v3806_v26 = vmul.f32 %v7344_v58, %v3804_v7 }
0x16ab   :  { %v3805_v51 = vsub.f32 %v3795_v11, %v3803_v27  ;;  %v3808_v45 = vmul.f32 %v3806_v26, %v3806_v26 }
0x16ad   :  { %3810 = vadd.xlane.f32.xlu0 %v3808_v45  ;;  %v3807_v63 = vmul.f32 %v7344_v58, %v3805_v51  ;;  %v3995_v58 = vld [vmem:[%s7411_s19] ss:$0 sm:$0xff] }
0x16af   :  { %v3809_v42 = vmul.f32 %v3807_v63, %v3807_v63 }
0x16b1   :  { %3812 = vadd.xlane.f32.xlu1 %v3809_v42 }
0x173a   :  { %v3811_v14 = vpop.xlane.xlu0 %3810 }
0x173b   :  { %v3814_v30 = vmul.f32 0.020833334, %v3811_v14 }
0x173d   :  { %v3816_v9 = vadd.f32 1e-05, %v3814_v30 }
0x173e   :  { %v3813_v62 = vpop.xlane.xlu1 %3812 }
0x173f   :  { %5342 = vrsqrt.f32 %v3816_v9  ;;  %v3815_v54 = vmul.f32 0.020833334, %v3813_v62 }
0x1741   :  { %v3817_v1 = vadd.f32 1e-05, %v3815_v54 }
0x1743   :  { %5344 = vrsqrt.f32 %v3817_v1 }
0x1749   :  { %v5343_v10 = vpop.eup %5342 }
0x174a   :  { %v3820_v24 = vmul.f32 %v5343_v10, %v3804_v7 }
0x174c   :  { %v3828_v22 = vmul.f32 %v3994_v34, %v3820_v24 }
0x174d   :  { %v5345_v20 = vpop.eup %5344 }
0x174e   :  { %v3821_v28 = vmul.f32 %v5345_v20, %v3805_v51  ;;  %v3836_v47 = vadd.f32 %v3995_v58, %v3828_v22 }
0x1750   :  { %v3829_v46 = vmul.f32 %v3994_v34, %v3821_v28  ;;  %3838 = vst [vmem:[#allocation16] sm:$0xff] %v3836_v47 }
0x1752   :  { %v3837_v32 = vadd.f32 %v3995_v58, %v3829_v46 }
0x1754   :  { %3839 = vst [vmem:[#allocation16 + $0x8] sm:$0xff] %v3837_v32 }
0x1755   :  { %5659 = shalt.err (!%p5656_p12)
}
0x1756   :  { %s7436_s7 = sld [smem:[#allocation28_spill]] }
0x175c   :  { %s5660_s1 = scalar_lea.hbm %s7436_s7, 256 }
0x175d   :  { %p5661_p13 = scmp.ne.s32.totalorder %s7436_s7, %s5660_s1  ;;  %p5664_p0 = scmp.lt.u32.totalorder %s5660_s1, %s7436_s7 }
0x175f   :  { %p5666_p1 = pnand %p5664_p0, %p5661_p13 }
0x1761   :  { %5669 = shalt.err (!%p5666_p1)
}
0x1762   :  { %3851 = dma.vmem_to_hbm [thread:$0]  %s3846_s21, 256, %s7436_s7, [#allocation4], %s5690_s11, %s5690_s11, %s5691_s23  }
0x1763   :  { %5680 = dma.done.wait [#allocation4], 256  }
0x1764   :  { %5681 = vsyncadd [#allocation4], 4294967040 }
0x1765   :  { %3855 = vsyncpa [#allocation3], 1 }
0x1766   :  { %3856 = vsyncpa [#allocation6], 1 }
0x1767   :  { %3857 = vsyncpa [#allocation9], 1 }
0x1768   :  { %3858 = vsyncpa [#allocation12], 1 }
0x1769   :  { %3859 = vsyncpa [#allocation15], 1 }
0x176a   :  { %3860 = vsyncpa [#allocation4], 1 }

</bundles_post_ra>
